<compile_context>
chip_gen: v5e
topology: v5e:2x2
jax: 0.10.0
libtpu: 0.0.40
codegen_flags: <defaults>
</compile_context>

<pallas_src>
import jax
import jax.numpy as jnp
from jax import lax
from jax.experimental import pallas as pl
from jax.experimental.pallas import tpu as pltpu

LANES = 128


# ----------------------------- Pallas kernels ------------------------------ #

def _conv_pool_kernel(p_ref, w_ref, b_ref, o_ref):
    """conv (im2col matmul) + 2x2 max-pool + bias + ReLU.

    p_ref : (4, bm, Kd)   rows = (pool window, batch*pooled_position block)
    w_ref : (Kd, 128)     zero-padded (Kd, Co)
    b_ref : (1, 128)      zero-padded bias
    o_ref : (bm, 128)     lane-dense, channels-last
    """
    nw, bm, kd = p_ref.shape
    z = jnp.dot(p_ref[...].reshape(nw * bm, kd), w_ref[...],
                preferred_element_type=jnp.float32)
    z = z.reshape(nw, bm, z.shape[-1])
    o_ref[...] = jnp.maximum(jnp.max(z, axis=0) + b_ref[...], 0.0)


def _conv_mlp_kernel(p_ref, w2_ref, b2_ref, w1f_ref, b1f_ref,
                     w2f_ref, b2f_ref, w3f_ref, b3f_ref, o_ref):
    """conv2 + pool + bias + ReLU + flatten + fc1 + ReLU + fc2 + ReLU + fc3 (fused).

    p_ref  : (4, bn, 2400)  lanes = (pooled_pos s, patch feature k)
    w2_ref : (2400, 256)    W[s*150+k, c*16+t] = conv2_w[k,c] * (s==t)
                            -> output lanes already in torch flatten order c*16+s
    """
    nw, bn, kd = p_ref.shape
    z = jnp.dot(p_ref[...].reshape(nw * bn, kd), w2_ref[...],
                preferred_element_type=jnp.float32)
    z = z.reshape(nw, bn, z.shape[-1])
    h = jnp.maximum(jnp.max(z, axis=0) + b2_ref[...], 0.0)        # (bn, 256)
    h = jnp.maximum(jnp.dot(h, w1f_ref[...], preferred_element_type=jnp.float32)
                    + b1f_ref[...], 0.0)
    h = jnp.maximum(jnp.dot(h, w2f_ref[...], preferred_element_type=jnp.float32)
                    + b2f_ref[...], 0.0)
    o_ref[...] = (jnp.dot(h, w3f_ref[...], preferred_element_type=jnp.float32)
                  + b3f_ref[...])


# ------------------------------ host wrappers ------------------------------ #

def _pad_to(a, shape):
    return jnp.pad(a, [(0, t - d) for d, t in zip(a.shape, shape)])


def _im2col_pooled(x_nhwc, k, pool, out_hw):
    """Patch gather (pure strided slices, no conv) grouped by 2x2 pool-window offset.

    Returns (pool*pool, N, out_hw*out_hw, k*k*C) with feature order (kh, kw, c):
      out[w=(p,q), b, s=(i,j), (kh*k+kw)*C+c] = x[b, pool*i+p+kh, pool*j+q+kw, c]
    """
    n, c = x_nhwc.shape[0], x_nhwc.shape[-1]
    span = pool * (out_hw - 1) + 1
    wins = []
    for p in range(pool):
        for q in range(pool):
            feats = []
            for kh in range(k):
                for kw in range(k):
                    feats.append(x_nhwc[:, p + kh:p + kh + span:pool,
                                        q + kw:q + kw + span:pool, :])
            blk = jnp.stack(feats, axis=3)                    # (N, oh, ow, k*k, C)
            wins.append(blk.reshape(n, out_hw * out_hw, k * k * c))
    return jnp.stack(wins, axis=0)


def _conv_pool_call(patches, wmat, bias, *, block_rows=1152):
    nw, rows, kd = patches.shape
    bm = rows if rows <= block_rows else block_rows           # multiple of 8 either way
    return pl.pallas_call(
        _conv_pool_kernel,
        out_shape=jax.ShapeDtypeStruct((rows, LANES), jnp.float32),
        grid=(pl.cdiv(rows, bm),),
        in_specs=[
            pl.BlockSpec((nw, bm, kd), lambda i: (0, i, 0)),
            pl.BlockSpec((kd, LANES), lambda i: (0, 0)),
            pl.BlockSpec((1, LANES), lambda i: (0, 0)),
        ],
        out_specs=pl.BlockSpec((bm, LANES), lambda i: (i, 0)),
        compiler_params=pltpu.CompilerParams(dimension_semantics=("parallel",)),
    )(patches, wmat, bias)


def _conv_mlp_call(p2, w2big, b2big, w1f, b1f, w2f, b2f, w3f, b3f, *, block_batch=256):
    nw, npad, kd = p2.shape
    bn = npad if npad <= block_batch else block_batch         # multiple of 8
    return pl.pallas_call(
        _conv_mlp_kernel,
        out_shape=jax.ShapeDtypeStruct((npad, LANES), jnp.float32),
        grid=(pl.cdiv(npad, bn),),
        in_specs=[
            pl.BlockSpec((nw, bn, kd), lambda i: (0, i, 0)),
            pl.BlockSpec(w2big.shape, lambda i: (0, 0)),
            pl.BlockSpec(b2big.shape, lambda i: (0, 0)),
            pl.BlockSpec(w1f.shape, lambda i: (0, 0)),
            pl.BlockSpec(b1f.shape, lambda i: (0, 0)),
            pl.BlockSpec(w2f.shape, lambda i: (0, 0)),
            pl.BlockSpec(b2f.shape, lambda i: (0, 0)),
            pl.BlockSpec(w3f.shape, lambda i: (0, 0)),
            pl.BlockSpec(b3f.shape, lambda i: (0, 0)),
        ],
        out_specs=pl.BlockSpec((bn, LANES), lambda i: (i, 0)),
        compiler_params=pltpu.CompilerParams(dimension_semantics=("parallel",)),
    )(p2, w2big, b2big, w1f, b1f, w2f, b2f, w3f, b3f)


def resnet_forward(x, p):
    """Forward pass matching the PyTorch module (f32, NCHW input (N, 1, 28, 28))."""
    n = x.shape[0]
    k, pool = 5, 2

    # ---- stage 1: conv1 + bias + ReLU + 2x2 maxpool (one Pallas matmul) ----
    co1 = p["w1"].shape[0]                                        # 6
    p1 = _im2col_pooled(x.reshape(n, 28, 28, 1), k, pool, 12)     # (4, N, 144, 25)
    p1 = p1.reshape(pool * pool, n * 144, k * k)                  # unpadded K=25
    w1m = _pad_to(p["w1"].transpose(2, 3, 1, 0).reshape(k * k, co1), (k * k, LANES))
    b1v = _pad_to(p["b1"].reshape(1, co1), (1, LANES))
    h1 = _conv_pool_call(p1, w1m, b1v)                            # (N*144, 128)

    # channels-last already: slice + reshape only, no transpose between the two calls
    h1_nhwc = h1[:, :co1].reshape(n, 12, 12, co1)

    # ---- stage 2: conv2 + pool + bias + ReLU + flatten + fc1/fc2/fc3 (one fused call) ----
    co2 = p["w2"].shape[0]                                        # 16
    s2 = 16                                                       # 4x4 pooled positions
    p2 = _im2col_pooled(h1_nhwc, k, pool, 4)                      # (4, N, 16, 150)
    npad = ((n + 7) // 8) * 8
    p2 = jnp.pad(p2, ((0, 0), (0, npad - n), (0, 0), (0, 0)))
    p2 = p2.reshape(pool * pool, npad, s2 * k * k * co1)          # (4, npad, 2400)

    # conv2 weight with pooled position and torch's channel-major flatten folded into
    # the output columns (exact 0/1 masking, no precision loss):
    #   w2big[s*150 + k, c*16 + t] = w2m[k, c] * (s == t)
    w2m = p["w2"].transpose(2, 3, 1, 0).reshape(k * k * co1, co2)     # (150, 16)
    eye = jnp.eye(s2, dtype=jnp.float32)
    w2big = (w2m[None, :, :, None] * eye[:, None, None, :]).reshape(s2 * 150, co2 * s2)
    b2big = jnp.repeat(p["b2"], s2).reshape(1, co2 * s2)              # idx = c*16 + s

    f1, f2, f3 = p["fw1"].shape[0], p["fw2"].shape[0], p["fw3"].shape[0]  # 120, 84, 10
    w1f = _pad_to(p["fw1"].T, (co2 * s2, LANES))
    b1f = _pad_to(p["fb1"].reshape(1, f1), (1, LANES))
    w2f = _pad_to(p["fw2"].T, (LANES, LANES))
    b2f = _pad_to(p["fb2"].reshape(1, f2), (1, LANES))
    w3f = _pad_to(p["fw3"].T, (LANES, LANES))
    b3f = _pad_to(p["fb3"].reshape(1, f3), (1, LANES))

    out = _conv_mlp_call(p2, w2big, b2big, w1f, b1f, w2f, b2f, w3f, b3f)  # (npad, 128)
    return out[:n, :f3]


# --------------------------- pure-JAX reference ----------------------------- #

def ref_forward(x, p):
    hp = lax.Precision.HIGHEST

    def conv(x_, w, b):
        y = lax.conv_general_dilated(x_, w, (1, 1), "VALID",
                                     dimension_numbers=("NCHW", "OIHW", "NCHW"),
                                     precision=hp)
        return y + b.reshape(1, -1, 1, 1)

    def pool(x_):
        return lax.reduce_window(x_, -jnp.inf, lax.max, (1, 1, 2, 2), (1, 1, 2, 2), "VALID")

    h = pool(jax.nn.relu(conv(x, p["w1"], p["b1"])))
    h = pool(jax.nn.relu(conv(h, p["w2"], p["b2"])))
    h = h.reshape(h.shape[0], -1)
    h = jax.nn.relu(jnp.dot(h, p["fw1"].T, precision=hp) + p["fb1"])
    h = jax.nn.relu(jnp.dot(h, p["fw2"].T, precision=hp) + p["fb2"])
    return jnp.dot(h, p["fw3"].T, precision=hp) + p["fb3"]


# ---------------------------------- main ------------------------------------ #

if __name__ == "__main__":
    key = jax.random.PRNGKey(0)
    ks = jax.random.split(key, 11)

    def u(k_, shape, fan_in):
        bound = 1.0 / float(fan_in) ** 0.5
        return jax.random.uniform(k_, shape, jnp.float32, -bound, bound)

    params = {
        "w1": u(ks[0], (6, 1, 5, 5), 1 * 5 * 5),   "b1": u(ks[1], (6,), 1 * 5 * 5),
        "w2": u(ks[2], (16, 6, 5, 5), 6 * 5 * 5),  "b2": u(ks[3], (16,), 6 * 5 * 5),
        "fw1": u(ks[4], (120, 256), 256),          "fb1": u(ks[5], (120,), 256),
        "fw2": u(ks[6], (84, 120), 120),           "fb2": u(ks[7], (84,), 120),
        "fw3": u(ks[8], (10, 84), 84),             "fb3": u(ks[9], (10,), 84),
    }
    # fc1 expects 16*4*4 features => 1-channel 28x28 input.
    x = jax.random.normal(ks[10], (2, 1, 28, 28), jnp.float32)

    out = jax.jit(resnet_forward)(x, params)
    out = jax.block_until_ready(out)

    ref = ref_forward(x, params)
    assert out.shape == (2, 10), out.shape
    assert jnp.allclose(out, ref, atol=1e-4, rtol=1e-4), (out, ref)
    print("KERNEL_OK")
</pallas_src>

<mosaic_0001>
module attributes {stable_mosaic.version = 11 : i64} {
  func.func @_conv_pool_kernel(%arg0: i32, %arg1: memref<4x288x25xf32, #tpu.memory_space<vmem>>, %arg2: memref<25x128xf32, #tpu.memory_space<vmem>>, %arg3: memref<1x128xf32, #tpu.memory_space<vmem>>, %arg4: memref<288x128xf32, #tpu.memory_space<vmem>>) attributes {dimension_semantics = [#tpu.dimension_semantics<parallel>], iteration_bounds = array<i64: 1>, scalar_prefetch = 0 : i64, scratch_operands = 0 : i64, tpu.core_type = #tpu.core_type<tc>, window_params = [{transform_indices = @transform_0, window_bounds = array<i64: 4, 288, 25>}, {pipeline_mode = #tpu.pipeline_mode<synchronous>, transform_indices = @transform_1, window_bounds = array<i64: 25, 128>}, {pipeline_mode = #tpu.pipeline_mode<synchronous>, transform_indices = @transform_2, window_bounds = array<i64: 1, 128>}, {transform_indices = @transform_3, window_bounds = array<i64: 288, 128>}]} {
    %c0 = arith.constant 0 : index
    %c0_0 = arith.constant 0 : index
    %c0_1 = arith.constant 0 : index
    %0 = vector.load %arg1[%c0, %c0_0, %c0_1] : memref<4x288x25xf32, #tpu.memory_space<vmem>>, vector<4x288x25xf32>
    %1 = vector.shape_cast %0 : vector<4x288x25xf32> to vector<1152x25xf32>
    %c0_2 = arith.constant 0 : index
    %c0_3 = arith.constant 0 : index
    %2 = vector.load %arg2[%c0_2, %c0_3] : memref<25x128xf32, #tpu.memory_space<vmem>>, vector<25x128xf32>
    %cst = arith.constant dense<0.000000e+00> : vector<1152x128xf32>
    %3 = tpu.matmul %1, %2, %cst {dimension_numbers = #tpu.dot_dimension_numbers<[1], [0], [0], [1], [0, 0, 1, 1], [], []>} : vector<1152x25xf32>, vector<25x128xf32>, vector<1152x128xf32> -> vector<1152x128xf32>
    %4 = vector.shape_cast %3 : vector<1152x128xf32> to vector<4x288x128xf32>
    %cst_4 = arith.constant dense<0xFF800000> : vector<288x128xf32>
    %5 = vector.multi_reduction <maximumf>, %4, %cst_4 [0] : vector<4x288x128xf32> to vector<288x128xf32>
    %c0_5 = arith.constant 0 : index
    %c0_6 = arith.constant 0 : index
    %6 = vector.load %arg3[%c0_5, %c0_6] : memref<1x128xf32, #tpu.memory_space<vmem>>, vector<1x128xf32>
    %7 = vector.broadcast %6 : vector<1x128xf32> to vector<288x128xf32>
    %8 = arith.addf %5, %7 : vector<288x128xf32>
    %cst_7 = arith.constant 0.000000e+00 : f32
    %9 = vector.broadcast %cst_7 : f32 to vector<288x128xf32>
    %10 = arith.maximumf %8, %9 : vector<288x128xf32>
    %c0_8 = arith.constant 0 : index
    %c0_9 = arith.constant 0 : index
    %11 = vector.load %arg4[%c0_8, %c0_9] : memref<288x128xf32, #tpu.memory_space<vmem>>, vector<288x128xf32>
    tpu.vector_store %arg4[%c0_8, %c0_9], %10 {strides = array<i32>} : memref<288x128xf32, #tpu.memory_space<vmem>>, vector<288x128xf32>,
    return
  }
  func.func @transform_0(%arg0: i32) -> (i32, i32, i32) {
    %c0_i32 = arith.constant 0 : i32
    %c0_i32_0 = arith.constant 0 : i32
    %c0_i32_1 = arith.constant 0 : i32
    return %c0_i32, %arg0, %c0_i32_0 : i32, i32, i32
  }
  func.func @transform_1(%arg0: i32) -> (i32, i32) {
    %c0_i32 = arith.constant 0 : i32
    %c0_i32_0 = arith.constant 0 : i32
    %c0_i32_1 = arith.constant 0 : i32
    return %c0_i32, %c0_i32_0 : i32, i32
  }
  func.func @transform_2(%arg0: i32) -> (i32, i32) {
    %c0_i32 = arith.constant 0 : i32
    %c0_i32_0 = arith.constant 0 : i32
    %c0_i32_1 = arith.constant 0 : i32
    return %c0_i32, %c0_i32_0 : i32, i32
  }
  func.func @transform_3(%arg0: i32) -> (i32, i32) {
    %c0_i32 = arith.constant 0 : i32
    %c0_i32_0 = arith.constant 0 : i32
    return %arg0, %c0_i32 : i32, i32
  }
}

module attributes {stable_mosaic.version = 11 : i64} {
  func.func @_conv_mlp_kernel(%arg0: i32, %arg1: memref<4x8x2400xf32, #tpu.memory_space<vmem>>, %arg2: memref<2400x256xf32, #tpu.memory_space<vmem>>, %arg3: memref<1x256xf32, #tpu.memory_space<vmem>>, %arg4: memref<256x128xf32, #tpu.memory_space<vmem>>, %arg5: memref<1x128xf32, #tpu.memory_space<vmem>>, %arg6: memref<128x128xf32, #tpu.memory_space<vmem>>, %arg7: memref<1x128xf32, #tpu.memory_space<vmem>>, %arg8: memref<128x128xf32, #tpu.memory_space<vmem>>, %arg9: memref<1x128xf32, #tpu.memory_space<vmem>>, %arg10: memref<8x128xf32, #tpu.memory_space<vmem>>) attributes {dimension_semantics = [#tpu.dimension_semantics<parallel>], iteration_bounds = array<i64: 1>, scalar_prefetch = 0 : i64, scratch_operands = 0 : i64, tpu.core_type = #tpu.core_type<tc>, window_params = [{transform_indices = @transform_0, window_bounds = array<i64: 4, 8, 2400>}, {pipeline_mode = #tpu.pipeline_mode<synchronous>, transform_indices = @transform_1, window_bounds = array<i64: 2400, 256>}, {pipeline_mode = #tpu.pipeline_mode<synchronous>, transform_indices = @transform_2, window_bounds = array<i64: 1, 256>}, {pipeline_mode = #tpu.pipeline_mode<synchronous>, transform_indices = @transform_3, window_bounds = array<i64: 256, 128>}, {pipeline_mode = #tpu.pipeline_mode<synchronous>, transform_indices = @transform_4, window_bounds = array<i64: 1, 128>}, {pipeline_mode = #tpu.pipeline_mode<synchronous>, transform_indices = @transform_5, window_bounds = array<i64: 128, 128>}, {pipeline_mode = #tpu.pipeline_mode<synchronous>, transform_indices = @transform_6, window_bounds = array<i64: 1, 128>}, {pipeline_mode = #tpu.pipeline_mode<synchronous>, transform_indices = @transform_7, window_bounds = array<i64: 128, 128>}, {pipeline_mode = #tpu.pipeline_mode<synchronous>, transform_indices = @transform_8, window_bounds = array<i64: 1, 128>}, {transform_indices = @transform_9, window_bounds = array<i64: 8, 128>}]} {
    %c0 = arith.constant 0 : index
    %c0_0 = arith.constant 0 : index
    %c0_1 = arith.constant 0 : index
    %0 = vector.load %arg1[%c0, %c0_0, %c0_1] : memref<4x8x2400xf32, #tpu.memory_space<vmem>>, vector<4x8x2400xf32>
    %1 = vector.shape_cast %0 : vector<4x8x2400xf32> to vector<32x2400xf32>
    %c0_2 = arith.constant 0 : index
    %c0_3 = arith.constant 0 : index
    %2 = vector.load %arg2[%c0_2, %c0_3] : memref<2400x256xf32, #tpu.memory_space<vmem>>, vector<2400x256xf32>
    %cst = arith.constant dense<0.000000e+00> : vector<32x256xf32>
    %3 = tpu.matmul %1, %2, %cst {dimension_numbers = #tpu.dot_dimension_numbers<[1], [0], [0], [1], [0, 0, 1, 1], [], []>} : vector<32x2400xf32>, vector<2400x256xf32>, vector<32x256xf32> -> vector<32x256xf32>
    %4 = vector.shape_cast %3 : vector<32x256xf32> to vector<4x8x256xf32>
    %cst_4 = arith.constant dense<0xFF800000> : vector<8x256xf32>
    %5 = vector.multi_reduction <maximumf>, %4, %cst_4 [0] : vector<4x8x256xf32> to vector<8x256xf32>
    %c0_5 = arith.constant 0 : index
    %c0_6 = arith.constant 0 : index
    %6 = vector.load %arg3[%c0_5, %c0_6] : memref<1x256xf32, #tpu.memory_space<vmem>>, vector<1x256xf32>
    %7 = vector.broadcast %6 : vector<1x256xf32> to vector<8x256xf32>
    %8 = arith.addf %5, %7 : vector<8x256xf32>
    %cst_7 = arith.constant 0.000000e+00 : f32
    %9 = vector.broadcast %cst_7 : f32 to vector<8x256xf32>
    %10 = arith.maximumf %8, %9 : vector<8x256xf32>
    %c0_8 = arith.constant 0 : index
    %c0_9 = arith.constant 0 : index
    %11 = vector.load %arg4[%c0_8, %c0_9] : memref<256x128xf32, #tpu.memory_space<vmem>>, vector<256x128xf32>
    %cst_10 = arith.constant dense<0.000000e+00> : vector<8x128xf32>
    %12 = tpu.matmul %10, %11, %cst_10 {dimension_numbers = #tpu.dot_dimension_numbers<[1], [0], [0], [1], [0, 0, 1, 1], [], []>} : vector<8x256xf32>, vector<256x128xf32>, vector<8x128xf32> -> vector<8x128xf32>
    %c0_11 = arith.constant 0 : index
    %c0_12 = arith.constant 0 : index
    %13 = vector.load %arg5[%c0_11, %c0_12] : memref<1x128xf32, #tpu.memory_space<vmem>>, vector<1x128xf32>
    %14 = vector.broadcast %13 : vector<1x128xf32> to vector<8x128xf32>
    %15 = arith.addf %12, %14 : vector<8x128xf32>
    %cst_13 = arith.constant 0.000000e+00 : f32
    %16 = vector.broadcast %cst_13 : f32 to vector<8x128xf32>
    %17 = arith.maximumf %15, %16 : vector<8x128xf32>
    %c0_14 = arith.constant 0 : index
    %c0_15 = arith.constant 0 : index
    %18 = vector.load %arg6[%c0_14, %c0_15] : memref<128x128xf32, #tpu.memory_space<vmem>>, vector<128x128xf32>
    %cst_16 = arith.constant dense<0.000000e+00> : vector<8x128xf32>
    %19 = tpu.matmul %17, %18, %cst_16 {dimension_numbers = #tpu.dot_dimension_numbers<[1], [0], [0], [1], [0, 0, 1, 1], [], []>} : vector<8x128xf32>, vector<128x128xf32>, vector<8x128xf32> -> vector<8x128xf32>
    %c0_17 = arith.constant 0 : index
    %c0_18 = arith.constant 0 : index
    %20 = vector.load %arg7[%c0_17, %c0_18] : memref<1x128xf32, #tpu.memory_space<vmem>>, vector<1x128xf32>
    %21 = vector.broadcast %20 : vector<1x128xf32> to vector<8x128xf32>
    %22 = arith.addf %19, %21 : vector<8x128xf32>
    %cst_19 = arith.constant 0.000000e+00 : f32
    %23 = vector.broadcast %cst_19 : f32 to vector<8x128xf32>
    %24 = arith.maximumf %22, %23 : vector<8x128xf32>
    %c0_20 = arith.constant 0 : index
    %c0_21 = arith.constant 0 : index
    %25 = vector.load %arg8[%c0_20, %c0_21] : memref<128x128xf32, #tpu.memory_space<vmem>>, vector<128x128xf32>
    %cst_22 = arith.constant dense<0.000000e+00> : vector<8x128xf32>
    %26 = tpu.matmul %24, %25, %cst_22 {dimension_numbers = #tpu.dot_dimension_numbers<[1], [0], [0], [1], [0, 0, 1, 1], [], []>} : vector<8x128xf32>, vector<128x128xf32>, vector<8x128xf32> -> vector<8x128xf32>
    %c0_23 = arith.constant 0 : index
    %c0_24 = arith.constant 0 : index
    %27 = vector.load %arg9[%c0_23, %c0_24] : memref<1x128xf32, #tpu.memory_space<vmem>>, vector<1x128xf32>
    %28 = vector.broadcast %27 : vector<1x128xf32> to vector<8x128xf32>
    %29 = arith.addf %26, %28 : vector<8x128xf32>
    %c0_25 = arith.constant 0 : index
    %c0_26 = arith.constant 0 : index
    %30 = vector.load %arg10[%c0_25, %c0_26] : memref<8x128xf32, #tpu.memory_space<vmem>>, vector<8x128xf32>
    tpu.vector_store %arg10[%c0_25, %c0_26], %29 {strides = array<i32>} : memref<8x128xf32, #tpu.memory_space<vmem>>, vector<8x128xf32>,
    return
  }
  func.func @transform_0(%arg0: i32) -> (i32, i32, i32) {
    %c0_i32 = arith.constant 0 : i32
    %c0_i32_0 = arith.constant 0 : i32
    %c0_i32_1 = arith.constant 0 : i32
    return %c0_i32, %arg0, %c0_i32_0 : i32, i32, i32
  }
  func.func @transform_1(%arg0: i32) -> (i32, i32) {
    %c0_i32 = arith.constant 0 : i32
    %c0_i32_0 = arith.constant 0 : i32
    %c0_i32_1 = arith.constant 0 : i32
    return %c0_i32, %c0_i32_0 : i32, i32
  }
  func.func @transform_2(%arg0: i32) -> (i32, i32) {
    %c0_i32 = arith.constant 0 : i32
    %c0_i32_0 = arith.constant 0 : i32
    %c0_i32_1 = arith.constant 0 : i32
    return %c0_i32, %c0_i32_0 : i32, i32
  }
  func.func @transform_3(%arg0: i32) -> (i32, i32) {
    %c0_i32 = arith.constant 0 : i32
    %c0_i32_0 = arith.constant 0 : i32
    %c0_i32_1 = arith.constant 0 : i32
    return %c0_i32, %c0_i32_0 : i32, i32
  }
  func.func @transform_4(%arg0: i32) -> (i32, i32) {
    %c0_i32 = arith.constant 0 : i32
    %c0_i32_0 = arith.constant 0 : i32
    %c0_i32_1 = arith.constant 0 : i32
    return %c0_i32, %c0_i32_0 : i32, i32
  }
  func.func @transform_5(%arg0: i32) -> (i32, i32) {
    %c0_i32 = arith.constant 0 : i32
    %c0_i32_0 = arith.constant 0 : i32
    %c0_i32_1 = arith.constant 0 : i32
    return %c0_i32, %c0_i32_0 : i32, i32
  }
  func.func @transform_6(%arg0: i32) -> (i32, i32) {
    %c0_i32 = arith.constant 0 : i32
    %c0_i32_0 = arith.constant 0 : i32
    %c0_i32_1 = arith.constant 0 : i32
    return %c0_i32, %c0_i32_0 : i32, i32
  }
  func.func @transform_7(%arg0: i32) -> (i32, i32) {
    %c0_i32 = arith.constant 0 : i32
    %c0_i32_0 = arith.constant 0 : i32
    %c0_i32_1 = arith.constant 0 : i32
    return %c0_i32, %c0_i32_0 : i32, i32
  }
  func.func @transform_8(%arg0: i32) -> (i32, i32) {
    %c0_i32 = arith.constant 0 : i32
    %c0_i32_0 = arith.constant 0 : i32
    %c0_i32_1 = arith.constant 0 : i32
    return %c0_i32, %c0_i32_0 : i32, i32
  }
  func.func @transform_9(%arg0: i32) -> (i32, i32) {
    %c0_i32 = arith.constant 0 : i32
    %c0_i32_0 = arith.constant 0 : i32
    return %arg0, %c0_i32 : i32, i32
  }
}

</mosaic_0001>

<bundles_post_ra>
// kernel: resnet_forward.2
= control target key start
LH: loop header
LB: loop body
LE: loop exit
PB: predicated region body
PF: predicated region fallthrough
CT: control target
= control target key end

     0   :  { %vm595_vm0 = vcmask 1040384   ;;  %vm162_vm1 = vcmask 203776   ;;  %s2187_s1 = inlined_call_operand.vmem [shape: f32[25,128], index: 1, kind: input, shape index: {}]   ;;  %s2188_s0 = inlined_call_operand.vmem [shape: f32[4,288,25], index: 0, kind: input, shape index: {}]   ;;  %s2189_s2 = inlined_call_operand.vmem [shape: f32[1,128], index: 2, kind: input, shape index: {}]   ;;  %s2190_s3 = inlined_call_operand.vmem [shape: f32[288,128], index: 3, kind: output, shape index: {}]  }
   0x1   :  { %v161_v0 = vld [vmem:[%s2187_s1 + $0x18] sm:$0x1]  ;;  %v160_v1 = vld [vmem:[%s2187_s1 + $0x10] sm:$0xff]  ;;  %v159_v2 = vld [vmem:[%s2187_s1 + $0x8] sm:$0xff] }
   0x2   :  { %1418 = vmatpush.msk.msra.mxu2 %vm595_vm0, %v161_v0  ;;  %1419 = vmatpush.msk.msra.mxu3 %vm595_vm0, %v161_v0  ;;  %v158_v3 = vld [vmem:[%s2187_s1] sm:$0xff]  ;;  %v87_v8 = vld [vmem:[%s2188_s0 + $0x248] sm:$0xff]  ;;  %v88_v12 = vld [vmem:[%s2188_s0 + $0x250] sm:$0xff] }
   0x3   :  { %1272 = vmatpush.msk.msra.mxu0 %vm595_vm0, %v161_v0  ;;  %1417 = vmatpush.msk.msra.mxu1 %vm595_vm0, %v161_v0  ;;  %v86_v4 = vld [vmem:[%s2188_s0 + $0x240] sm:$0xff]  ;;  %v123_v9 = vld [vmem:[%s2188_s0 + $0x368] sm:$0xff]  ;;  %v124_v13 = vld [vmem:[%s2188_s0 + $0x370] sm:$0xff] }
   0x4   :  { %1421 = vmatpush.msra.mxu2 %v160_v1  ;;  %1422 = vmatpush.msra.mxu3 %v160_v1  ;;  %v122_v5 = vld [vmem:[%s2188_s0 + $0x360] sm:$0xff]  ;;  %v15_v10 = vld [vmem:[%s2188_s0 + $0x8] sm:$0xff]  ;;  %v16_v14 = vld [vmem:[%s2188_s0 + $0x10] sm:$0xff] }
   0x5   :  { %612 = vmatpush.msra.mxu0 %v160_v1  ;;  %1420 = vmatpush.msra.mxu1 %v160_v1  ;;  %v14_v6 = vld [vmem:[%s2188_s0] sm:$0xff]  ;;  %v51_v11 = vld [vmem:[%s2188_s0 + $0x128] sm:$0xff]  ;;  %v52_v15 = vld [vmem:[%s2188_s0 + $0x130] sm:$0xff] }
   0x6   :  { %1424 = vmatpush.msra.mxu2 %v159_v2  ;;  %1425 = vmatpush.msra.mxu3 %v159_v2  ;;  %v50_v7 = vld [vmem:[%s2188_s0 + $0x120] sm:$0xff]  ;;  %v89_v16 = vld [vmem:[%s2188_s0 + $0x258] sm:$0xff]  ;;  %v91_v24 = vld [vmem:[%s2188_s0 + $0x268] sm:$0xff] }
   0x7   :  { %613 = vmatpush.msra.mxu0 %v159_v2  ;;  %1423 = vmatpush.msra.mxu1 %v159_v2  ;;  %v125_v17 = vld [vmem:[%s2188_s0 + $0x378] sm:$0xff]  ;;  %v90_v20 = vld [vmem:[%s2188_s0 + $0x260] sm:$0xff]  ;;  %v127_v25 = vld [vmem:[%s2188_s0 + $0x388] sm:$0xff] }
   0x8   :  { %1427 = vmatpush.msra.mxu2 %v158_v3  ;;  %1428 = vmatpush.msra.mxu3 %v158_v3  ;;  %v17_v18 = vld [vmem:[%s2188_s0 + $0x18] sm:$0xff]  ;;  %v126_v21 = vld [vmem:[%s2188_s0 + $0x380] sm:$0xff]  ;;  %v19_v26 = vld [vmem:[%s2188_s0 + $0x28] sm:$0xff] }
   0x9   :  { %1345 = vmatmul.msk.f32.vlgmr.msra.gmra.mxu2 %vm162_vm1, %v86_v4  ;;  %1381 = vmatmul.msk.f32.vlgmr.msra.gmra.mxu3 %vm162_vm1, %v122_v5  ;;  %v53_v19 = vld [vmem:[%s2188_s0 + $0x138] sm:$0xff]  ;;  %v18_v22 = vld [vmem:[%s2188_s0 + $0x20] sm:$0xff]  ;;  %v55_v27 = vld [vmem:[%s2188_s0 + $0x148] sm:$0xff] }
   0xa   :  { %614 = vmatpush.msra.mxu0 %v158_v3  ;;  %1426 = vmatpush.msra.mxu1 %v158_v3  ;;  %v54_v23 = vld [vmem:[%s2188_s0 + $0x140] sm:$0xff]  ;;  %v92_v28 = vld [vmem:[%s2188_s0 + $0x270] sm:$0xff]  ;;  %v93_v32 = vld [vmem:[%s2188_s0 + $0x278] sm:$0xff] }
   0xb   :  { %1273 = vmatmul.msk.f32.vlgmr.msra.gmra.mxu0 %vm162_vm1, %v14_v6  ;;  %1309 = vmatmul.msk.f32.vlgmr.msra.gmra.mxu1 %vm162_vm1, %v50_v7  ;;  %v128_v29 = vld [vmem:[%s2188_s0 + $0x390] sm:$0xff]  ;;  %v129_v33 = vld [vmem:[%s2188_s0 + $0x398] sm:$0xff]  ;;  %v94_v36 = vld [vmem:[%s2188_s0 + $0x280] sm:$0xff] }
   0xc   :  { %v20_v30 = vld [vmem:[%s2188_s0 + $0x30] sm:$0xff]  ;;  %v21_v34 = vld [vmem:[%s2188_s0 + $0x38] sm:$0xff]  ;;  %v130_v37 = vld [vmem:[%s2188_s0 + $0x3a0] sm:$0xff] }
   0xd   :  { %v56_v31 = vld [vmem:[%s2188_s0 + $0x150] sm:$0xff]  ;;  %v57_v35 = vld [vmem:[%s2188_s0 + $0x158] sm:$0xff]  ;;  %v22_v38 = vld [vmem:[%s2188_s0 + $0x40] sm:$0xff] }
   0xe   :  { %v58_v39 = vld [vmem:[%s2188_s0 + $0x160] sm:$0xff]  ;;  %v95_v40 = vld [vmem:[%s2188_s0 + $0x288] sm:$0xff]  ;;  %v96_v44 = vld [vmem:[%s2188_s0 + $0x290] sm:$0xff] }
   0xf   :  { %v131_v41 = vld [vmem:[%s2188_s0 + $0x3a8] sm:$0xff]  ;;  %v132_v45 = vld [vmem:[%s2188_s0 + $0x3b0] sm:$0xff]  ;;  %v97_v48 = vld [vmem:[%s2188_s0 + $0x298] sm:$0xff] }
  0x10   :  { %v23_v42 = vld [vmem:[%s2188_s0 + $0x48] sm:$0xff]  ;;  %v24_v46 = vld [vmem:[%s2188_s0 + $0x50] sm:$0xff]  ;;  %v133_v49 = vld [vmem:[%s2188_s0 + $0x3b8] sm:$0xff] }
  0x11   :  { %1346 = vmatmul.msk.f32.gmra.mxu2 %vm162_vm1, %v87_v8  ;;  %1382 = vmatmul.msk.f32.gmra.mxu3 %vm162_vm1, %v123_v9  ;;  %v59_v43 = vld [vmem:[%s2188_s0 + $0x168] sm:$0xff]  ;;  %v60_v47 = vld [vmem:[%s2188_s0 + $0x170] sm:$0xff]  ;;  %v25_v50 = vld [vmem:[%s2188_s0 + $0x58] sm:$0xff] }
  0x12   :  { %v61_v51 = vld [vmem:[%s2188_s0 + $0x178] sm:$0xff]  ;;  %v98_v52 = vld [vmem:[%s2188_s0 + $0x2a0] sm:$0xff]  ;;  %v99_v56 = vld [vmem:[%s2188_s0 + $0x2a8] sm:$0xff] }
  0x13   :  { %1274 = vmatmul.msk.f32.gmra.mxu0 %vm162_vm1, %v15_v10  ;;  %1310 = vmatmul.msk.f32.gmra.mxu1 %vm162_vm1, %v51_v11  ;;  %v134_v53 = vld [vmem:[%s2188_s0 + $0x3c0] sm:$0xff]  ;;  %v135_v57 = vld [vmem:[%s2188_s0 + $0x3c8] sm:$0xff]  ;;  %v100_v60 = vld [vmem:[%s2188_s0 + $0x2b0] sm:$0xff] }
  0x14   :  { %v26_v54 = vld [vmem:[%s2188_s0 + $0x60] sm:$0xff]  ;;  %v27_v58 = vld [vmem:[%s2188_s0 + $0x68] sm:$0xff]  ;;  %v136_v61 = vld [vmem:[%s2188_s0 + $0x3d0] sm:$0xff] }
  0x15   :  { %v62_v55 = vld [vmem:[%s2188_s0 + $0x180] sm:$0xff]  ;;  %v63_v59 = vld [vmem:[%s2188_s0 + $0x188] sm:$0xff]  ;;  %v28_v62 = vld [vmem:[%s2188_s0 + $0x70] sm:$0xff] }
  0x16   :  { %v64_v63 = vld [vmem:[%s2188_s0 + $0x190] sm:$0xff]  ;;  %v101_v0 = vld [vmem:[%s2188_s0 + $0x2b8] sm:$0xff]  ;;  %v102_v4 = vld [vmem:[%s2188_s0 + $0x2c0] sm:$0xff] }
  0x17   :  { %v137_v1 = vld [vmem:[%s2188_s0 + $0x3d8] sm:$0xff]  ;;  %v138_v5 = vld [vmem:[%s2188_s0 + $0x3e0] sm:$0xff] }
  0x18   :  { %v29_v2 = vld [vmem:[%s2188_s0 + $0x78] sm:$0xff]  ;;  %v30_v8 = vld [vmem:[%s2188_s0 + $0x80] sm:$0xff] }
  0x19   :  { %1347 = vmatmul.msk.f32.gmra.mxu2 %vm162_vm1, %v88_v12  ;;  %1383 = vmatmul.msk.f32.gmra.mxu3 %vm162_vm1, %v124_v13  ;;  %v65_v3 = vld [vmem:[%s2188_s0 + $0x198] sm:$0xff]  ;;  %v66_v9 = vld [vmem:[%s2188_s0 + $0x1a0] sm:$0xff] }
  0x1b   :  { %1275 = vmatmul.msk.f32.gmra.mxu0 %vm162_vm1, %v16_v14  ;;  %1311 = vmatmul.msk.f32.gmra.mxu1 %vm162_vm1, %v52_v15  ;;  %v1737_v14 = vld [vmem:[%s2189_s2] ss:$0 sm:$0xff]  ;;  %v103_v15 = vld [vmem:[%s2188_s0 + $0x2c8] sm:$0xff] }
  0x21   :  { %1348 = vmatmul.msk.f32.gmra.mxu2 %vm162_vm1, %v89_v16  ;;  %1384 = vmatmul.msk.f32.gmra.mxu3 %vm162_vm1, %v125_v17  ;;  %v139_v16 = vld [vmem:[%s2188_s0 + $0x3e8] sm:$0xff] }
  0x23   :  { %1276 = vmatmul.msk.f32.gmra.mxu0 %vm162_vm1, %v17_v18  ;;  %1312 = vmatmul.msk.f32.gmra.mxu1 %vm162_vm1, %v53_v19 }
  0x29   :  { %1349 = vmatmul.msk.f32.gmra.mxu2 %vm162_vm1, %v90_v20  ;;  %1385 = vmatmul.msk.f32.gmra.mxu3 %vm162_vm1, %v126_v21  ;;  %v31_v20 = vld [vmem:[%s2188_s0 + $0x88] sm:$0xff] }
  0x2a   :  { %v67_v21 = vld [vmem:[%s2188_s0 + $0x1a8] sm:$0xff] }
  0x2b   :  { %1277 = vmatmul.msk.f32.gmra.mxu0 %vm162_vm1, %v18_v22  ;;  %1313 = vmatmul.msk.f32.gmra.mxu1 %vm162_vm1, %v54_v23 }
  0x31   :  { %1350 = vmatmul.msk.f32.gmra.mxu2 %vm162_vm1, %v91_v24  ;;  %1386 = vmatmul.msk.f32.gmra.mxu3 %vm162_vm1, %v127_v25 }
  0x33   :  { %1278 = vmatmul.msk.f32.gmra.mxu0 %vm162_vm1, %v19_v26  ;;  %1314 = vmatmul.msk.f32.gmra.mxu1 %vm162_vm1, %v55_v27 }
  0x39   :  { %1351 = vmatmul.msk.f32.gmra.mxu2 %vm162_vm1, %v92_v28  ;;  %1387 = vmatmul.msk.f32.gmra.mxu3 %vm162_vm1, %v128_v29  ;;  %v104_v28 = vld [vmem:[%s2188_s0 + $0x2d0] sm:$0xff] }
  0x3a   :  { %v140_v29 = vld [vmem:[%s2188_s0 + $0x3f0] sm:$0xff] }
  0x3b   :  { %1279 = vmatmul.msk.f32.gmra.mxu0 %vm162_vm1, %v20_v30  ;;  %1315 = vmatmul.msk.f32.gmra.mxu1 %vm162_vm1, %v56_v31 }
  0x41   :  { %1352 = vmatmul.msk.f32.gmra.mxu2 %vm162_vm1, %v93_v32  ;;  %1388 = vmatmul.msk.f32.gmra.mxu3 %vm162_vm1, %v129_v33  ;;  %v32_v33 = vld [vmem:[%s2188_s0 + $0x90] sm:$0xff] }
  0x43   :  { %1280 = vmatmul.msk.f32.gmra.mxu0 %vm162_vm1, %v21_v34  ;;  %1316 = vmatmul.msk.f32.gmra.mxu1 %vm162_vm1, %v57_v35  ;;  %v68_v34 = vld [vmem:[%s2188_s0 + $0x1b0] sm:$0xff] }
  0x49   :  { %1353 = vmatmul.msk.f32.gmra.mxu2 %vm162_vm1, %v94_v36  ;;  %1389 = vmatmul.msk.f32.gmra.mxu3 %vm162_vm1, %v130_v37 }
  0x4b   :  { %1281 = vmatmul.msk.f32.gmra.mxu0 %vm162_vm1, %v22_v38  ;;  %1317 = vmatmul.msk.f32.gmra.mxu1 %vm162_vm1, %v58_v39 }
  0x51   :  { %1354 = vmatmul.msk.f32.gmra.mxu2 %vm162_vm1, %v95_v40  ;;  %1390 = vmatmul.msk.f32.gmra.mxu3 %vm162_vm1, %v131_v41  ;;  %v105_v41 = vld [vmem:[%s2188_s0 + $0x2d8] sm:$0xff] }
  0x53   :  { %1282 = vmatmul.msk.f32.gmra.mxu0 %vm162_vm1, %v23_v42  ;;  %1318 = vmatmul.msk.f32.gmra.mxu1 %vm162_vm1, %v59_v43  ;;  %v141_v42 = vld [vmem:[%s2188_s0 + $0x3f8] sm:$0xff] }
  0x59   :  { %1355 = vmatmul.msk.f32.gmra.mxu2 %vm162_vm1, %v96_v44  ;;  %1391 = vmatmul.msk.f32.gmra.mxu3 %vm162_vm1, %v132_v45 }
  0x5b   :  { %1283 = vmatmul.msk.f32.gmra.mxu0 %vm162_vm1, %v24_v46  ;;  %1319 = vmatmul.msk.f32.gmra.mxu1 %vm162_vm1, %v60_v47  ;;  %v33_v46 = vld [vmem:[%s2188_s0 + $0x98] sm:$0xff] }
  0x5c   :  { %v69_v47 = vld [vmem:[%s2188_s0 + $0x1b8] sm:$0xff] }
  0x61   :  { %1356 = vmatmul.msk.f32.gmra.mxu2 %vm162_vm1, %v97_v48  ;;  %1392 = vmatmul.msk.f32.gmra.mxu3 %vm162_vm1, %v133_v49 }
  0x63   :  { %1284 = vmatmul.msk.f32.gmra.mxu0 %vm162_vm1, %v25_v50  ;;  %1320 = vmatmul.msk.f32.gmra.mxu1 %vm162_vm1, %v61_v51 }
  0x69   :  { %1357 = vmatmul.msk.f32.gmra.mxu2 %vm162_vm1, %v98_v52  ;;  %1393 = vmatmul.msk.f32.gmra.mxu3 %vm162_vm1, %v134_v53 }
  0x6b   :  { %1285 = vmatmul.msk.f32.gmra.mxu0 %vm162_vm1, %v26_v54  ;;  %1321 = vmatmul.msk.f32.gmra.mxu1 %vm162_vm1, %v62_v55  ;;  %v106_v54 = vld [vmem:[%s2188_s0 + $0x2e0] sm:$0xff] }
  0x6c   :  { %v142_v55 = vld [vmem:[%s2188_s0 + $0x400] sm:$0xff] }
  0x71   :  { %1358 = vmatmul.msk.f32.gmra.mxu2 %vm162_vm1, %v99_v56  ;;  %1394 = vmatmul.msk.f32.gmra.mxu3 %vm162_vm1, %v135_v57 }
  0x73   :  { %1286 = vmatmul.msk.f32.gmra.mxu0 %vm162_vm1, %v27_v58  ;;  %1322 = vmatmul.msk.f32.gmra.mxu1 %vm162_vm1, %v63_v59  ;;  %v34_v59 = vld [vmem:[%s2188_s0 + $0xa0] sm:$0xff] }
  0x79   :  { %1359 = vmatmul.msk.f32.gmra.mxu2 %vm162_vm1, %v100_v60  ;;  %1395 = vmatmul.msk.f32.gmra.mxu3 %vm162_vm1, %v136_v61  ;;  %v70_v60 = vld [vmem:[%s2188_s0 + $0x1c0] sm:$0xff] }
  0x7b   :  { %1287 = vmatmul.msk.f32.gmra.mxu0 %vm162_vm1, %v28_v62  ;;  %1323 = vmatmul.msk.f32.gmra.mxu1 %vm162_vm1, %v64_v63 }
  0x81   :  { %1360 = vmatmul.msk.f32.gmra.mxu2 %vm162_vm1, %v101_v0  ;;  %1396 = vmatmul.msk.f32.gmra.mxu3 %vm162_vm1, %v137_v1 }
  0x83   :  { %1288 = vmatmul.msk.f32.gmra.mxu0 %vm162_vm1, %v29_v2  ;;  %1324 = vmatmul.msk.f32.gmra.mxu1 %vm162_vm1, %v65_v3  ;;  %v107_v3 = vld [vmem:[%s2188_s0 + $0x2e8] sm:$0xff] }
  0x88   :  { %v616_v6 = vpop.f32.mrf.mxu0  ;;  %v724_v7 = vpop.f32.mrf.mxu1 }
  0x89   :  { %1361 = vmatmul.msk.f32.gmra.mxu2 %vm162_vm1, %v102_v4  ;;  %v1048_v10 = vmax.f32 %v616_v6, %v724_v7  ;;  %1397 = vmatmul.msk.f32.gmra.mxu3 %vm162_vm1, %v138_v5  ;;  %v143_v4 = vld [vmem:[%s2188_s0 + $0x408] sm:$0xff] }
  0x8b   :  { %1289 = vmatmul.msk.f32.gmra.mxu0 %vm162_vm1, %v30_v8  ;;  %1325 = vmatmul.msk.f32.gmra.mxu1 %vm162_vm1, %v66_v9  ;;  %v35_v8 = vld [vmem:[%s2188_s0 + $0xa8] sm:$0xff] }
  0x8c   :  { %v832_v11 = vpop.f32.mrf.mxu2  ;;  %v940_v12 = vpop.f32.mrf.mxu3  ;;  %v71_v9 = vld [vmem:[%s2188_s0 + $0x1c8] sm:$0xff] }
  0x8d   :  { %v1049_v13 = vmax.f32 %v1048_v10, %v832_v11 }
  0x8f   :  { %v1050_v17 = vmax.f32 %v1049_v13, %v940_v12 }
  0x90   :  { %v619_v18 = vpop.f32.mrf.mxu0  ;;  %v727_v19 = vpop.f32.mrf.mxu1 }
  0x91   :  { %v1160_v22 = vadd.f32 %v1737_v14, %v1050_v17  ;;  %1362 = vmatmul.msk.f32.gmra.mxu2 %vm162_vm1, %v103_v15  ;;  %v1051_v23 = vmax.f32 %v619_v18, %v727_v19  ;;  %1398 = vmatmul.msk.f32.gmra.mxu3 %vm162_vm1, %v139_v16  ;;  %v108_v17 = vld [vmem:[%s2188_s0 + $0x2f0] sm:$0xff] }
  0x92   :  { %v144_v18 = vld [vmem:[%s2188_s0 + $0x410] sm:$0xff] }
  0x93   :  { %v1196_v24 = vmax.f32 %v1160_v22, 0.0  ;;  %1290 = vmatmul.msk.f32.gmra.mxu0 %vm162_vm1, %v31_v20  ;;  %1326 = vmatmul.msk.f32.gmra.mxu1 %vm162_vm1, %v67_v21  ;;  %v36_v22 = vld [vmem:[%s2188_s0 + $0xb0] sm:$0xff] }
  0x94   :  { %v835_v25 = vpop.f32.mrf.mxu2  ;;  %v943_v26 = vpop.f32.mrf.mxu3 }
  0x95   :  { %1232 = vst [vmem:[%s2190_s3] sm:$0xff] %v1196_v24  ;;  %v1052_v27 = vmax.f32 %v1051_v23, %v835_v25  ;;  %v72_v23 = vld [vmem:[%s2188_s0 + $0x1d0] sm:$0xff] }
  0x97   :  { %v1053_v30 = vmax.f32 %v1052_v27, %v943_v26 }
  0x98   :  { %v622_v31 = vpop.f32.mrf.mxu0  ;;  %v730_v32 = vpop.f32.mrf.mxu1 }
  0x99   :  { %v1161_v35 = vadd.f32 %v1737_v14, %v1053_v30  ;;  %1363 = vmatmul.msk.f32.gmra.mxu2 %vm162_vm1, %v104_v28  ;;  %v1054_v36 = vmax.f32 %v622_v31, %v730_v32  ;;  %1399 = vmatmul.msk.f32.gmra.mxu3 %vm162_vm1, %v140_v29  ;;  %v109_v30 = vld [vmem:[%s2188_s0 + $0x2f8] sm:$0xff] }
  0x9a   :  { %v145_v31 = vld [vmem:[%s2188_s0 + $0x418] sm:$0xff] }
  0x9b   :  { %v1197_v37 = vmax.f32 %v1161_v35, 0.0  ;;  %1291 = vmatmul.msk.f32.gmra.mxu0 %vm162_vm1, %v32_v33  ;;  %1327 = vmatmul.msk.f32.gmra.mxu1 %vm162_vm1, %v68_v34  ;;  %v37_v35 = vld [vmem:[%s2188_s0 + $0xb8] sm:$0xff] }
  0x9c   :  { %v838_v38 = vpop.f32.mrf.mxu2  ;;  %v946_v39 = vpop.f32.mrf.mxu3 }
  0x9d   :  { %1233 = vst [vmem:[%s2190_s3 + $0x8] sm:$0xff] %v1197_v37  ;;  %v1055_v40 = vmax.f32 %v1054_v36, %v838_v38  ;;  %v73_v36 = vld [vmem:[%s2188_s0 + $0x1d8] sm:$0xff] }
  0x9f   :  { %v1056_v43 = vmax.f32 %v1055_v40, %v946_v39 }
  0xa0   :  { %v625_v44 = vpop.f32.mrf.mxu0  ;;  %v733_v45 = vpop.f32.mrf.mxu1 }
  0xa1   :  { %v1162_v48 = vadd.f32 %v1737_v14, %v1056_v43  ;;  %1364 = vmatmul.msk.f32.gmra.mxu2 %vm162_vm1, %v105_v41  ;;  %v1057_v49 = vmax.f32 %v625_v44, %v733_v45  ;;  %1400 = vmatmul.msk.f32.gmra.mxu3 %vm162_vm1, %v141_v42  ;;  %v110_v43 = vld [vmem:[%s2188_s0 + $0x300] sm:$0xff] }
  0xa2   :  { %v146_v44 = vld [vmem:[%s2188_s0 + $0x420] sm:$0xff] }
  0xa3   :  { %v1198_v50 = vmax.f32 %v1162_v48, 0.0  ;;  %1292 = vmatmul.msk.f32.gmra.mxu0 %vm162_vm1, %v33_v46  ;;  %1328 = vmatmul.msk.f32.gmra.mxu1 %vm162_vm1, %v69_v47  ;;  %v38_v48 = vld [vmem:[%s2188_s0 + $0xc0] sm:$0xff] }
  0xa4   :  { %v841_v51 = vpop.f32.mrf.mxu2  ;;  %v949_v52 = vpop.f32.mrf.mxu3 }
  0xa5   :  { %1234 = vst [vmem:[%s2190_s3 + $0x10] sm:$0xff] %v1198_v50  ;;  %v1058_v53 = vmax.f32 %v1057_v49, %v841_v51  ;;  %v74_v49 = vld [vmem:[%s2188_s0 + $0x1e0] sm:$0xff] }
  0xa7   :  { %v1059_v56 = vmax.f32 %v1058_v53, %v949_v52 }
  0xa8   :  { %v628_v57 = vpop.f32.mrf.mxu0  ;;  %v736_v58 = vpop.f32.mrf.mxu1 }
  0xa9   :  { %v1163_v61 = vadd.f32 %v1737_v14, %v1059_v56  ;;  %1365 = vmatmul.msk.f32.gmra.mxu2 %vm162_vm1, %v106_v54  ;;  %v1060_v62 = vmax.f32 %v628_v57, %v736_v58  ;;  %1401 = vmatmul.msk.f32.gmra.mxu3 %vm162_vm1, %v142_v55  ;;  %v111_v56 = vld [vmem:[%s2188_s0 + $0x308] sm:$0xff] }
  0xaa   :  { %v147_v57 = vld [vmem:[%s2188_s0 + $0x428] sm:$0xff] }
  0xab   :  { %v1199_v63 = vmax.f32 %v1163_v61, 0.0  ;;  %1293 = vmatmul.msk.f32.gmra.mxu0 %vm162_vm1, %v34_v59  ;;  %1329 = vmatmul.msk.f32.gmra.mxu1 %vm162_vm1, %v70_v60  ;;  %v39_v61 = vld [vmem:[%s2188_s0 + $0xc8] sm:$0xff] }
  0xac   :  { %v844_v0 = vpop.f32.mrf.mxu2  ;;  %v952_v1 = vpop.f32.mrf.mxu3 }
  0xad   :  { %1235 = vst [vmem:[%s2190_s3 + $0x18] sm:$0xff] %v1199_v63  ;;  %v1061_v2 = vmax.f32 %v1060_v62, %v844_v0  ;;  %v75_v62 = vld [vmem:[%s2188_s0 + $0x1e8] sm:$0xff] }
  0xaf   :  { %v1062_v5 = vmax.f32 %v1061_v2, %v952_v1 }
  0xb0   :  { %v631_v6 = vpop.f32.mrf.mxu0  ;;  %v739_v7 = vpop.f32.mrf.mxu1 }
  0xb1   :  { %v1164_v10 = vadd.f32 %v1737_v14, %v1062_v5  ;;  %1366 = vmatmul.msk.f32.gmra.mxu2 %vm162_vm1, %v107_v3  ;;  %v1063_v11 = vmax.f32 %v631_v6, %v739_v7  ;;  %1402 = vmatmul.msk.f32.gmra.mxu3 %vm162_vm1, %v143_v4  ;;  %v112_v5 = vld [vmem:[%s2188_s0 + $0x310] sm:$0xff] }
  0xb2   :  { %v148_v6 = vld [vmem:[%s2188_s0 + $0x430] sm:$0xff] }
  0xb3   :  { %v1200_v12 = vmax.f32 %v1164_v10, 0.0  ;;  %1294 = vmatmul.msk.f32.gmra.mxu0 %vm162_vm1, %v35_v8  ;;  %1330 = vmatmul.msk.f32.gmra.mxu1 %vm162_vm1, %v71_v9  ;;  %v40_v10 = vld [vmem:[%s2188_s0 + $0xd0] sm:$0xff] }
  0xb4   :  { %v847_v13 = vpop.f32.mrf.mxu2  ;;  %v955_v15 = vpop.f32.mrf.mxu3 }
  0xb5   :  { %1236 = vst [vmem:[%s2190_s3 + $0x20] sm:$0xff] %v1200_v12  ;;  %v1064_v16 = vmax.f32 %v1063_v11, %v847_v13  ;;  %v76_v11 = vld [vmem:[%s2188_s0 + $0x1f0] sm:$0xff] }
  0xb7   :  { %v1065_v19 = vmax.f32 %v1064_v16, %v955_v15 }
  0xb8   :  { %v634_v20 = vpop.f32.mrf.mxu0  ;;  %v742_v21 = vpop.f32.mrf.mxu1 }
  0xb9   :  { %v1165_v24 = vadd.f32 %v1737_v14, %v1065_v19  ;;  %1367 = vmatmul.msk.f32.gmra.mxu2 %vm162_vm1, %v108_v17  ;;  %v1066_v25 = vmax.f32 %v634_v20, %v742_v21  ;;  %1403 = vmatmul.msk.f32.gmra.mxu3 %vm162_vm1, %v144_v18  ;;  %v113_v19 = vld [vmem:[%s2188_s0 + $0x318] sm:$0xff] }
  0xba   :  { %v149_v20 = vld [vmem:[%s2188_s0 + $0x438] sm:$0xff] }
  0xbb   :  { %v1201_v26 = vmax.f32 %v1165_v24, 0.0  ;;  %1295 = vmatmul.msk.f32.gmra.mxu0 %vm162_vm1, %v36_v22  ;;  %1331 = vmatmul.msk.f32.gmra.mxu1 %vm162_vm1, %v72_v23  ;;  %v41_v24 = vld [vmem:[%s2188_s0 + $0xd8] sm:$0xff] }
  0xbc   :  { %v850_v27 = vpop.f32.mrf.mxu2  ;;  %v958_v28 = vpop.f32.mrf.mxu3 }
  0xbd   :  { %1237 = vst [vmem:[%s2190_s3 + $0x28] sm:$0xff] %v1201_v26  ;;  %v1067_v29 = vmax.f32 %v1066_v25, %v850_v27  ;;  %v77_v25 = vld [vmem:[%s2188_s0 + $0x1f8] sm:$0xff] }
  0xbf   :  { %v1068_v32 = vmax.f32 %v1067_v29, %v958_v28 }
  0xc0   :  { %v637_v33 = vpop.f32.mrf.mxu0  ;;  %v745_v34 = vpop.f32.mrf.mxu1 }
  0xc1   :  { %v1166_v37 = vadd.f32 %v1737_v14, %v1068_v32  ;;  %1368 = vmatmul.msk.f32.gmra.mxu2 %vm162_vm1, %v109_v30  ;;  %v1069_v38 = vmax.f32 %v637_v33, %v745_v34  ;;  %1404 = vmatmul.msk.f32.gmra.mxu3 %vm162_vm1, %v145_v31  ;;  %v114_v32 = vld [vmem:[%s2188_s0 + $0x320] sm:$0xff] }
  0xc2   :  { %v150_v33 = vld [vmem:[%s2188_s0 + $0x440] sm:$0xff] }
  0xc3   :  { %v1202_v39 = vmax.f32 %v1166_v37, 0.0  ;;  %1296 = vmatmul.msk.f32.gmra.mxu0 %vm162_vm1, %v37_v35  ;;  %1332 = vmatmul.msk.f32.gmra.mxu1 %vm162_vm1, %v73_v36  ;;  %v42_v37 = vld [vmem:[%s2188_s0 + $0xe0] sm:$0xff] }
  0xc4   :  { %v853_v40 = vpop.f32.mrf.mxu2  ;;  %v961_v41 = vpop.f32.mrf.mxu3 }
  0xc5   :  { %1238 = vst [vmem:[%s2190_s3 + $0x30] sm:$0xff] %v1202_v39  ;;  %v1070_v42 = vmax.f32 %v1069_v38, %v853_v40  ;;  %v78_v38 = vld [vmem:[%s2188_s0 + $0x200] sm:$0xff] }
  0xc7   :  { %v1071_v45 = vmax.f32 %v1070_v42, %v961_v41 }
  0xc8   :  { %v640_v46 = vpop.f32.mrf.mxu0  ;;  %v748_v47 = vpop.f32.mrf.mxu1 }
  0xc9   :  { %v1167_v50 = vadd.f32 %v1737_v14, %v1071_v45  ;;  %1369 = vmatmul.msk.f32.gmra.mxu2 %vm162_vm1, %v110_v43  ;;  %v1072_v51 = vmax.f32 %v640_v46, %v748_v47  ;;  %1405 = vmatmul.msk.f32.gmra.mxu3 %vm162_vm1, %v146_v44  ;;  %v115_v45 = vld [vmem:[%s2188_s0 + $0x328] sm:$0xff] }
  0xca   :  { %v151_v46 = vld [vmem:[%s2188_s0 + $0x448] sm:$0xff] }
  0xcb   :  { %v1203_v52 = vmax.f32 %v1167_v50, 0.0  ;;  %1297 = vmatmul.msk.f32.gmra.mxu0 %vm162_vm1, %v38_v48  ;;  %1333 = vmatmul.msk.f32.gmra.mxu1 %vm162_vm1, %v74_v49  ;;  %v43_v50 = vld [vmem:[%s2188_s0 + $0xe8] sm:$0xff] }
  0xcc   :  { %v856_v53 = vpop.f32.mrf.mxu2  ;;  %v964_v54 = vpop.f32.mrf.mxu3 }
  0xcd   :  { %1239 = vst [vmem:[%s2190_s3 + $0x38] sm:$0xff] %v1203_v52  ;;  %v1073_v55 = vmax.f32 %v1072_v51, %v856_v53  ;;  %v79_v51 = vld [vmem:[%s2188_s0 + $0x208] sm:$0xff] }
  0xcf   :  { %v1074_v58 = vmax.f32 %v1073_v55, %v964_v54 }
  0xd0   :  { %v643_v59 = vpop.f32.mrf.mxu0  ;;  %v751_v60 = vpop.f32.mrf.mxu1 }
  0xd1   :  { %v1168_v63 = vadd.f32 %v1737_v14, %v1074_v58  ;;  %1370 = vmatmul.msk.f32.gmra.mxu2 %vm162_vm1, %v111_v56  ;;  %v1075_v0 = vmax.f32 %v643_v59, %v751_v60  ;;  %1406 = vmatmul.msk.f32.gmra.mxu3 %vm162_vm1, %v147_v57  ;;  %v116_v58 = vld [vmem:[%s2188_s0 + $0x330] sm:$0xff] }
  0xd2   :  { %v152_v59 = vld [vmem:[%s2188_s0 + $0x450] sm:$0xff] }
  0xd3   :  { %v1204_v1 = vmax.f32 %v1168_v63, 0.0  ;;  %1298 = vmatmul.msk.f32.gmra.mxu0 %vm162_vm1, %v39_v61  ;;  %1334 = vmatmul.msk.f32.gmra.mxu1 %vm162_vm1, %v75_v62  ;;  %v44_v63 = vld [vmem:[%s2188_s0 + $0xf0] sm:$0xff] }
  0xd4   :  { %v859_v2 = vpop.f32.mrf.mxu2  ;;  %v967_v3 = vpop.f32.mrf.mxu3 }
  0xd5   :  { %1240 = vst [vmem:[%s2190_s3 + $0x40] sm:$0xff] %v1204_v1  ;;  %v1076_v4 = vmax.f32 %v1075_v0, %v859_v2  ;;  %v80_v0 = vld [vmem:[%s2188_s0 + $0x210] sm:$0xff] }
  0xd7   :  { %v1077_v7 = vmax.f32 %v1076_v4, %v967_v3 }
  0xd8   :  { %v646_v8 = vpop.f32.mrf.mxu0  ;;  %v754_v9 = vpop.f32.mrf.mxu1 }
  0xd9   :  { %v1169_v12 = vadd.f32 %v1737_v14, %v1077_v7  ;;  %1371 = vmatmul.msk.f32.gmra.mxu2 %vm162_vm1, %v112_v5  ;;  %v1078_v13 = vmax.f32 %v646_v8, %v754_v9  ;;  %1407 = vmatmul.msk.f32.gmra.mxu3 %vm162_vm1, %v148_v6  ;;  %v117_v7 = vld [vmem:[%s2188_s0 + $0x338] sm:$0xff] }
  0xda   :  { %v153_v8 = vld [vmem:[%s2188_s0 + $0x458] sm:$0xff] }
  0xdb   :  { %v1205_v15 = vmax.f32 %v1169_v12, 0.0  ;;  %1299 = vmatmul.msk.f32.gmra.mxu0 %vm162_vm1, %v40_v10  ;;  %1335 = vmatmul.msk.f32.gmra.mxu1 %vm162_vm1, %v76_v11  ;;  %v45_v12 = vld [vmem:[%s2188_s0 + $0xf8] sm:$0xff] }
  0xdc   :  { %v862_v16 = vpop.f32.mrf.mxu2  ;;  %v970_v17 = vpop.f32.mrf.mxu3 }
  0xdd   :  { %1241 = vst [vmem:[%s2190_s3 + $0x48] sm:$0xff] %v1205_v15  ;;  %v1079_v18 = vmax.f32 %v1078_v13, %v862_v16  ;;  %v81_v13 = vld [vmem:[%s2188_s0 + $0x218] sm:$0xff] }
  0xdf   :  { %v1080_v21 = vmax.f32 %v1079_v18, %v970_v17 }
  0xe0   :  { %v649_v22 = vpop.f32.mrf.mxu0  ;;  %v757_v23 = vpop.f32.mrf.mxu1 }
  0xe1   :  { %v1170_v26 = vadd.f32 %v1737_v14, %v1080_v21  ;;  %1372 = vmatmul.msk.f32.gmra.mxu2 %vm162_vm1, %v113_v19  ;;  %v1081_v27 = vmax.f32 %v649_v22, %v757_v23  ;;  %1408 = vmatmul.msk.f32.gmra.mxu3 %vm162_vm1, %v149_v20  ;;  %v118_v21 = vld [vmem:[%s2188_s0 + $0x340] sm:$0xff] }
  0xe2   :  { %v154_v22 = vld [vmem:[%s2188_s0 + $0x460] sm:$0xff] }
  0xe3   :  { %v1206_v28 = vmax.f32 %v1170_v26, 0.0  ;;  %1300 = vmatmul.msk.f32.gmra.mxu0 %vm162_vm1, %v41_v24  ;;  %1336 = vmatmul.msk.f32.gmra.mxu1 %vm162_vm1, %v77_v25  ;;  %v46_v26 = vld [vmem:[%s2188_s0 + $0x100] sm:$0xff] }
  0xe4   :  { %v865_v29 = vpop.f32.mrf.mxu2  ;;  %v973_v30 = vpop.f32.mrf.mxu3 }
  0xe5   :  { %1242 = vst [vmem:[%s2190_s3 + $0x50] sm:$0xff] %v1206_v28  ;;  %v1082_v31 = vmax.f32 %v1081_v27, %v865_v29  ;;  %v82_v27 = vld [vmem:[%s2188_s0 + $0x220] sm:$0xff] }
  0xe7   :  { %v1083_v34 = vmax.f32 %v1082_v31, %v973_v30 }
  0xe8   :  { %v652_v35 = vpop.f32.mrf.mxu0  ;;  %v760_v36 = vpop.f32.mrf.mxu1 }
  0xe9   :  { %v1171_v39 = vadd.f32 %v1737_v14, %v1083_v34  ;;  %1373 = vmatmul.msk.f32.gmra.mxu2 %vm162_vm1, %v114_v32  ;;  %v1084_v40 = vmax.f32 %v652_v35, %v760_v36  ;;  %1409 = vmatmul.msk.f32.gmra.mxu3 %vm162_vm1, %v150_v33  ;;  %v119_v34 = vld [vmem:[%s2188_s0 + $0x348] sm:$0xff] }
  0xea   :  { %v155_v35 = vld [vmem:[%s2188_s0 + $0x468] sm:$0xff] }
  0xeb   :  { %v1207_v41 = vmax.f32 %v1171_v39, 0.0  ;;  %1301 = vmatmul.msk.f32.gmra.mxu0 %vm162_vm1, %v42_v37  ;;  %1337 = vmatmul.msk.f32.gmra.mxu1 %vm162_vm1, %v78_v38  ;;  %v47_v39 = vld [vmem:[%s2188_s0 + $0x108] sm:$0xff] }
  0xec   :  { %v868_v42 = vpop.f32.mrf.mxu2  ;;  %v976_v43 = vpop.f32.mrf.mxu3 }
  0xed   :  { %1243 = vst [vmem:[%s2190_s3 + $0x58] sm:$0xff] %v1207_v41  ;;  %v1085_v44 = vmax.f32 %v1084_v40, %v868_v42  ;;  %v83_v40 = vld [vmem:[%s2188_s0 + $0x228] sm:$0xff] }
  0xef   :  { %v1086_v47 = vmax.f32 %v1085_v44, %v976_v43 }
  0xf0   :  { %v655_v48 = vpop.f32.mrf.mxu0  ;;  %v763_v49 = vpop.f32.mrf.mxu1 }
  0xf1   :  { %v1172_v52 = vadd.f32 %v1737_v14, %v1086_v47  ;;  %1374 = vmatmul.msk.f32.gmra.mxu2 %vm162_vm1, %v115_v45  ;;  %v1087_v53 = vmax.f32 %v655_v48, %v763_v49  ;;  %1410 = vmatmul.msk.f32.gmra.mxu3 %vm162_vm1, %v151_v46  ;;  %v120_v47 = vld [vmem:[%s2188_s0 + $0x350] sm:$0xff] }
  0xf2   :  { %v156_v48 = vld [vmem:[%s2188_s0 + $0x470] sm:$0xff] }
  0xf3   :  { %v1208_v54 = vmax.f32 %v1172_v52, 0.0  ;;  %1302 = vmatmul.msk.f32.gmra.mxu0 %vm162_vm1, %v43_v50  ;;  %1338 = vmatmul.msk.f32.gmra.mxu1 %vm162_vm1, %v79_v51  ;;  %v48_v52 = vld [vmem:[%s2188_s0 + $0x110] sm:$0xff] }
  0xf4   :  { %v871_v55 = vpop.f32.mrf.mxu2  ;;  %v979_v56 = vpop.f32.mrf.mxu3 }
  0xf5   :  { %1244 = vst [vmem:[%s2190_s3 + $0x60] sm:$0xff] %v1208_v54  ;;  %v1088_v57 = vmax.f32 %v1087_v53, %v871_v55  ;;  %v84_v53 = vld [vmem:[%s2188_s0 + $0x230] sm:$0xff] }
  0xf7   :  { %v1089_v60 = vmax.f32 %v1088_v57, %v979_v56 }
  0xf8   :  { %v658_v61 = vpop.f32.mrf.mxu0  ;;  %v766_v62 = vpop.f32.mrf.mxu1 }
  0xf9   :  { %v1173_v1 = vadd.f32 %v1737_v14, %v1089_v60  ;;  %1375 = vmatmul.msk.f32.gmra.mxu2 %vm162_vm1, %v116_v58  ;;  %v1090_v2 = vmax.f32 %v658_v61, %v766_v62  ;;  %1411 = vmatmul.msk.f32.gmra.mxu3 %vm162_vm1, %v152_v59  ;;  %v121_v60 = vld [vmem:[%s2188_s0 + $0x358] sm:$0xff] }
  0xfa   :  { %v157_v61 = vld [vmem:[%s2188_s0 + $0x478] sm:$0xff] }
  0xfb   :  { %v1209_v3 = vmax.f32 %v1173_v1, 0.0  ;;  %1303 = vmatmul.msk.f32.gmra.mxu0 %vm162_vm1, %v44_v63  ;;  %1339 = vmatmul.msk.f32.gmra.mxu1 %vm162_vm1, %v80_v0  ;;  %v49_v1 = vld [vmem:[%s2188_s0 + $0x118] sm:$0xff] }
  0xfc   :  { %v874_v4 = vpop.f32.mrf.mxu2  ;;  %v982_v5 = vpop.f32.mrf.mxu3 }
  0xfd   :  { %1245 = vst [vmem:[%s2190_s3 + $0x68] sm:$0xff] %v1209_v3  ;;  %v1091_v6 = vmax.f32 %v1090_v2, %v874_v4  ;;  %v85_v2 = vld [vmem:[%s2188_s0 + $0x238] sm:$0xff] }
  0xff   :  { %v1092_v9 = vmax.f32 %v1091_v6, %v982_v5 }
 0x100   :  { %v661_v10 = vpop.f32.mrf.mxu0  ;;  %v769_v11 = vpop.f32.mrf.mxu1 }
 0x101   :  { %v1174_v15 = vadd.f32 %v1737_v14, %v1092_v9  ;;  %1376 = vmatmul.msk.f32.gmra.mxu2 %vm162_vm1, %v117_v7  ;;  %v1093_v16 = vmax.f32 %v661_v10, %v769_v11  ;;  %1412 = vmatmul.msk.f32.gmra.mxu3 %vm162_vm1, %v153_v8 }
 0x103   :  { %v1210_v17 = vmax.f32 %v1174_v15, 0.0  ;;  %1304 = vmatmul.msk.f32.gmra.mxu0 %vm162_vm1, %v45_v12  ;;  %1340 = vmatmul.msk.f32.gmra.mxu1 %vm162_vm1, %v81_v13 }
 0x104   :  { %v877_v18 = vpop.f32.mrf.mxu2  ;;  %v985_v19 = vpop.f32.mrf.mxu3 }
 0x105   :  { %1246 = vst [vmem:[%s2190_s3 + $0x70] sm:$0xff] %v1210_v17  ;;  %v1094_v20 = vmax.f32 %v1093_v16, %v877_v18 }
 0x107   :  { %v1095_v23 = vmax.f32 %v1094_v20, %v985_v19 }
 0x108   :  { %v664_v24 = vpop.f32.mrf.mxu0  ;;  %v772_v25 = vpop.f32.mrf.mxu1 }
 0x109   :  { %v1175_v28 = vadd.f32 %v1737_v14, %v1095_v23  ;;  %1377 = vmatmul.msk.f32.gmra.mxu2 %vm162_vm1, %v118_v21  ;;  %v1096_v29 = vmax.f32 %v664_v24, %v772_v25  ;;  %1413 = vmatmul.msk.f32.gmra.mxu3 %vm162_vm1, %v154_v22 }
 0x10b   :  { %v1211_v30 = vmax.f32 %v1175_v28, 0.0  ;;  %1305 = vmatmul.msk.f32.gmra.mxu0 %vm162_vm1, %v46_v26  ;;  %1341 = vmatmul.msk.f32.gmra.mxu1 %vm162_vm1, %v82_v27 }
 0x10c   :  { %v880_v31 = vpop.f32.mrf.mxu2  ;;  %v988_v32 = vpop.f32.mrf.mxu3 }
 0x10d   :  { %1247 = vst [vmem:[%s2190_s3 + $0x78] sm:$0xff] %v1211_v30  ;;  %v1097_v33 = vmax.f32 %v1096_v29, %v880_v31 }
 0x10f   :  { %v1098_v36 = vmax.f32 %v1097_v33, %v988_v32 }
 0x110   :  { %v667_v37 = vpop.f32.mrf.mxu0  ;;  %v775_v38 = vpop.f32.mrf.mxu1 }
 0x111   :  { %v1176_v41 = vadd.f32 %v1737_v14, %v1098_v36  ;;  %1378 = vmatmul.msk.f32.gmra.mxu2 %vm162_vm1, %v119_v34  ;;  %v1099_v42 = vmax.f32 %v667_v37, %v775_v38  ;;  %1414 = vmatmul.msk.f32.gmra.mxu3 %vm162_vm1, %v155_v35 }
 0x113   :  { %v1212_v43 = vmax.f32 %v1176_v41, 0.0  ;;  %1306 = vmatmul.msk.f32.gmra.mxu0 %vm162_vm1, %v47_v39  ;;  %1342 = vmatmul.msk.f32.gmra.mxu1 %vm162_vm1, %v83_v40 }
 0x114   :  { %v883_v44 = vpop.f32.mrf.mxu2  ;;  %v991_v45 = vpop.f32.mrf.mxu3 }
 0x115   :  { %1248 = vst [vmem:[%s2190_s3 + $0x80] sm:$0xff] %v1212_v43  ;;  %v1100_v46 = vmax.f32 %v1099_v42, %v883_v44 }
 0x117   :  { %v1101_v49 = vmax.f32 %v1100_v46, %v991_v45 }
 0x118   :  { %v670_v50 = vpop.f32.mrf.mxu0  ;;  %v778_v51 = vpop.f32.mrf.mxu1 }
 0x119   :  { %v1177_v54 = vadd.f32 %v1737_v14, %v1101_v49  ;;  %1379 = vmatmul.msk.f32.gmra.mxu2 %vm162_vm1, %v120_v47  ;;  %v1102_v55 = vmax.f32 %v670_v50, %v778_v51  ;;  %1415 = vmatmul.msk.f32.gmra.mxu3 %vm162_vm1, %v156_v48 }
 0x11b   :  { %v1213_v56 = vmax.f32 %v1177_v54, 0.0  ;;  %1307 = vmatmul.msk.f32.gmra.mxu0 %vm162_vm1, %v48_v52  ;;  %1343 = vmatmul.msk.f32.gmra.mxu1 %vm162_vm1, %v84_v53 }
 0x11c   :  { %v886_v57 = vpop.f32.mrf.mxu2  ;;  %v994_v58 = vpop.f32.mrf.mxu3 }
 0x11d   :  { %1249 = vst [vmem:[%s2190_s3 + $0x88] sm:$0xff] %v1213_v56  ;;  %v1103_v59 = vmax.f32 %v1102_v55, %v886_v57 }
 0x11f   :  { %v1104_v62 = vmax.f32 %v1103_v59, %v994_v58 }
 0x120   :  { %v673_v63 = vpop.f32.mrf.mxu0  ;;  %v781_v0 = vpop.f32.mrf.mxu1 }
 0x121   :  { %v1178_v3 = vadd.f32 %v1737_v14, %v1104_v62  ;;  %1380 = vmatmul.msk.f32.gmra.mxu2 %vm162_vm1, %v121_v60  ;;  %v1105_v4 = vmax.f32 %v673_v63, %v781_v0  ;;  %1416 = vmatmul.msk.f32.gmra.mxu3 %vm162_vm1, %v157_v61 }
 0x123   :  { %v1214_v5 = vmax.f32 %v1178_v3, 0.0  ;;  %1308 = vmatmul.msk.f32.gmra.mxu0 %vm162_vm1, %v49_v1  ;;  %1344 = vmatmul.msk.f32.gmra.mxu1 %vm162_vm1, %v85_v2 }
 0x124   :  { %v889_v6 = vpop.f32.mrf.mxu2  ;;  %v997_v7 = vpop.f32.mrf.mxu3 }
 0x125   :  { %1250 = vst [vmem:[%s2190_s3 + $0x90] sm:$0xff] %v1214_v5  ;;  %v1106_v8 = vmax.f32 %v1105_v4, %v889_v6 }
 0x127   :  { %v1107_v9 = vmax.f32 %v1106_v8, %v997_v7 }
 0x128   :  { %v676_v10 = vpop.f32.mrf.mxu0  ;;  %v784_v11 = vpop.f32.mrf.mxu1 }
 0x129   :  { %v1179_v12 = vadd.f32 %v1737_v14, %v1107_v9  ;;  %v1108_v13 = vmax.f32 %v676_v10, %v784_v11 }
 0x12b   :  { %v1215_v15 = vmax.f32 %v1179_v12, 0.0 }
 0x12c   :  { %v892_v16 = vpop.f32.mrf.mxu2  ;;  %v1000_v17 = vpop.f32.mrf.mxu3 }
 0x12d   :  { %1251 = vst [vmem:[%s2190_s3 + $0x98] sm:$0xff] %v1215_v15  ;;  %v1109_v18 = vmax.f32 %v1108_v13, %v892_v16 }
 0x12f   :  { %v1110_v19 = vmax.f32 %v1109_v18, %v1000_v17 }
 0x130   :  { %v679_v20 = vpop.f32.mrf.mxu0  ;;  %v787_v21 = vpop.f32.mrf.mxu1 }
 0x131   :  { %v1180_v22 = vadd.f32 %v1737_v14, %v1110_v19  ;;  %v1111_v23 = vmax.f32 %v679_v20, %v787_v21 }
 0x133   :  { %v1216_v24 = vmax.f32 %v1180_v22, 0.0 }
 0x134   :  { %v895_v25 = vpop.f32.mrf.mxu2  ;;  %v1003_v26 = vpop.f32.mrf.mxu3 }
 0x135   :  { %1252 = vst [vmem:[%s2190_s3 + $0xa0] sm:$0xff] %v1216_v24  ;;  %v1112_v27 = vmax.f32 %v1111_v23, %v895_v25 }
 0x137   :  { %v1113_v28 = vmax.f32 %v1112_v27, %v1003_v26 }
 0x138   :  { %v682_v29 = vpop.f32.mrf.mxu0  ;;  %v790_v30 = vpop.f32.mrf.mxu1 }
 0x139   :  { %v1181_v31 = vadd.f32 %v1737_v14, %v1113_v28  ;;  %v1114_v32 = vmax.f32 %v682_v29, %v790_v30 }
 0x13b   :  { %v1217_v33 = vmax.f32 %v1181_v31, 0.0 }
 0x13c   :  { %v898_v34 = vpop.f32.mrf.mxu2  ;;  %v1006_v35 = vpop.f32.mrf.mxu3 }
 0x13d   :  { %1253 = vst [vmem:[%s2190_s3 + $0xa8] sm:$0xff] %v1217_v33  ;;  %v1115_v36 = vmax.f32 %v1114_v32, %v898_v34 }
 0x13f   :  { %v1116_v37 = vmax.f32 %v1115_v36, %v1006_v35 }
 0x140   :  { %v685_v38 = vpop.f32.mrf.mxu0  ;;  %v793_v39 = vpop.f32.mrf.mxu1 }
 0x141   :  { %v1182_v40 = vadd.f32 %v1737_v14, %v1116_v37  ;;  %v1117_v41 = vmax.f32 %v685_v38, %v793_v39 }
 0x143   :  { %v1218_v42 = vmax.f32 %v1182_v40, 0.0 }
 0x144   :  { %v901_v43 = vpop.f32.mrf.mxu2  ;;  %v1009_v44 = vpop.f32.mrf.mxu3 }
 0x145   :  { %1254 = vst [vmem:[%s2190_s3 + $0xb0] sm:$0xff] %v1218_v42  ;;  %v1118_v45 = vmax.f32 %v1117_v41, %v901_v43 }
 0x147   :  { %v1119_v46 = vmax.f32 %v1118_v45, %v1009_v44 }
 0x148   :  { %v688_v47 = vpop.f32.mrf.mxu0  ;;  %v796_v48 = vpop.f32.mrf.mxu1 }
 0x149   :  { %v1183_v49 = vadd.f32 %v1737_v14, %v1119_v46  ;;  %v1120_v50 = vmax.f32 %v688_v47, %v796_v48 }
 0x14b   :  { %v1219_v51 = vmax.f32 %v1183_v49, 0.0 }
 0x14c   :  { %v904_v52 = vpop.f32.mrf.mxu2  ;;  %v1012_v53 = vpop.f32.mrf.mxu3 }
 0x14d   :  { %1255 = vst [vmem:[%s2190_s3 + $0xb8] sm:$0xff] %v1219_v51  ;;  %v1121_v54 = vmax.f32 %v1120_v50, %v904_v52 }
 0x14f   :  { %v1122_v55 = vmax.f32 %v1121_v54, %v1012_v53 }
 0x150   :  { %v691_v56 = vpop.f32.mrf.mxu0  ;;  %v799_v57 = vpop.f32.mrf.mxu1 }
 0x151   :  { %v1184_v58 = vadd.f32 %v1737_v14, %v1122_v55  ;;  %v1123_v59 = vmax.f32 %v691_v56, %v799_v57 }
 0x153   :  { %v1220_v60 = vmax.f32 %v1184_v58, 0.0 }
 0x154   :  { %v907_v61 = vpop.f32.mrf.mxu2  ;;  %v1015_v62 = vpop.f32.mrf.mxu3 }
 0x155   :  { %1256 = vst [vmem:[%s2190_s3 + $0xc0] sm:$0xff] %v1220_v60  ;;  %v1124_v63 = vmax.f32 %v1123_v59, %v907_v61 }
 0x157   :  { %v1125_v0 = vmax.f32 %v1124_v63, %v1015_v62 }
 0x158   :  { %v694_v1 = vpop.f32.mrf.mxu0  ;;  %v802_v2 = vpop.f32.mrf.mxu1 }
 0x159   :  { %v1185_v3 = vadd.f32 %v1737_v14, %v1125_v0  ;;  %v1126_v4 = vmax.f32 %v694_v1, %v802_v2 }
 0x15b   :  { %v1221_v5 = vmax.f32 %v1185_v3, 0.0 }
 0x15c   :  { %v910_v6 = vpop.f32.mrf.mxu2  ;;  %v1018_v7 = vpop.f32.mrf.mxu3 }
 0x15d   :  { %1257 = vst [vmem:[%s2190_s3 + $0xc8] sm:$0xff] %v1221_v5  ;;  %v1127_v8 = vmax.f32 %v1126_v4, %v910_v6 }
 0x15f   :  { %v1128_v9 = vmax.f32 %v1127_v8, %v1018_v7 }
 0x160   :  { %v697_v10 = vpop.f32.mrf.mxu0  ;;  %v805_v11 = vpop.f32.mrf.mxu1 }
 0x161   :  { %v1186_v12 = vadd.f32 %v1737_v14, %v1128_v9  ;;  %v1129_v13 = vmax.f32 %v697_v10, %v805_v11 }
 0x163   :  { %v1222_v15 = vmax.f32 %v1186_v12, 0.0 }
 0x164   :  { %v913_v16 = vpop.f32.mrf.mxu2  ;;  %v1021_v17 = vpop.f32.mrf.mxu3 }
 0x165   :  { %1258 = vst [vmem:[%s2190_s3 + $0xd0] sm:$0xff] %v1222_v15  ;;  %v1130_v18 = vmax.f32 %v1129_v13, %v913_v16 }
 0x167   :  { %v1131_v19 = vmax.f32 %v1130_v18, %v1021_v17 }
 0x168   :  { %v700_v20 = vpop.f32.mrf.mxu0  ;;  %v808_v21 = vpop.f32.mrf.mxu1 }
 0x169   :  { %v1187_v22 = vadd.f32 %v1737_v14, %v1131_v19  ;;  %v1132_v23 = vmax.f32 %v700_v20, %v808_v21 }
 0x16b   :  { %v1223_v24 = vmax.f32 %v1187_v22, 0.0 }
 0x16c   :  { %v916_v25 = vpop.f32.mrf.mxu2  ;;  %v1024_v26 = vpop.f32.mrf.mxu3 }
 0x16d   :  { %1259 = vst [vmem:[%s2190_s3 + $0xd8] sm:$0xff] %v1223_v24  ;;  %v1133_v27 = vmax.f32 %v1132_v23, %v916_v25 }
 0x16f   :  { %v1134_v28 = vmax.f32 %v1133_v27, %v1024_v26 }
 0x170   :  { %v703_v29 = vpop.f32.mrf.mxu0  ;;  %v811_v30 = vpop.f32.mrf.mxu1 }
 0x171   :  { %v1188_v31 = vadd.f32 %v1737_v14, %v1134_v28  ;;  %v1135_v32 = vmax.f32 %v703_v29, %v811_v30 }
 0x173   :  { %v1224_v33 = vmax.f32 %v1188_v31, 0.0 }
 0x174   :  { %v919_v34 = vpop.f32.mrf.mxu2  ;;  %v1027_v35 = vpop.f32.mrf.mxu3 }
 0x175   :  { %1260 = vst [vmem:[%s2190_s3 + $0xe0] sm:$0xff] %v1224_v33  ;;  %v1136_v36 = vmax.f32 %v1135_v32, %v919_v34 }
 0x177   :  { %v1137_v37 = vmax.f32 %v1136_v36, %v1027_v35 }
 0x178   :  { %v706_v38 = vpop.f32.mrf.mxu0  ;;  %v814_v39 = vpop.f32.mrf.mxu1 }
 0x179   :  { %v1189_v40 = vadd.f32 %v1737_v14, %v1137_v37  ;;  %v1138_v41 = vmax.f32 %v706_v38, %v814_v39 }
 0x17b   :  { %v1225_v42 = vmax.f32 %v1189_v40, 0.0 }
 0x17c   :  { %v922_v43 = vpop.f32.mrf.mxu2  ;;  %v1030_v44 = vpop.f32.mrf.mxu3 }
 0x17d   :  { %1261 = vst [vmem:[%s2190_s3 + $0xe8] sm:$0xff] %v1225_v42  ;;  %v1139_v45 = vmax.f32 %v1138_v41, %v922_v43 }
 0x17f   :  { %v1140_v46 = vmax.f32 %v1139_v45, %v1030_v44 }
 0x180   :  { %v709_v47 = vpop.f32.mrf.mxu0  ;;  %v817_v48 = vpop.f32.mrf.mxu1 }
 0x181   :  { %v1190_v49 = vadd.f32 %v1737_v14, %v1140_v46  ;;  %v1141_v50 = vmax.f32 %v709_v47, %v817_v48 }
 0x183   :  { %v1226_v51 = vmax.f32 %v1190_v49, 0.0 }
 0x184   :  { %v925_v52 = vpop.f32.mrf.mxu2  ;;  %v1033_v53 = vpop.f32.mrf.mxu3 }
 0x185   :  { %1262 = vst [vmem:[%s2190_s3 + $0xf0] sm:$0xff] %v1226_v51  ;;  %v1142_v54 = vmax.f32 %v1141_v50, %v925_v52 }
 0x187   :  { %v1143_v55 = vmax.f32 %v1142_v54, %v1033_v53 }
 0x188   :  { %v712_v56 = vpop.f32.mrf.mxu0  ;;  %v820_v57 = vpop.f32.mrf.mxu1 }
 0x189   :  { %v1191_v58 = vadd.f32 %v1737_v14, %v1143_v55  ;;  %v1144_v59 = vmax.f32 %v712_v56, %v820_v57 }
 0x18b   :  { %v1227_v60 = vmax.f32 %v1191_v58, 0.0 }
 0x18c   :  { %v928_v61 = vpop.f32.mrf.mxu2  ;;  %v1036_v62 = vpop.f32.mrf.mxu3 }
 0x18d   :  { %1263 = vst [vmem:[%s2190_s3 + $0xf8] sm:$0xff] %v1227_v60  ;;  %v1145_v63 = vmax.f32 %v1144_v59, %v928_v61 }
 0x18f   :  { %v1146_v0 = vmax.f32 %v1145_v63, %v1036_v62 }
 0x190   :  { %v715_v1 = vpop.f32.mrf.mxu0  ;;  %v823_v2 = vpop.f32.mrf.mxu1 }
 0x191   :  { %v1192_v3 = vadd.f32 %v1737_v14, %v1146_v0  ;;  %v1147_v4 = vmax.f32 %v715_v1, %v823_v2 }
 0x193   :  { %v1228_v5 = vmax.f32 %v1192_v3, 0.0 }
 0x194   :  { %v931_v6 = vpop.f32.mrf.mxu2  ;;  %v1039_v7 = vpop.f32.mrf.mxu3 }
 0x195   :  { %1264 = vst [vmem:[%s2190_s3 + $0x100] sm:$0xff] %v1228_v5  ;;  %v1148_v8 = vmax.f32 %v1147_v4, %v931_v6 }
 0x197   :  { %v1149_v9 = vmax.f32 %v1148_v8, %v1039_v7 }
 0x198   :  { %v718_v10 = vpop.f32.mrf.mxu0  ;;  %v826_v11 = vpop.f32.mrf.mxu1 }
 0x199   :  { %v1193_v12 = vadd.f32 %v1737_v14, %v1149_v9  ;;  %v1150_v13 = vmax.f32 %v718_v10, %v826_v11 }
 0x19b   :  { %v1229_v15 = vmax.f32 %v1193_v12, 0.0 }
 0x19c   :  { %v934_v16 = vpop.f32.mrf.mxu2  ;;  %v1042_v17 = vpop.f32.mrf.mxu3 }
 0x19d   :  { %1265 = vst [vmem:[%s2190_s3 + $0x108] sm:$0xff] %v1229_v15  ;;  %v1151_v18 = vmax.f32 %v1150_v13, %v934_v16 }
 0x19f   :  { %v1152_v19 = vmax.f32 %v1151_v18, %v1042_v17 }
 0x1a0   :  { %v721_v20 = vpop.f32.mrf.mxu0  ;;  %v829_v21 = vpop.f32.mrf.mxu1 }
 0x1a1   :  { %v1194_v22 = vadd.f32 %v1737_v14, %v1152_v19  ;;  %v1153_v23 = vmax.f32 %v721_v20, %v829_v21 }
 0x1a3   :  { %v1230_v24 = vmax.f32 %v1194_v22, 0.0 }
 0x1a4   :  { %v937_v25 = vpop.f32.mrf.mxu2  ;;  %v1045_v26 = vpop.f32.mrf.mxu3 }
 0x1a5   :  { %1266 = vst [vmem:[%s2190_s3 + $0x110] sm:$0xff] %v1230_v24  ;;  %v1154_v27 = vmax.f32 %v1153_v23, %v937_v25 }
 0x1a7   :  { %v1155_v28 = vmax.f32 %v1154_v27, %v1045_v26 }
 0x1a9   :  { %v1195_v29 = vadd.f32 %v1737_v14, %v1155_v28 }
 0x1ab   :  { %v1231_v30 = vmax.f32 %v1195_v29, 0.0 }
 0x1ad   :  { %1267 = vst [vmem:[%s2190_s3 + $0x118] sm:$0xff] %v1231_v30 }

// kernel: mul.8
= control target key start
LH: loop header
LB: loop body
LE: loop exit
PB: predicated region body
PF: predicated region fallthrough
CT: control target
= control target key end

     0   :  { %vm3_vm0 = vcmask 130048   ;;  %s358_s0 = inlined_call_operand.vmem [shape: f32[5,5,6,16], index: 0, kind: input, shape index: {}]   ;;  %s359_s1 = inlined_call_operand.vmem [shape: f32[150,16], index: 1, kind: output, shape index: {}]  }
   0x1   :  { %v2_v0 = vld [vmem:[%s358_s0] sm:$0x3f]   ;;  %v125_v1 = vld [vmem:[%s358_s0 + $0x8] sm:$0x3f]   ;;  %v127_v2 = vld [vmem:[%s358_s0 + $0x10] sm:$0x3f]  }
   0x2   :  { %4 = vst.msk [vmem:[%s359_s1] sm:$0x3f] %vm3_vm0, %v2_v0   ;;  %v129_v3 = vld [vmem:[%s358_s0 + $0x18] sm:$0x3f]   ;;  %v131_v4 = vld [vmem:[%s358_s0 + $0x20] sm:$0x3f]  }
   0x3   :  { %126 = vst.msk [vmem:[%s359_s1 + $0x6] sm:$0x3f] %vm3_vm0, %v125_v1   ;;  %v133_v5 = vld [vmem:[%s358_s0 + $0x28] sm:$0x3f]   ;;  %v135_v6 = vld [vmem:[%s358_s0 + $0x30] sm:$0x3f]  }
   0x4   :  { %128 = vst.msk [vmem:[%s359_s1 + $0xc] sm:$0x3f] %vm3_vm0, %v127_v2   ;;  %v137_v7 = vld [vmem:[%s358_s0 + $0x38] sm:$0x3f]   ;;  %v139_v8 = vld [vmem:[%s358_s0 + $0x40] sm:$0x3f]  }
   0x5   :  { %130 = vst.msk [vmem:[%s359_s1 + $0x12] sm:$0x3f] %vm3_vm0, %v129_v3   ;;  %v141_v9 = vld [vmem:[%s358_s0 + $0x48] sm:$0x3f]   ;;  %v143_v10 = vld [vmem:[%s358_s0 + $0x50] sm:$0x3f]  }
   0x6   :  { %132 = vst.msk [vmem:[%s359_s1 + $0x18] sm:$0x3f] %vm3_vm0, %v131_v4   ;;  %v145_v11 = vld [vmem:[%s358_s0 + $0x58] sm:$0x3f]   ;;  %v147_v12 = vld [vmem:[%s358_s0 + $0x60] sm:$0x3f]  }
   0x7   :  { %134 = vst.msk [vmem:[%s359_s1 + $0x1e] sm:$0x3f] %vm3_vm0, %v133_v5   ;;  %v149_v13 = vld [vmem:[%s358_s0 + $0x68] sm:$0x3f]   ;;  %v151_v14 = vld [vmem:[%s358_s0 + $0x70] sm:$0x3f]  }
   0x8   :  { %136 = vst.msk [vmem:[%s359_s1 + $0x24] sm:$0x3f] %vm3_vm0, %v135_v6   ;;  %v153_v15 = vld [vmem:[%s358_s0 + $0x78] sm:$0x3f]   ;;  %v155_v16 = vld [vmem:[%s358_s0 + $0x80] sm:$0x3f]  }
   0x9   :  { %138 = vst.msk [vmem:[%s359_s1 + $0x2a] sm:$0x3f] %vm3_vm0, %v137_v7   ;;  %v157_v17 = vld [vmem:[%s358_s0 + $0x88] sm:$0x3f]   ;;  %v159_v18 = vld [vmem:[%s358_s0 + $0x90] sm:$0x3f]  }
   0xa   :  { %140 = vst.msk [vmem:[%s359_s1 + $0x30] sm:$0x3f] %vm3_vm0, %v139_v8   ;;  %v161_v19 = vld [vmem:[%s358_s0 + $0x98] sm:$0x3f]   ;;  %v163_v20 = vld [vmem:[%s358_s0 + $0xa0] sm:$0x3f]  }
   0xb   :  { %142 = vst.msk [vmem:[%s359_s1 + $0x36] sm:$0x3f] %vm3_vm0, %v141_v9   ;;  %v165_v21 = vld [vmem:[%s358_s0 + $0xa8] sm:$0x3f]   ;;  %v167_v22 = vld [vmem:[%s358_s0 + $0xb0] sm:$0x3f]  }
   0xc   :  { %144 = vst.msk [vmem:[%s359_s1 + $0x3c] sm:$0x3f] %vm3_vm0, %v143_v10   ;;  %v169_v23 = vld [vmem:[%s358_s0 + $0xb8] sm:$0x3f]   ;;  %v171_v24 = vld [vmem:[%s358_s0 + $0xc0] sm:$0x3f]  }
   0xd   :  { %146 = vst.msk [vmem:[%s359_s1 + $0x42] sm:$0x3f] %vm3_vm0, %v145_v11  }
   0xe   :  { %148 = vst.msk [vmem:[%s359_s1 + $0x48] sm:$0x3f] %vm3_vm0, %v147_v12  }
   0xf   :  { %150 = vst.msk [vmem:[%s359_s1 + $0x4e] sm:$0x3f] %vm3_vm0, %v149_v13  }
  0x10   :  { %152 = vst.msk [vmem:[%s359_s1 + $0x54] sm:$0x3f] %vm3_vm0, %v151_v14  }
  0x11   :  { %154 = vst.msk [vmem:[%s359_s1 + $0x5a] sm:$0x3f] %vm3_vm0, %v153_v15  }
  0x12   :  { %156 = vst.msk [vmem:[%s359_s1 + $0x60] sm:$0x3f] %vm3_vm0, %v155_v16  }
  0x13   :  { %158 = vst.msk [vmem:[%s359_s1 + $0x66] sm:$0x3f] %vm3_vm0, %v157_v17  }
  0x14   :  { %160 = vst.msk [vmem:[%s359_s1 + $0x6c] sm:$0x3f] %vm3_vm0, %v159_v18  }
  0x15   :  { %162 = vst.msk [vmem:[%s359_s1 + $0x72] sm:$0x3f] %vm3_vm0, %v161_v19  }
  0x16   :  { %164 = vst.msk [vmem:[%s359_s1 + $0x78] sm:$0x3f] %vm3_vm0, %v163_v20  }
  0x17   :  { %166 = vst.msk [vmem:[%s359_s1 + $0x7e] sm:$0x3f] %vm3_vm0, %v165_v21  }
  0x18   :  { %168 = vst.msk [vmem:[%s359_s1 + $0x84] sm:$0x3f] %vm3_vm0, %v167_v22  }
  0x19   :  { %170 = vst.msk [vmem:[%s359_s1 + $0x8a] sm:$0x3f] %vm3_vm0, %v169_v23  }
  0x1a   :  { %172 = vst.msk [vmem:[%s359_s1 + $0x90] sm:$0x3f] %vm3_vm0, %v171_v24  }

// kernel: resnet_forward.3
= control target key start
LH: loop header
LB: loop body
LE: loop exit
PB: predicated region body
PF: predicated region fallthrough
CT: control target
= control target key end

     0   :  { %vm708_vm0 = vcmask 785408   ;;  %s4878_s1 = inlined_call_operand.vmem [shape: f32[2400,256], index: 1, kind: input, shape index: {}]   ;;  %s4879_s0 = inlined_call_operand.vmem [shape: f32[4,8,2400], index: 0, kind: input, shape index: {}]   ;;  %s4880_s3 = inlined_call_operand.vmem [shape: f32[256,128], index: 3, kind: input, shape index: {}]   ;;  %s4881_s2 = inlined_call_operand.vmem [shape: f32[1,256], index: 2, kind: input, shape index: {}]   ;;  %s4882_s4 = inlined_call_operand.vmem [shape: f32[1,128], index: 4, kind: input, shape index: {}]   ;;  %s4883_s5 = inlined_call_operand.vmem [shape: f32[128,128], index: 5, kind: input, shape index: {}]   ;;  %s4884_s6 = inlined_call_operand.vmem [shape: f32[1,128], index: 6, kind: input, shape index: {}]   ;;  %s4885_s7 = inlined_call_operand.vmem [shape: f32[128,128], index: 7, kind: input, shape index: {}]   ;;  %s4886_s8 = inlined_call_operand.vmem [shape: f32[1,128], index: 8, kind: input, shape index: {}]   ;;  %s4887_s9 = inlined_call_operand.vmem [shape: f32[8,128], index: 9, kind: output, shape index: {}]  }
   0x1   :  { %v138_v0 = vld [vmem:[%s4878_s1 + $0xf0] sm:$0xff]  ;;  %v136_v3 = vld [vmem:[%s4878_s1 + $0xe0] sm:$0xff] }
   0x2   :  { %v170_v1 = vld [vmem:[%s4878_s1 + $0x1f0] sm:$0xff]  ;;  %721 = vmatpush.msra.mxu0 %v138_v0  ;;  %v168_v4 = vld [vmem:[%s4878_s1 + $0x1e0] sm:$0xff]  ;;  %v33_v0 = vld [vmem:[%s4879_s0 + $0x8] sm:$0xff] }
   0x3   :  { %v202_v2 = vld [vmem:[%s4878_s1 + $0x2f0] sm:$0xff]  ;;  %750 = vmatpush.msra.mxu1 %v170_v1  ;;  %v200_v5 = vld [vmem:[%s4878_s1 + $0x2e0] sm:$0xff] }
   0x4   :  { %779 = vmatpush.msra.mxu2 %v202_v2  ;;  %v234_v6 = vld [vmem:[%s4878_s1 + $0x3f0] sm:$0xff]  ;;  %722 = vmatpush.msra.mxu0 %v136_v3  ;;  %v232_v10 = vld [vmem:[%s4878_s1 + $0x3e0] sm:$0xff] }
   0x5   :  { %v134_v7 = vld [vmem:[%s4878_s1 + $0xd0] sm:$0xff]  ;;  %751 = vmatpush.msra.mxu1 %v168_v4  ;;  %808 = vmatpush.msra.mxu3 %v234_v6  ;;  %v132_v11 = vld [vmem:[%s4878_s1 + $0xc0] sm:$0xff] }
   0x6   :  { %v166_v8 = vld [vmem:[%s4878_s1 + $0x1d0] sm:$0xff]  ;;  %780 = vmatpush.msra.mxu2 %v200_v5  ;;  %v164_v12 = vld [vmem:[%s4878_s1 + $0x1c0] sm:$0xff]  ;;  %723 = vmatpush.msra.mxu0 %v134_v7  ;;  %v35_v5 = vld [vmem:[%s4879_s0 + $0x18] sm:$0xff] }
   0x7   :  { %v198_v9 = vld [vmem:[%s4878_s1 + $0x2d0] sm:$0xff]  ;;  %752 = vmatpush.msra.mxu1 %v166_v8  ;;  %v196_v13 = vld [vmem:[%s4878_s1 + $0x2c0] sm:$0xff]  ;;  %809 = vmatpush.msra.mxu3 %v232_v10 }
   0x8   :  { %v230_v14 = vld [vmem:[%s4878_s1 + $0x3d0] sm:$0xff]  ;;  %781 = vmatpush.msra.mxu2 %v198_v9  ;;  %724 = vmatpush.msra.mxu0 %v132_v11  ;;  %v228_v18 = vld [vmem:[%s4878_s1 + $0x3c0] sm:$0xff] }
   0x9   :  { %v130_v15 = vld [vmem:[%s4878_s1 + $0xb0] sm:$0xff]  ;;  %753 = vmatpush.msra.mxu1 %v164_v12  ;;  %810 = vmatpush.msra.mxu3 %v230_v14  ;;  %v128_v19 = vld [vmem:[%s4878_s1 + $0xa0] sm:$0xff] }
   0xa   :  { %v162_v16 = vld [vmem:[%s4878_s1 + $0x1b0] sm:$0xff]  ;;  %782 = vmatpush.msra.mxu2 %v196_v13  ;;  %v160_v20 = vld [vmem:[%s4878_s1 + $0x1a0] sm:$0xff]  ;;  %725 = vmatpush.msra.mxu0 %v130_v15 }
   0xb   :  { %v194_v17 = vld [vmem:[%s4878_s1 + $0x2b0] sm:$0xff]  ;;  %754 = vmatpush.msra.mxu1 %v162_v16  ;;  %v192_v21 = vld [vmem:[%s4878_s1 + $0x2a0] sm:$0xff]  ;;  %811 = vmatpush.msra.mxu3 %v228_v18  ;;  %v51_v18 = vld [vmem:[%s4879_s0 + $0x98] sm:$0xff] }
   0xc   :  { %v226_v22 = vld [vmem:[%s4878_s1 + $0x3b0] sm:$0xff]  ;;  %783 = vmatpush.msra.mxu2 %v194_v17  ;;  %726 = vmatpush.msra.mxu0 %v128_v19  ;;  %v224_v26 = vld [vmem:[%s4878_s1 + $0x3a0] sm:$0xff] }
   0xd   :  { %v126_v23 = vld [vmem:[%s4878_s1 + $0x90] sm:$0xff]  ;;  %755 = vmatpush.msra.mxu1 %v160_v20  ;;  %812 = vmatpush.msra.mxu3 %v226_v22  ;;  %v124_v27 = vld [vmem:[%s4878_s1 + $0x80] sm:$0xff]  ;;  %v53_v20 = vld [vmem:[%s4879_s0 + $0xa8] sm:$0xff] }
   0xe   :  { %v158_v24 = vld [vmem:[%s4878_s1 + $0x190] sm:$0xff]  ;;  %784 = vmatpush.msra.mxu2 %v192_v21  ;;  %v156_v28 = vld [vmem:[%s4878_s1 + $0x180] sm:$0xff]  ;;  %727 = vmatpush.msra.mxu0 %v126_v23 }
   0xf   :  { %v190_v25 = vld [vmem:[%s4878_s1 + $0x290] sm:$0xff]  ;;  %756 = vmatpush.msra.mxu1 %v158_v24  ;;  %v188_v29 = vld [vmem:[%s4878_s1 + $0x280] sm:$0xff]  ;;  %813 = vmatpush.msra.mxu3 %v224_v26 }
  0x10   :  { %v222_v30 = vld [vmem:[%s4878_s1 + $0x390] sm:$0xff]  ;;  %785 = vmatpush.msra.mxu2 %v190_v25  ;;  %728 = vmatpush.msra.mxu0 %v124_v27  ;;  %v220_v34 = vld [vmem:[%s4878_s1 + $0x380] sm:$0xff] }
  0x11   :  { %v122_v31 = vld [vmem:[%s4878_s1 + $0x70] sm:$0xff]  ;;  %757 = vmatpush.msra.mxu1 %v156_v28  ;;  %814 = vmatpush.msra.mxu3 %v222_v30  ;;  %v120_v35 = vld [vmem:[%s4878_s1 + $0x60] sm:$0xff] }
  0x12   :  { %v154_v32 = vld [vmem:[%s4878_s1 + $0x170] sm:$0xff]  ;;  %786 = vmatpush.msra.mxu2 %v188_v29  ;;  %v152_v36 = vld [vmem:[%s4878_s1 + $0x160] sm:$0xff]  ;;  %729 = vmatpush.msra.mxu0 %v122_v31 }
  0x13   :  { %v186_v33 = vld [vmem:[%s4878_s1 + $0x270] sm:$0xff]  ;;  %758 = vmatpush.msra.mxu1 %v154_v32  ;;  %v184_v37 = vld [vmem:[%s4878_s1 + $0x260] sm:$0xff]  ;;  %815 = vmatpush.msra.mxu3 %v220_v34 }
  0x14   :  { %v218_v38 = vld [vmem:[%s4878_s1 + $0x370] sm:$0xff]  ;;  %787 = vmatpush.msra.mxu2 %v186_v33  ;;  %730 = vmatpush.msra.mxu0 %v120_v35  ;;  %v216_v42 = vld [vmem:[%s4878_s1 + $0x360] sm:$0xff] }
  0x15   :  { %v118_v39 = vld [vmem:[%s4878_s1 + $0x50] sm:$0xff]  ;;  %759 = vmatpush.msra.mxu1 %v152_v36  ;;  %816 = vmatpush.msra.mxu3 %v218_v38  ;;  %v116_v43 = vld [vmem:[%s4878_s1 + $0x40] sm:$0xff] }
  0x16   :  { %v150_v40 = vld [vmem:[%s4878_s1 + $0x150] sm:$0xff]  ;;  %788 = vmatpush.msra.mxu2 %v184_v37  ;;  %v148_v44 = vld [vmem:[%s4878_s1 + $0x140] sm:$0xff]  ;;  %731 = vmatpush.msra.mxu0 %v118_v39  ;;  %v71_v39 = vld [vmem:[%s4879_s0 + $0x138] sm:$0xff] }
  0x17   :  { %v182_v41 = vld [vmem:[%s4878_s1 + $0x250] sm:$0xff]  ;;  %760 = vmatpush.msra.mxu1 %v150_v40  ;;  %v180_v45 = vld [vmem:[%s4878_s1 + $0x240] sm:$0xff]  ;;  %817 = vmatpush.msra.mxu3 %v216_v42 }
  0x18   :  { %v214_v46 = vld [vmem:[%s4878_s1 + $0x350] sm:$0xff]  ;;  %789 = vmatpush.msra.mxu2 %v182_v41  ;;  %732 = vmatpush.msra.mxu0 %v116_v43  ;;  %v212_v50 = vld [vmem:[%s4878_s1 + $0x340] sm:$0xff] }
  0x19   :  { %v114_v47 = vld [vmem:[%s4878_s1 + $0x30] sm:$0xff]  ;;  %761 = vmatpush.msra.mxu1 %v148_v44  ;;  %818 = vmatpush.msra.mxu3 %v214_v46  ;;  %v112_v51 = vld [vmem:[%s4878_s1 + $0x20] sm:$0xff] }
  0x1a   :  { %v146_v48 = vld [vmem:[%s4878_s1 + $0x130] sm:$0xff]  ;;  %790 = vmatpush.msra.mxu2 %v180_v45  ;;  %v144_v52 = vld [vmem:[%s4878_s1 + $0x120] sm:$0xff]  ;;  %733 = vmatpush.msra.mxu0 %v114_v47  ;;  %v73_v45 = vld [vmem:[%s4879_s0 + $0x148] sm:$0xff] }
  0x1b   :  { %v178_v49 = vld [vmem:[%s4878_s1 + $0x230] sm:$0xff]  ;;  %762 = vmatpush.msra.mxu1 %v146_v48  ;;  %v176_v53 = vld [vmem:[%s4878_s1 + $0x220] sm:$0xff]  ;;  %819 = vmatpush.msra.mxu3 %v212_v50 }
  0x1c   :  { %v210_v54 = vld [vmem:[%s4878_s1 + $0x330] sm:$0xff]  ;;  %791 = vmatpush.msra.mxu2 %v178_v49  ;;  %734 = vmatpush.msra.mxu0 %v112_v51  ;;  %v208_v58 = vld [vmem:[%s4878_s1 + $0x320] sm:$0xff] }
  0x1d   :  { %v110_v55 = vld [vmem:[%s4878_s1 + $0x10] sm:$0xff]  ;;  %763 = vmatpush.msra.mxu1 %v144_v52  ;;  %820 = vmatpush.msra.mxu3 %v210_v54  ;;  %v108_v59 = vld [vmem:[%s4878_s1] sm:$0xff] }
  0x1e   :  { %v142_v56 = vld [vmem:[%s4878_s1 + $0x110] sm:$0xff]  ;;  %792 = vmatpush.msra.mxu2 %v176_v53  ;;  %v140_v60 = vld [vmem:[%s4878_s1 + $0x100] sm:$0xff]  ;;  %735 = vmatpush.msra.mxu0 %v110_v55 }
  0x1f   :  { %v174_v57 = vld [vmem:[%s4878_s1 + $0x210] sm:$0xff]  ;;  %764 = vmatpush.msra.mxu1 %v142_v56  ;;  %v172_v61 = vld [vmem:[%s4878_s1 + $0x200] sm:$0xff]  ;;  %821 = vmatpush.msra.mxu3 %v208_v58  ;;  %v89_v58 = vld [vmem:[%s4879_s0 + $0x1c8] sm:$0xff] }
  0x20   :  { %v206_v62 = vld [vmem:[%s4878_s1 + $0x310] sm:$0xff]  ;;  %793 = vmatpush.msra.mxu2 %v174_v57  ;;  %v32_v63 = vld [vmem:[%s4879_s0] sm:$0xff]  ;;  %736 = vmatpush.msra.mxu0 %v108_v59 }
  0x21   :  { %765 = vmatpush.msra.mxu1 %v140_v60  ;;  %v34_v1 = vld [vmem:[%s4879_s0 + $0x10] sm:$0xff]  ;;  %822 = vmatpush.msra.mxu3 %v206_v62  ;;  %v204_v3 = vld [vmem:[%s4878_s1 + $0x300] sm:$0xff]  ;;  %v91_v60 = vld [vmem:[%s4879_s0 + $0x1d8] sm:$0xff] }
  0x22   :  { %v266_v2 = vld [vmem:[%s4878_s1 + $0x4f0] sm:$0xff]  ;;  %794 = vmatpush.msra.mxu2 %v172_v61  ;;  %737 = vmatmul.f32.vlgmr.msra.gmra.mxu0 %v32_v63  ;;  %v264_v6 = vld [vmem:[%s4878_s1 + $0x4e0] sm:$0xff] }
  0x23   :  { %v330_v4 = vld [vmem:[%s4878_s1 + $0x6f0] sm:$0xff]  ;;  %766 = vmatmul.f32.vlgmr.msra.gmra.mxu1 %v33_v0  ;;  %795 = vmatmul.f32.vlgmr.msra.gmra.mxu2 %v34_v1  ;;  %v328_v8 = vld [vmem:[%s4878_s1 + $0x6e0] sm:$0xff] }
  0x24   :  { %837 = vmatpush.msrb.mxu0 %v266_v2  ;;  %v298_v7 = vld [vmem:[%s4878_s1 + $0x5f0] sm:$0xff]  ;;  %823 = vmatpush.msra.mxu3 %v204_v3  ;;  %v296_v11 = vld [vmem:[%s4878_s1 + $0x5e0] sm:$0xff] }
  0x25   :  { %895 = vmatpush.msrb.mxu2 %v330_v4  ;;  %v362_v9 = vld [vmem:[%s4878_s1 + $0x7f0] sm:$0xff]  ;;  %824 = vmatmul.f32.vlgmr.msra.gmra.mxu3 %v35_v5  ;;  %v360_v13 = vld [vmem:[%s4878_s1 + $0x7e0] sm:$0xff] }
  0x26   :  { %v262_v10 = vld [vmem:[%s4878_s1 + $0x4d0] sm:$0xff]  ;;  %838 = vmatpush.msrb.mxu0 %v264_v6  ;;  %866 = vmatpush.msrb.mxu1 %v298_v7  ;;  %v260_v14 = vld [vmem:[%s4878_s1 + $0x4c0] sm:$0xff] }
  0x27   :  { %v326_v12 = vld [vmem:[%s4878_s1 + $0x6d0] sm:$0xff]  ;;  %896 = vmatpush.msrb.mxu2 %v328_v8  ;;  %924 = vmatpush.msrb.mxu3 %v362_v9  ;;  %v324_v16 = vld [vmem:[%s4878_s1 + $0x6c0] sm:$0xff] }
  0x28   :  { %839 = vmatpush.msrb.mxu0 %v262_v10  ;;  %v294_v15 = vld [vmem:[%s4878_s1 + $0x5d0] sm:$0xff]  ;;  %867 = vmatpush.msrb.mxu1 %v296_v11  ;;  %v52_v19 = vld [vmem:[%s4879_s0 + $0xa0] sm:$0xff] }
  0x29   :  { %897 = vmatpush.msrb.mxu2 %v326_v12  ;;  %v358_v17 = vld [vmem:[%s4878_s1 + $0x7d0] sm:$0xff]  ;;  %925 = vmatpush.msrb.mxu3 %v360_v13  ;;  %v292_v22 = vld [vmem:[%s4878_s1 + $0x5c0] sm:$0xff] }
  0x2a   :  { %840 = vmatpush.msrb.mxu0 %v260_v14  ;;  %868 = vmatpush.msrb.mxu1 %v294_v15  ;;  %v258_v21 = vld [vmem:[%s4878_s1 + $0x4b0] sm:$0xff]  ;;  %v356_v24 = vld [vmem:[%s4878_s1 + $0x7c0] sm:$0xff] }
  0x2b   :  { %898 = vmatpush.msrb.mxu2 %v324_v16  ;;  %926 = vmatpush.msrb.mxu3 %v358_v17  ;;  %v322_v23 = vld [vmem:[%s4878_s1 + $0x6b0] sm:$0xff]  ;;  %v256_v26 = vld [vmem:[%s4878_s1 + $0x4a0] sm:$0xff] }
  0x2c   :  { %740 = vmatmul.f32.gmra.mxu0 %v51_v18  ;;  %769 = vmatmul.f32.gmra.mxu1 %v52_v19  ;;  %v54_v25 = vld [vmem:[%s4879_s0 + $0xb0] sm:$0xff]  ;;  %v320_v28 = vld [vmem:[%s4878_s1 + $0x6a0] sm:$0xff] }
  0x2d   :  { %798 = vmatmul.f32.gmra.mxu2 %v53_v20  ;;  %841 = vmatpush.msrb.mxu0 %v258_v21  ;;  %v290_v27 = vld [vmem:[%s4878_s1 + $0x5b0] sm:$0xff]  ;;  %v288_v31 = vld [vmem:[%s4878_s1 + $0x5a0] sm:$0xff]  ;;  %v37_v20 = vld [vmem:[%s4879_s0 + $0x28] sm:$0xff] }
  0x2e   :  { %869 = vmatpush.msrb.mxu1 %v292_v22  ;;  %899 = vmatpush.msrb.mxu2 %v322_v23  ;;  %v354_v29 = vld [vmem:[%s4878_s1 + $0x7b0] sm:$0xff]  ;;  %v352_v33 = vld [vmem:[%s4878_s1 + $0x7a0] sm:$0xff]  ;;  %v39_v21 = vld [vmem:[%s4879_s0 + $0x38] sm:$0xff] }
  0x2f   :  { %927 = vmatpush.msrb.mxu3 %v356_v24  ;;  %v254_v30 = vld [vmem:[%s4878_s1 + $0x490] sm:$0xff]  ;;  %842 = vmatpush.msrb.mxu0 %v256_v26  ;;  %v252_v34 = vld [vmem:[%s4878_s1 + $0x480] sm:$0xff] }
  0x30   :  { %827 = vmatmul.f32.gmra.mxu3 %v54_v25  ;;  %v318_v32 = vld [vmem:[%s4878_s1 + $0x690] sm:$0xff]  ;;  %870 = vmatpush.msrb.mxu1 %v290_v27  ;;  %v316_v36 = vld [vmem:[%s4878_s1 + $0x680] sm:$0xff] }
  0x31   :  { %900 = vmatpush.msrb.mxu2 %v320_v28  ;;  %928 = vmatpush.msrb.mxu3 %v354_v29  ;;  %v286_v35 = vld [vmem:[%s4878_s1 + $0x590] sm:$0xff]  ;;  %v72_v40 = vld [vmem:[%s4879_s0 + $0x140] sm:$0xff] }
  0x32   :  { %843 = vmatpush.msrb.mxu0 %v254_v30  ;;  %871 = vmatpush.msrb.mxu1 %v288_v31  ;;  %v350_v37 = vld [vmem:[%s4878_s1 + $0x790] sm:$0xff]  ;;  %v284_v42 = vld [vmem:[%s4878_s1 + $0x580] sm:$0xff] }
  0x33   :  { %901 = vmatpush.msrb.mxu2 %v318_v32  ;;  %v70_v38 = vld [vmem:[%s4879_s0 + $0x130] sm:$0xff]  ;;  %929 = vmatpush.msrb.mxu3 %v352_v33  ;;  %v348_v44 = vld [vmem:[%s4878_s1 + $0x780] sm:$0xff] }
  0x34   :  { %844 = vmatpush.msrb.mxu0 %v252_v34  ;;  %872 = vmatpush.msrb.mxu1 %v286_v35  ;;  %v250_v41 = vld [vmem:[%s4878_s1 + $0x470] sm:$0xff]  ;;  %v248_v46 = vld [vmem:[%s4878_s1 + $0x460] sm:$0xff]  ;;  %v55_v34 = vld [vmem:[%s4879_s0 + $0xb8] sm:$0xff] }
  0x35   :  { %902 = vmatpush.msrb.mxu2 %v316_v36  ;;  %930 = vmatpush.msrb.mxu3 %v350_v37  ;;  %v314_v43 = vld [vmem:[%s4878_s1 + $0x670] sm:$0xff]  ;;  %v312_v48 = vld [vmem:[%s4878_s1 + $0x660] sm:$0xff]  ;;  %v57_v35 = vld [vmem:[%s4879_s0 + $0xc8] sm:$0xff] }
  0x36   :  { %743 = vmatmul.f32.gmra.mxu0 %v70_v38  ;;  %772 = vmatmul.f32.gmra.mxu1 %v71_v39  ;;  %v282_v47 = vld [vmem:[%s4878_s1 + $0x570] sm:$0xff]  ;;  %v280_v51 = vld [vmem:[%s4878_s1 + $0x560] sm:$0xff] }
  0x37   :  { %801 = vmatmul.f32.gmra.mxu2 %v72_v40  ;;  %845 = vmatpush.msrb.mxu0 %v250_v41  ;;  %v346_v49 = vld [vmem:[%s4878_s1 + $0x770] sm:$0xff]  ;;  %v344_v53 = vld [vmem:[%s4878_s1 + $0x760] sm:$0xff] }
  0x38   :  { %873 = vmatpush.msrb.mxu1 %v284_v42  ;;  %903 = vmatpush.msrb.mxu2 %v314_v43  ;;  %v246_v50 = vld [vmem:[%s4878_s1 + $0x450] sm:$0xff]  ;;  %v244_v54 = vld [vmem:[%s4878_s1 + $0x440] sm:$0xff] }
  0x39   :  { %931 = vmatpush.msrb.mxu3 %v348_v44  ;;  %846 = vmatpush.msrb.mxu0 %v248_v46  ;;  %v310_v52 = vld [vmem:[%s4878_s1 + $0x650] sm:$0xff]  ;;  %v308_v56 = vld [vmem:[%s4878_s1 + $0x640] sm:$0xff] }
  0x3a   :  { %830 = vmatmul.f32.gmra.mxu3 %v73_v45  ;;  %874 = vmatpush.msrb.mxu1 %v282_v47  ;;  %v278_v55 = vld [vmem:[%s4878_s1 + $0x550] sm:$0xff]  ;;  %v276_v62 = vld [vmem:[%s4878_s1 + $0x540] sm:$0xff] }
  0x3b   :  { %904 = vmatpush.msrb.mxu2 %v312_v48  ;;  %932 = vmatpush.msrb.mxu3 %v346_v49  ;;  %v342_v57 = vld [vmem:[%s4878_s1 + $0x750] sm:$0xff]  ;;  %v340_v0 = vld [vmem:[%s4878_s1 + $0x740] sm:$0xff] }
  0x3c   :  { %847 = vmatpush.msrb.mxu0 %v246_v50  ;;  %875 = vmatpush.msrb.mxu1 %v280_v51  ;;  %v90_v59 = vld [vmem:[%s4879_s0 + $0x1d0] sm:$0xff]  ;;  %v92_v1 = vld [vmem:[%s4879_s0 + $0x1e0] sm:$0xff] }
  0x3d   :  { %905 = vmatpush.msrb.mxu2 %v310_v52  ;;  %933 = vmatpush.msrb.mxu3 %v344_v53  ;;  %v242_v61 = vld [vmem:[%s4878_s1 + $0x430] sm:$0xff]  ;;  %v240_v2 = vld [vmem:[%s4878_s1 + $0x420] sm:$0xff] }
  0x3e   :  { %848 = vmatpush.msrb.mxu0 %v244_v54  ;;  %876 = vmatpush.msrb.mxu1 %v278_v55  ;;  %v306_v63 = vld [vmem:[%s4878_s1 + $0x630] sm:$0xff]  ;;  %v304_v4 = vld [vmem:[%s4878_s1 + $0x620] sm:$0xff] }
  0x3f   :  { %906 = vmatpush.msrb.mxu2 %v308_v56  ;;  %934 = vmatpush.msrb.mxu3 %v342_v57  ;;  %v274_v3 = vld [vmem:[%s4878_s1 + $0x530] sm:$0xff]  ;;  %v272_v7 = vld [vmem:[%s4878_s1 + $0x520] sm:$0xff] }
  0x40   :  { %746 = vmatmul.f32.gmra.mxu0 %v89_v58  ;;  %775 = vmatmul.f32.gmra.mxu1 %v90_v59  ;;  %v338_v5 = vld [vmem:[%s4878_s1 + $0x730] sm:$0xff]  ;;  %v336_v9 = vld [vmem:[%s4878_s1 + $0x720] sm:$0xff] }
  0x41   :  { %804 = vmatmul.f32.gmra.mxu2 %v91_v60  ;;  %849 = vmatpush.msrb.mxu0 %v242_v61  ;;  %v238_v6 = vld [vmem:[%s4878_s1 + $0x410] sm:$0xff]  ;;  %v236_v10 = vld [vmem:[%s4878_s1 + $0x400] sm:$0xff]  ;;  %v75_v60 = vld [vmem:[%s4879_s0 + $0x158] sm:$0xff] }
  0x42   :  { %877 = vmatpush.msrb.mxu1 %v276_v62  ;;  %907 = vmatpush.msrb.mxu2 %v306_v63  ;;  %v302_v8 = vld [vmem:[%s4878_s1 + $0x610] sm:$0xff]  ;;  %v300_v12 = vld [vmem:[%s4878_s1 + $0x600] sm:$0xff]  ;;  %v77_v61 = vld [vmem:[%s4879_s0 + $0x168] sm:$0xff] }
  0x43   :  { %935 = vmatpush.msrb.mxu3 %v340_v0  ;;  %850 = vmatpush.msrb.mxu0 %v240_v2  ;;  %v270_v11 = vld [vmem:[%s4878_s1 + $0x510] sm:$0xff]  ;;  %v36_v14 = vld [vmem:[%s4879_s0 + $0x20] sm:$0xff] }
  0x44   :  { %833 = vmatmul.f32.gmra.mxu3 %v92_v1  ;;  %878 = vmatpush.msrb.mxu1 %v274_v3  ;;  %v334_v13 = vld [vmem:[%s4878_s1 + $0x710] sm:$0xff]  ;;  %v268_v15 = vld [vmem:[%s4878_s1 + $0x500] sm:$0xff] }
  0x45   :  { %908 = vmatpush.msrb.mxu2 %v304_v4  ;;  %936 = vmatpush.msrb.mxu3 %v338_v5  ;;  %v38_v16 = vld [vmem:[%s4879_s0 + $0x30] sm:$0xff]  ;;  %v332_v18 = vld [vmem:[%s4878_s1 + $0x700] sm:$0xff] }
  0x46   :  { %851 = vmatpush.msrb.mxu0 %v238_v6  ;;  %879 = vmatpush.msrb.mxu1 %v272_v7  ;;  %v394_v17 = vld [vmem:[%s4878_s1 + $0x8f0] sm:$0xff]  ;;  %v392_v22 = vld [vmem:[%s4878_s1 + $0x8e0] sm:$0xff] }
  0x47   :  { %909 = vmatpush.msrb.mxu2 %v302_v8  ;;  %937 = vmatpush.msrb.mxu3 %v336_v9  ;;  %v458_v19 = vld [vmem:[%s4878_s1 + $0xaf0] sm:$0xff]  ;;  %v456_v24 = vld [vmem:[%s4878_s1 + $0xae0] sm:$0xff] }
  0x48   :  { %852 = vmatpush.msrb.mxu0 %v236_v10  ;;  %880 = vmatpush.msrb.mxu1 %v270_v11  ;;  %v426_v23 = vld [vmem:[%s4878_s1 + $0x9f0] sm:$0xff]  ;;  %v424_v27 = vld [vmem:[%s4878_s1 + $0x9e0] sm:$0xff]  ;;  %v93_v10 = vld [vmem:[%s4879_s0 + $0x1e8] sm:$0xff] }
  0x49   :  { %910 = vmatpush.msrb.mxu2 %v300_v12  ;;  %938 = vmatpush.msrb.mxu3 %v334_v13  ;;  %v490_v25 = vld [vmem:[%s4878_s1 + $0xbf0] sm:$0xff]  ;;  %v488_v29 = vld [vmem:[%s4878_s1 + $0xbe0] sm:$0xff]  ;;  %v95_v11 = vld [vmem:[%s4879_s0 + $0x1f8] sm:$0xff] }
  0x4a   :  { %853 = vmatmul.f32.vlgmr.msrb.gmra.mxu0 %v36_v14  ;;  %881 = vmatpush.msrb.mxu1 %v268_v15  ;;  %v390_v26 = vld [vmem:[%s4878_s1 + $0x8d0] sm:$0xff]  ;;  %v388_v30 = vld [vmem:[%s4878_s1 + $0x8c0] sm:$0xff] }
  0x4b   :  { %911 = vmatmul.f32.vlgmr.msrb.gmra.mxu2 %v38_v16  ;;  %953 = vmatpush.msra.mxu0 %v394_v17  ;;  %v454_v28 = vld [vmem:[%s4878_s1 + $0xad0] sm:$0xff]  ;;  %v452_v32 = vld [vmem:[%s4878_s1 + $0xac0] sm:$0xff] }
  0x4c   :  { %939 = vmatpush.msrb.mxu3 %v332_v18  ;;  %1011 = vmatpush.msra.mxu2 %v458_v19  ;;  %v422_v31 = vld [vmem:[%s4878_s1 + $0x9d0] sm:$0xff]  ;;  %v420_v37 = vld [vmem:[%s4878_s1 + $0x9c0] sm:$0xff] }
  0x4d   :  { %882 = vmatmul.f32.vlgmr.msrb.gmra.mxu1 %v37_v20  ;;  %940 = vmatmul.f32.vlgmr.msrb.gmra.mxu3 %v39_v21  ;;  %v486_v33 = vld [vmem:[%s4878_s1 + $0xbd0] sm:$0xff]  ;;  %v484_v39 = vld [vmem:[%s4878_s1 + $0xbc0] sm:$0xff] }
  0x4e   :  { %954 = vmatpush.msra.mxu0 %v392_v22  ;;  %982 = vmatpush.msra.mxu1 %v426_v23  ;;  %v386_v36 = vld [vmem:[%s4878_s1 + $0x8b0] sm:$0xff]  ;;  %v56_v40 = vld [vmem:[%s4879_s0 + $0xc0] sm:$0xff] }
  0x4f   :  { %1012 = vmatpush.msra.mxu2 %v456_v24  ;;  %1040 = vmatpush.msra.mxu3 %v490_v25  ;;  %v450_v38 = vld [vmem:[%s4878_s1 + $0xab0] sm:$0xff]  ;;  %v384_v42 = vld [vmem:[%s4878_s1 + $0x8a0] sm:$0xff] }
  0x50   :  { %955 = vmatpush.msra.mxu0 %v390_v26  ;;  %983 = vmatpush.msra.mxu1 %v424_v27  ;;  %v58_v41 = vld [vmem:[%s4879_s0 + $0xd0] sm:$0xff]  ;;  %v448_v44 = vld [vmem:[%s4878_s1 + $0xaa0] sm:$0xff] }
  0x51   :  { %1013 = vmatpush.msra.mxu2 %v454_v28  ;;  %1041 = vmatpush.msra.mxu3 %v488_v29  ;;  %v418_v43 = vld [vmem:[%s4878_s1 + $0x9b0] sm:$0xff]  ;;  %v416_v47 = vld [vmem:[%s4878_s1 + $0x9a0] sm:$0xff] }
  0x52   :  { %956 = vmatpush.msra.mxu0 %v388_v30  ;;  %984 = vmatpush.msra.mxu1 %v422_v31  ;;  %v482_v45 = vld [vmem:[%s4878_s1 + $0xbb0] sm:$0xff]  ;;  %v480_v49 = vld [vmem:[%s4878_s1 + $0xba0] sm:$0xff] }
  0x53   :  { %1014 = vmatpush.msra.mxu2 %v452_v32  ;;  %1042 = vmatpush.msra.mxu3 %v486_v33  ;;  %v382_v46 = vld [vmem:[%s4878_s1 + $0x890] sm:$0xff]  ;;  %v380_v50 = vld [vmem:[%s4878_s1 + $0x880] sm:$0xff] }
  0x54   :  { %856 = vmatmul.f32.gmra.mxu0 %v55_v34  ;;  %914 = vmatmul.f32.gmra.mxu2 %v57_v35  ;;  %v446_v48 = vld [vmem:[%s4878_s1 + $0xa90] sm:$0xff]  ;;  %v444_v52 = vld [vmem:[%s4878_s1 + $0xa80] sm:$0xff] }
  0x55   :  { %957 = vmatpush.msra.mxu0 %v386_v36  ;;  %985 = vmatpush.msra.mxu1 %v420_v37  ;;  %v414_v51 = vld [vmem:[%s4878_s1 + $0x990] sm:$0xff]  ;;  %v76_v55 = vld [vmem:[%s4879_s0 + $0x160] sm:$0xff]  ;;  %v41_v36 = vld [vmem:[%s4879_s0 + $0x48] sm:$0xff] }
  0x56   :  { %1015 = vmatpush.msra.mxu2 %v450_v38  ;;  %1043 = vmatpush.msra.mxu3 %v484_v39  ;;  %v478_v53 = vld [vmem:[%s4878_s1 + $0xb90] sm:$0xff]  ;;  %v412_v57 = vld [vmem:[%s4878_s1 + $0x980] sm:$0xff]  ;;  %v43_v37 = vld [vmem:[%s4879_s0 + $0x58] sm:$0xff] }
  0x57   :  { %885 = vmatmul.f32.gmra.mxu1 %v56_v40  ;;  %943 = vmatmul.f32.gmra.mxu3 %v58_v41  ;;  %v74_v54 = vld [vmem:[%s4879_s0 + $0x150] sm:$0xff]  ;;  %v476_v59 = vld [vmem:[%s4878_s1 + $0xb80] sm:$0xff] }
  0x58   :  { %958 = vmatpush.msra.mxu0 %v384_v42  ;;  %986 = vmatpush.msra.mxu1 %v418_v43  ;;  %v378_v56 = vld [vmem:[%s4878_s1 + $0x870] sm:$0xff]  ;;  %v376_v62 = vld [vmem:[%s4878_s1 + $0x860] sm:$0xff] }
  0x59   :  { %1016 = vmatpush.msra.mxu2 %v448_v44  ;;  %1044 = vmatpush.msra.mxu3 %v482_v45  ;;  %v442_v58 = vld [vmem:[%s4878_s1 + $0xa70] sm:$0xff]  ;;  %v440_v0 = vld [vmem:[%s4878_s1 + $0xa60] sm:$0xff] }
  0x5a   :  { %959 = vmatpush.msra.mxu0 %v382_v46  ;;  %987 = vmatpush.msra.mxu1 %v416_v47  ;;  %v410_v63 = vld [vmem:[%s4878_s1 + $0x970] sm:$0xff]  ;;  %v408_v3 = vld [vmem:[%s4878_s1 + $0x960] sm:$0xff] }
  0x5b   :  { %1017 = vmatpush.msra.mxu2 %v446_v48  ;;  %1045 = vmatpush.msra.mxu3 %v480_v49  ;;  %v474_v1 = vld [vmem:[%s4878_s1 + $0xb70] sm:$0xff]  ;;  %v472_v5 = vld [vmem:[%s4878_s1 + $0xb60] sm:$0xff] }
  0x5c   :  { %960 = vmatpush.msra.mxu0 %v380_v50  ;;  %988 = vmatpush.msra.mxu1 %v414_v51  ;;  %v374_v2 = vld [vmem:[%s4878_s1 + $0x850] sm:$0xff]  ;;  %v372_v6 = vld [vmem:[%s4878_s1 + $0x840] sm:$0xff]  ;;  %v59_v50 = vld [vmem:[%s4879_s0 + $0xd8] sm:$0xff] }
  0x5d   :  { %1018 = vmatpush.msra.mxu2 %v444_v52  ;;  %1046 = vmatpush.msra.mxu3 %v478_v53  ;;  %v438_v4 = vld [vmem:[%s4878_s1 + $0xa50] sm:$0xff]  ;;  %v436_v8 = vld [vmem:[%s4878_s1 + $0xa40] sm:$0xff]  ;;  %v61_v51 = vld [vmem:[%s4879_s0 + $0xe8] sm:$0xff] }
  0x5e   :  { %859 = vmatmul.f32.gmra.mxu0 %v74_v54  ;;  %917 = vmatmul.f32.gmra.mxu2 %v76_v55  ;;  %v406_v7 = vld [vmem:[%s4878_s1 + $0x950] sm:$0xff]  ;;  %v404_v13 = vld [vmem:[%s4878_s1 + $0x940] sm:$0xff] }
  0x5f   :  { %961 = vmatpush.msra.mxu0 %v378_v56  ;;  %989 = vmatpush.msra.mxu1 %v412_v57  ;;  %v470_v9 = vld [vmem:[%s4878_s1 + $0xb50] sm:$0xff]  ;;  %v468_v15 = vld [vmem:[%s4878_s1 + $0xb40] sm:$0xff] }
  0x60   :  { %1019 = vmatpush.msra.mxu2 %v442_v58  ;;  %1047 = vmatpush.msra.mxu3 %v476_v59  ;;  %v370_v12 = vld [vmem:[%s4878_s1 + $0x830] sm:$0xff]  ;;  %v96_v17 = vld [vmem:[%s4879_s0 + $0x200] sm:$0xff] }
  0x61   :  { %888 = vmatmul.f32.gmra.mxu1 %v75_v60  ;;  %946 = vmatmul.f32.gmra.mxu3 %v77_v61  ;;  %v434_v14 = vld [vmem:[%s4878_s1 + $0xa30] sm:$0xff]  ;;  %v368_v18 = vld [vmem:[%s4878_s1 + $0x820] sm:$0xff] }
  0x62   :  { %962 = vmatpush.msra.mxu0 %v376_v62  ;;  %990 = vmatpush.msra.mxu1 %v410_v63  ;;  %v94_v16 = vld [vmem:[%s4879_s0 + $0x1f0] sm:$0xff]  ;;  %v432_v20 = vld [vmem:[%s4878_s1 + $0xa20] sm:$0xff] }
  0x63   :  { %1020 = vmatpush.msra.mxu2 %v440_v0  ;;  %1048 = vmatpush.msra.mxu3 %v474_v1  ;;  %v402_v19 = vld [vmem:[%s4878_s1 + $0x930] sm:$0xff]  ;;  %v400_v23 = vld [vmem:[%s4878_s1 + $0x920] sm:$0xff] }
  0x64   :  { %963 = vmatpush.msra.mxu0 %v374_v2  ;;  %991 = vmatpush.msra.mxu1 %v408_v3  ;;  %v466_v21 = vld [vmem:[%s4878_s1 + $0xb30] sm:$0xff]  ;;  %v464_v25 = vld [vmem:[%s4878_s1 + $0xb20] sm:$0xff] }
  0x65   :  { %1021 = vmatpush.msra.mxu2 %v438_v4  ;;  %1049 = vmatpush.msra.mxu3 %v472_v5  ;;  %v366_v22 = vld [vmem:[%s4878_s1 + $0x810] sm:$0xff]  ;;  %v364_v26 = vld [vmem:[%s4878_s1 + $0x800] sm:$0xff] }
  0x66   :  { %964 = vmatpush.msra.mxu0 %v372_v6  ;;  %992 = vmatpush.msra.mxu1 %v406_v7  ;;  %v430_v24 = vld [vmem:[%s4878_s1 + $0xa10] sm:$0xff]  ;;  %v428_v28 = vld [vmem:[%s4878_s1 + $0xa00] sm:$0xff] }
  0x67   :  { %1022 = vmatpush.msra.mxu2 %v436_v8  ;;  %1050 = vmatpush.msra.mxu3 %v470_v9  ;;  %v398_v27 = vld [vmem:[%s4878_s1 + $0x910] sm:$0xff]  ;;  %v40_v30 = vld [vmem:[%s4879_s0 + $0x40] sm:$0xff] }
  0x68   :  { %862 = vmatmul.f32.gmra.mxu0 %v93_v10  ;;  %920 = vmatmul.f32.gmra.mxu2 %v95_v11  ;;  %v462_v29 = vld [vmem:[%s4878_s1 + $0xb10] sm:$0xff]  ;;  %v396_v31 = vld [vmem:[%s4878_s1 + $0x900] sm:$0xff] }
  0x69   :  { %965 = vmatpush.msra.mxu0 %v370_v12  ;;  %993 = vmatpush.msra.mxu1 %v404_v13  ;;  %v42_v32 = vld [vmem:[%s4879_s0 + $0x50] sm:$0xff]  ;;  %v460_v34 = vld [vmem:[%s4878_s1 + $0xb00] sm:$0xff]  ;;  %v79_v12 = vld [vmem:[%s4879_s0 + $0x178] sm:$0xff] }
  0x6a   :  { %1023 = vmatpush.msra.mxu2 %v434_v14  ;;  %1051 = vmatpush.msra.mxu3 %v468_v15  ;;  %v522_v33 = vld [vmem:[%s4878_s1 + $0xcf0] sm:$0xff]  ;;  %v520_v38 = vld [vmem:[%s4878_s1 + $0xce0] sm:$0xff]  ;;  %v81_v13 = vld [vmem:[%s4879_s0 + $0x188] sm:$0xff] }
  0x6b   :  { %891 = vmatmul.f32.gmra.mxu1 %v94_v16  ;;  %949 = vmatmul.f32.gmra.mxu3 %v96_v17  ;;  %v586_v35 = vld [vmem:[%s4878_s1 + $0xef0] sm:$0xff]  ;;  %v584_v40 = vld [vmem:[%s4878_s1 + $0xee0] sm:$0xff] }
  0x6c   :  { %966 = vmatpush.msra.mxu0 %v368_v18  ;;  %994 = vmatpush.msra.mxu1 %v402_v19  ;;  %v554_v39 = vld [vmem:[%s4878_s1 + $0xdf0] sm:$0xff]  ;;  %v552_v43 = vld [vmem:[%s4878_s1 + $0xde0] sm:$0xff] }
  0x6d   :  { %1024 = vmatpush.msra.mxu2 %v432_v20  ;;  %1052 = vmatpush.msra.mxu3 %v466_v21  ;;  %v618_v41 = vld [vmem:[%s4878_s1 + $0xff0] sm:$0xff]  ;;  %v616_v45 = vld [vmem:[%s4878_s1 + $0xfe0] sm:$0xff] }
  0x6e   :  { %967 = vmatpush.msra.mxu0 %v366_v22  ;;  %995 = vmatpush.msra.mxu1 %v400_v23  ;;  %v518_v42 = vld [vmem:[%s4878_s1 + $0xcd0] sm:$0xff]  ;;  %v516_v46 = vld [vmem:[%s4878_s1 + $0xcc0] sm:$0xff] }
  0x6f   :  { %1025 = vmatpush.msra.mxu2 %v430_v24  ;;  %1053 = vmatpush.msra.mxu3 %v464_v25  ;;  %v582_v44 = vld [vmem:[%s4878_s1 + $0xed0] sm:$0xff]  ;;  %v580_v48 = vld [vmem:[%s4878_s1 + $0xec0] sm:$0xff] }
  0x70   :  { %968 = vmatpush.msra.mxu0 %v364_v26  ;;  %996 = vmatpush.msra.mxu1 %v398_v27  ;;  %v550_v47 = vld [vmem:[%s4878_s1 + $0xdd0] sm:$0xff]  ;;  %v548_v53 = vld [vmem:[%s4878_s1 + $0xdc0] sm:$0xff]  ;;  %v97_v26 = vld [vmem:[%s4879_s0 + $0x208] sm:$0xff] }
  0x71   :  { %1026 = vmatpush.msra.mxu2 %v428_v28  ;;  %1054 = vmatpush.msra.mxu3 %v462_v29  ;;  %v614_v49 = vld [vmem:[%s4878_s1 + $0xfd0] sm:$0xff]  ;;  %v612_v55 = vld [vmem:[%s4878_s1 + $0xfc0] sm:$0xff]  ;;  %v99_v27 = vld [vmem:[%s4879_s0 + $0x218] sm:$0xff] }
  0x72   :  { %969 = vmatmul.f32.vlgmr.msra.gmra.mxu0 %v40_v30  ;;  %997 = vmatpush.msra.mxu1 %v396_v31  ;;  %v514_v52 = vld [vmem:[%s4878_s1 + $0xcb0] sm:$0xff]  ;;  %v60_v56 = vld [vmem:[%s4879_s0 + $0xe0] sm:$0xff] }
  0x73   :  { %1027 = vmatmul.f32.vlgmr.msra.gmra.mxu2 %v42_v32  ;;  %1069 = vmatpush.msrb.mxu0 %v522_v33  ;;  %v578_v54 = vld [vmem:[%s4878_s1 + $0xeb0] sm:$0xff]  ;;  %v512_v58 = vld [vmem:[%s4878_s1 + $0xca0] sm:$0xff] }
  0x74   :  { %1055 = vmatpush.msra.mxu3 %v460_v34  ;;  %1127 = vmatpush.msrb.mxu2 %v586_v35  ;;  %v62_v57 = vld [vmem:[%s4879_s0 + $0xf0] sm:$0xff]  ;;  %v576_v60 = vld [vmem:[%s4878_s1 + $0xea0] sm:$0xff] }
  0x75   :  { %998 = vmatmul.f32.vlgmr.msra.gmra.mxu1 %v41_v36  ;;  %1056 = vmatmul.f32.vlgmr.msra.gmra.mxu3 %v43_v37  ;;  %v546_v59 = vld [vmem:[%s4878_s1 + $0xdb0] sm:$0xff]  ;;  %v544_v63 = vld [vmem:[%s4878_s1 + $0xda0] sm:$0xff] }
  0x76   :  { %1070 = vmatpush.msrb.mxu0 %v520_v38  ;;  %1098 = vmatpush.msrb.mxu1 %v554_v39  ;;  %v610_v61 = vld [vmem:[%s4878_s1 + $0xfb0] sm:$0xff]  ;;  %v608_v1 = vld [vmem:[%s4878_s1 + $0xfa0] sm:$0xff] }
  0x77   :  { %1128 = vmatpush.msrb.mxu2 %v584_v40  ;;  %1156 = vmatpush.msrb.mxu3 %v618_v41  ;;  %v510_v62 = vld [vmem:[%s4878_s1 + $0xc90] sm:$0xff]  ;;  %v508_v2 = vld [vmem:[%s4878_s1 + $0xc80] sm:$0xff] }
  0x78   :  { %1071 = vmatpush.msrb.mxu0 %v518_v42  ;;  %1099 = vmatpush.msrb.mxu1 %v552_v43  ;;  %v574_v0 = vld [vmem:[%s4878_s1 + $0xe90] sm:$0xff]  ;;  %v572_v4 = vld [vmem:[%s4878_s1 + $0xe80] sm:$0xff] }
  0x79   :  { %1129 = vmatpush.msrb.mxu2 %v582_v44  ;;  %1157 = vmatpush.msrb.mxu3 %v616_v45  ;;  %v542_v3 = vld [vmem:[%s4878_s1 + $0xd90] sm:$0xff]  ;;  %v80_v7 = vld [vmem:[%s4879_s0 + $0x180] sm:$0xff] }
  0x7a   :  { %1072 = vmatpush.msrb.mxu0 %v516_v46  ;;  %1100 = vmatpush.msrb.mxu1 %v550_v47  ;;  %v606_v5 = vld [vmem:[%s4878_s1 + $0xf90] sm:$0xff]  ;;  %v540_v9 = vld [vmem:[%s4878_s1 + $0xd80] sm:$0xff] }
  0x7b   :  { %1130 = vmatpush.msrb.mxu2 %v580_v48  ;;  %1158 = vmatpush.msrb.mxu3 %v614_v49  ;;  %v78_v6 = vld [vmem:[%s4879_s0 + $0x170] sm:$0xff]  ;;  %v604_v11 = vld [vmem:[%s4878_s1 + $0xf80] sm:$0xff] }
  0x7c   :  { %972 = vmatmul.f32.gmra.mxu0 %v59_v50  ;;  %1030 = vmatmul.f32.gmra.mxu2 %v61_v51  ;;  %v506_v8 = vld [vmem:[%s4878_s1 + $0xc70] sm:$0xff]  ;;  %v504_v14 = vld [vmem:[%s4878_s1 + $0xc60] sm:$0xff]  ;;  %v45_v51 = vld [vmem:[%s4879_s0 + $0x68] sm:$0xff] }
  0x7d   :  { %1073 = vmatpush.msrb.mxu0 %v514_v52  ;;  %1101 = vmatpush.msrb.mxu1 %v548_v53  ;;  %v570_v10 = vld [vmem:[%s4878_s1 + $0xe70] sm:$0xff]  ;;  %v568_v16 = vld [vmem:[%s4878_s1 + $0xe60] sm:$0xff]  ;;  %v47_v52 = vld [vmem:[%s4879_s0 + $0x78] sm:$0xff] }
  0x7e   :  { %1131 = vmatpush.msrb.mxu2 %v578_v54  ;;  %1159 = vmatpush.msrb.mxu3 %v612_v55  ;;  %v538_v15 = vld [vmem:[%s4878_s1 + $0xd70] sm:$0xff]  ;;  %v536_v19 = vld [vmem:[%s4878_s1 + $0xd60] sm:$0xff]  ;;  %v139_v55 = vld [vmem:[%s4878_s1 + $0xf8] sm:$0xff] }
  0x7f   :  { %1001 = vmatmul.f32.gmra.mxu1 %v60_v56  ;;  %1059 = vmatmul.f32.gmra.mxu3 %v62_v57  ;;  %v602_v17 = vld [vmem:[%s4878_s1 + $0xf70] sm:$0xff]  ;;  %v600_v21 = vld [vmem:[%s4878_s1 + $0xf60] sm:$0xff] }
  0x80   :  { %1074 = vmatpush.msrb.mxu0 %v512_v58  ;;  %1102 = vmatpush.msrb.mxu1 %v546_v59  ;;  %v502_v18 = vld [vmem:[%s4878_s1 + $0xc50] sm:$0xff]  ;;  %v500_v22 = vld [vmem:[%s4878_s1 + $0xc40] sm:$0xff]  ;;  %v137_v59 = vld [vmem:[%s4878_s1 + $0xe8] sm:$0xff] }
  0x81   :  { %1132 = vmatpush.msrb.mxu2 %v576_v60  ;;  %1160 = vmatpush.msrb.mxu3 %v610_v61  ;;  %v566_v20 = vld [vmem:[%s4878_s1 + $0xe50] sm:$0xff]  ;;  %v564_v24 = vld [vmem:[%s4878_s1 + $0xe40] sm:$0xff] }
  0x82   :  { %1075 = vmatpush.msrb.mxu0 %v510_v62  ;;  %1103 = vmatpush.msrb.mxu1 %v544_v63  ;;  %v534_v23 = vld [vmem:[%s4878_s1 + $0xd50] sm:$0xff]  ;;  %v532_v29 = vld [vmem:[%s4878_s1 + $0xd40] sm:$0xff]  ;;  %v135_v63 = vld [vmem:[%s4878_s1 + $0xd8] sm:$0xff] }
  0x83   :  { %1133 = vmatpush.msrb.mxu2 %v574_v0  ;;  %1161 = vmatpush.msrb.mxu3 %v608_v1  ;;  %v598_v25 = vld [vmem:[%s4878_s1 + $0xf50] sm:$0xff]  ;;  %v596_v31 = vld [vmem:[%s4878_s1 + $0xf40] sm:$0xff]  ;;  %v63_v0 = vld [vmem:[%s4879_s0 + $0xf8] sm:$0xff] }
  0x84   :  { %1076 = vmatpush.msrb.mxu0 %v508_v2  ;;  %1104 = vmatpush.msrb.mxu1 %v542_v3  ;;  %v498_v28 = vld [vmem:[%s4878_s1 + $0xc30] sm:$0xff]  ;;  %v100_v33 = vld [vmem:[%s4879_s0 + $0x220] sm:$0xff]  ;;  %v65_v2 = vld [vmem:[%s4879_s0 + $0x108] sm:$0xff] }
  0x85   :  { %1134 = vmatpush.msrb.mxu2 %v572_v4  ;;  %1162 = vmatpush.msrb.mxu3 %v606_v5  ;;  %v562_v30 = vld [vmem:[%s4878_s1 + $0xe30] sm:$0xff]  ;;  %v496_v34 = vld [vmem:[%s4878_s1 + $0xc20] sm:$0xff]  ;;  %v133_v5 = vld [vmem:[%s4878_s1 + $0xc8] sm:$0xff] }
  0x86   :  { %975 = vmatmul.f32.gmra.mxu0 %v78_v6  ;;  %1033 = vmatmul.f32.gmra.mxu2 %v80_v7  ;;  %v98_v32 = vld [vmem:[%s4879_s0 + $0x210] sm:$0xff]  ;;  %v560_v36 = vld [vmem:[%s4878_s1 + $0xe20] sm:$0xff] }
  0x87   :  { %1077 = vmatpush.msrb.mxu0 %v506_v8  ;;  %1105 = vmatpush.msrb.mxu1 %v540_v9  ;;  %v530_v35 = vld [vmem:[%s4878_s1 + $0xd30] sm:$0xff]  ;;  %v528_v39 = vld [vmem:[%s4878_s1 + $0xd20] sm:$0xff] }
  0x88   :  { %1135 = vmatpush.msrb.mxu2 %v570_v10  ;;  %1163 = vmatpush.msrb.mxu3 %v604_v11  ;;  %v594_v37 = vld [vmem:[%s4878_s1 + $0xf30] sm:$0xff]  ;;  %v592_v41 = vld [vmem:[%s4878_s1 + $0xf20] sm:$0xff]  ;;  %v131_v11 = vld [vmem:[%s4878_s1 + $0xb8] sm:$0xff] }
  0x89   :  { %1004 = vmatmul.f32.gmra.mxu1 %v79_v12  ;;  %1062 = vmatmul.f32.gmra.mxu3 %v81_v13  ;;  %v494_v38 = vld [vmem:[%s4878_s1 + $0xc10] sm:$0xff]  ;;  %v492_v42 = vld [vmem:[%s4878_s1 + $0xc00] sm:$0xff] }
  0x8a   :  { %1078 = vmatpush.msrb.mxu0 %v504_v14  ;;  %1106 = vmatpush.msrb.mxu1 %v538_v15  ;;  %v558_v40 = vld [vmem:[%s4878_s1 + $0xe10] sm:$0xff]  ;;  %v556_v44 = vld [vmem:[%s4878_s1 + $0xe00] sm:$0xff]  ;;  %v129_v15 = vld [vmem:[%s4878_s1 + $0xa8] sm:$0xff] }
  0x8b   :  { %1136 = vmatpush.msrb.mxu2 %v568_v16  ;;  %1164 = vmatpush.msrb.mxu3 %v602_v17  ;;  %v526_v43 = vld [vmem:[%s4878_s1 + $0xd10] sm:$0xff]  ;;  %v44_v46 = vld [vmem:[%s4879_s0 + $0x60] sm:$0xff] }
  0x8c   :  { %1079 = vmatpush.msrb.mxu0 %v502_v18  ;;  %1107 = vmatpush.msrb.mxu1 %v536_v19  ;;  %v590_v45 = vld [vmem:[%s4878_s1 + $0xf10] sm:$0xff]  ;;  %v524_v47 = vld [vmem:[%s4878_s1 + $0xd00] sm:$0xff] }
  0x8d   :  { %1137 = vmatpush.msrb.mxu2 %v566_v20  ;;  %1165 = vmatpush.msrb.mxu3 %v600_v21  ;;  %v46_v48 = vld [vmem:[%s4879_s0 + $0x70] sm:$0xff]  ;;  %v588_v50 = vld [vmem:[%s4878_s1 + $0xf00] sm:$0xff]  ;;  %v127_v20 = vld [vmem:[%s4878_s1 + $0x98] sm:$0xff] }
  0x8e   :  { %1080 = vmatpush.msrb.mxu0 %v500_v22  ;;  %1108 = vmatpush.msrb.mxu1 %v534_v23  ;;  %v650_v49 = vld [vmem:[%s4878_s1 + $0x10f0] sm:$0xff]  ;;  %v648_v53 = vld [vmem:[%s4878_s1 + $0x10e0] sm:$0xff] }
  0x8f   :  { %1138 = vmatpush.msrb.mxu2 %v564_v24  ;;  %1166 = vmatpush.msrb.mxu3 %v598_v25  ;;  %v682_v54 = vld [vmem:[%s4878_s1 + $0x11f0] sm:$0xff]  ;;  %v680_v58 = vld [vmem:[%s4878_s1 + $0x11e0] sm:$0xff] }
  0x90   :  { %978 = vmatmul.f32.gmra.mxu0 %v97_v26  ;;  %1036 = vmatmul.f32.gmra.mxu2 %v99_v27  ;;  %v706_v56 = vld [vmem:[%s4878_s1 + $0x12b0] sm:$0xff]  ;;  %v704_v60 = vld [vmem:[%s4878_s1 + $0x12a0] sm:$0xff] }
  0x91   :  { %1081 = vmatpush.msrb.mxu0 %v498_v28  ;;  %1109 = vmatpush.msrb.mxu1 %v532_v29  ;;  %v646_v57 = vld [vmem:[%s4878_s1 + $0x10d0] sm:$0xff]  ;;  %v644_v61 = vld [vmem:[%s4878_s1 + $0x10c0] sm:$0xff]  ;;  %v125_v28 = vld [vmem:[%s4878_s1 + $0x88] sm:$0xff] }
  0x92   :  { %1139 = vmatpush.msrb.mxu2 %v562_v30  ;;  %1167 = vmatpush.msrb.mxu3 %v596_v31  ;;  %v678_v62 = vld [vmem:[%s4878_s1 + $0x11d0] sm:$0xff]  ;;  %v676_v4 = vld [vmem:[%s4878_s1 + $0x11c0] sm:$0xff]  ;;  %v83_v29 = vld [vmem:[%s4879_s0 + $0x198] sm:$0xff] }
  0x93   :  { %1007 = vmatmul.f32.gmra.mxu1 %v98_v32  ;;  %1065 = vmatmul.f32.gmra.mxu3 %v100_v33  ;;  %v642_v3 = vld [vmem:[%s4878_s1 + $0x10b0] sm:$0xff]  ;;  %v64_v6 = vld [vmem:[%s4879_s0 + $0x100] sm:$0xff]  ;;  %v85_v30 = vld [vmem:[%s4879_s0 + $0x1a8] sm:$0xff] }
  0x94   :  { %1082 = vmatpush.msrb.mxu0 %v496_v34  ;;  %1110 = vmatpush.msrb.mxu1 %v530_v35  ;;  %v66_v7 = vld [vmem:[%s4879_s0 + $0x110] sm:$0xff]  ;;  %v640_v8 = vld [vmem:[%s4878_s1 + $0x10a0] sm:$0xff]  ;;  %v123_v35 = vld [vmem:[%s4878_s1 + $0x78] sm:$0xff] }
  0x95   :  { %1140 = vmatpush.msrb.mxu2 %v560_v36  ;;  %1168 = vmatpush.msrb.mxu3 %v594_v37  ;;  %v674_v9 = vld [vmem:[%s4878_s1 + $0x11b0] sm:$0xff]  ;;  %v672_v14 = vld [vmem:[%s4878_s1 + $0x11a0] sm:$0xff] }
  0x96   :  { %1083 = vmatpush.msrb.mxu0 %v494_v38  ;;  %1111 = vmatpush.msrb.mxu1 %v528_v39  ;;  %v702_v12 = vld [vmem:[%s4878_s1 + $0x1290] sm:$0xff]  ;;  %v700_v16 = vld [vmem:[%s4878_s1 + $0x1280] sm:$0xff] }
  0x97   :  { %1141 = vmatpush.msrb.mxu2 %v558_v40  ;;  %1169 = vmatpush.msrb.mxu3 %v592_v41  ;;  %v638_v13 = vld [vmem:[%s4878_s1 + $0x1090] sm:$0xff]  ;;  %v636_v18 = vld [vmem:[%s4878_s1 + $0x1080] sm:$0xff]  ;;  %v121_v40 = vld [vmem:[%s4878_s1 + $0x68] sm:$0xff] }
  0x98   :  { %1084 = vmatpush.msrb.mxu0 %v492_v42  ;;  %1112 = vmatpush.msrb.mxu1 %v526_v43  ;;  %v670_v19 = vld [vmem:[%s4878_s1 + $0x1190] sm:$0xff]  ;;  %v84_v24 = vld [vmem:[%s4879_s0 + $0x1a0] sm:$0xff] }
  0x99   :  { %1142 = vmatpush.msrb.mxu2 %v556_v44  ;;  %1170 = vmatpush.msrb.mxu3 %v590_v45  ;;  %v82_v21 = vld [vmem:[%s4879_s0 + $0x190] sm:$0xff]  ;;  %v668_v26 = vld [vmem:[%s4878_s1 + $0x1180] sm:$0xff]  ;;  %v119_v44 = vld [vmem:[%s4878_s1 + $0x58] sm:$0xff] }
  0x9a   :  { %1085 = vmatmul.f32.vlgmr.msrb.gmra.mxu0 %v44_v46  ;;  %1113 = vmatpush.msrb.mxu1 %v524_v47  ;;  %v634_v25 = vld [vmem:[%s4878_s1 + $0x1070] sm:$0xff]  ;;  %v632_v31 = vld [vmem:[%s4878_s1 + $0x1060] sm:$0xff]  ;;  %v101_v45 = vld [vmem:[%s4879_s0 + $0x228] sm:$0xff] }
  0x9b   :  { %1143 = vmatmul.f32.vlgmr.msrb.gmra.mxu2 %v46_v48  ;;  %1185 = vmatpush.msra.mxu0 %v650_v49  ;;  %v698_v27 = vld [vmem:[%s4878_s1 + $0x1270] sm:$0xff]  ;;  %v696_v33 = vld [vmem:[%s4878_s1 + $0x1260] sm:$0xff]  ;;  %v103_v48 = vld [vmem:[%s4879_s0 + $0x238] sm:$0xff] }
  0x9c   :  { %1171 = vmatpush.msrb.mxu3 %v588_v50  ;;  %1114 = vmatmul.f32.vlgmr.msrb.gmra.mxu1 %v45_v51  ;;  %v666_v32 = vld [vmem:[%s4878_s1 + $0x1170] sm:$0xff]  ;;  %v664_v37 = vld [vmem:[%s4878_s1 + $0x1160] sm:$0xff] }
  0x9d   :  { %1172 = vmatmul.f32.vlgmr.msrb.gmra.mxu3 %v47_v52  ;;  %1186 = vmatpush.msra.mxu0 %v648_v53  ;;  %v630_v36 = vld [vmem:[%s4878_s1 + $0x1050] sm:$0xff]  ;;  %v628_v41 = vld [vmem:[%s4878_s1 + $0x1040] sm:$0xff]  ;;  %v117_v52 = vld [vmem:[%s4878_s1 + $0x48] sm:$0xff] }
  0x9e   :  { %1214 = vmatpush.msra.mxu1 %v682_v54  ;;  %1272 = vmatpush.msra.mxu3 %v139_v55  ;;  %v694_v38 = vld [vmem:[%s4878_s1 + $0x1250] sm:$0xff]  ;;  %v692_v43 = vld [vmem:[%s4878_s1 + $0x1240] sm:$0xff] }
  0x9f   :  { %1247 = vmatpush.msra.mxu2 %v706_v56  ;;  %1187 = vmatpush.msra.mxu0 %v646_v57  ;;  %v3102_v1 = vpop.f32.mrf.mxu0  ;;  %v662_v42 = vld [vmem:[%s4878_s1 + $0x1150] sm:$0xff]  ;;  %v660_v50 = vld [vmem:[%s4878_s1 + $0x1140] sm:$0xff] }
  0xa0   :  { %1215 = vmatpush.msra.mxu1 %v680_v58  ;;  %1273 = vmatpush.msra.mxu3 %v137_v59  ;;  %v3128_v10 = vpop.f32.mrf.mxu1  ;;  %v626_v49 = vld [vmem:[%s4878_s1 + $0x1030] sm:$0xff]  ;;  %v104_v54 = vld [vmem:[%s4879_s0 + $0x240] sm:$0xff]  ;;  %v115_v59 = vld [vmem:[%s4878_s1 + $0x38] sm:$0xff] }
  0xa1   :  { %1248 = vmatpush.msra.mxu2 %v704_v60  ;;  %1188 = vmatpush.msra.mxu0 %v644_v61  ;;  %v690_v51 = vld [vmem:[%s4878_s1 + $0x1230] sm:$0xff]  ;;  %v624_v55 = vld [vmem:[%s4878_s1 + $0x1020] sm:$0xff] }
  0xa2   :  { %1216 = vmatpush.msra.mxu1 %v678_v62  ;;  %1274 = vmatpush.msra.mxu3 %v135_v63  ;;  %v102_v53 = vld [vmem:[%s4879_s0 + $0x230] sm:$0xff]  ;;  %v688_v57 = vld [vmem:[%s4878_s1 + $0x1220] sm:$0xff] }
  0xa3   :  { %1088 = vmatmul.f32.gmra.mxu0 %v63_v0  ;;  %1146 = vmatmul.f32.gmra.mxu2 %v65_v2  ;;  %v658_v56 = vld [vmem:[%s4878_s1 + $0x1130] sm:$0xff]  ;;  %v656_v61 = vld [vmem:[%s4878_s1 + $0x1120] sm:$0xff]  ;;  %v113_v0 = vld [vmem:[%s4878_s1 + $0x28] sm:$0xff] }
  0xa4   :  { %1189 = vmatpush.msra.mxu0 %v642_v3  ;;  %1217 = vmatpush.msra.mxu1 %v676_v4  ;;  %v622_v60 = vld [vmem:[%s4878_s1 + $0x1010] sm:$0xff]  ;;  %v620_v2 = vld [vmem:[%s4878_s1 + $0x1000] sm:$0xff] }
  0xa5   :  { %1275 = vmatpush.msra.mxu3 %v133_v5  ;;  %1117 = vmatmul.f32.gmra.mxu1 %v64_v6  ;;  %v686_v62 = vld [vmem:[%s4878_s1 + $0x1210] sm:$0xff]  ;;  %v684_v4 = vld [vmem:[%s4878_s1 + $0x1200] sm:$0xff]  ;;  %v111_v5 = vld [vmem:[%s4878_s1 + $0x18] sm:$0xff] }
  0xa6   :  { %1175 = vmatmul.f32.gmra.mxu3 %v66_v7  ;;  %1190 = vmatpush.msra.mxu0 %v640_v8  ;;  %v3148_v17 = vpop.f32.mrf.mxu2  ;;  %v654_v3 = vld [vmem:[%s4878_s1 + $0x1110] sm:$0xff]  ;;  %v48_v6 = vld [vmem:[%s4879_s0 + $0x80] sm:$0xff] }
  0xa7   :  { %1218 = vmatpush.msra.mxu1 %v674_v9  ;;  %1276 = vmatpush.msra.mxu3 %v131_v11  ;;  %v652_v9 = vld [vmem:[%s4878_s1 + $0x1100] sm:$0xff]  ;;  %v50_v11 = vld [vmem:[%s4879_s0 + $0x90] sm:$0xff] }
  0xa8   :  { %1249 = vmatpush.msra.mxu2 %v702_v12  ;;  %1191 = vmatpush.msra.mxu0 %v638_v13  ;;  %v3164_v23 = vpop.f32.mrf.mxu3  ;;  %v171_v12 = vld [vmem:[%s4878_s1 + $0x1f8] sm:$0xff]  ;;  %v109_v13 = vld [vmem:[%s4878_s1 + $0x8] sm:$0xff] }
  0xa9   :  { %1219 = vmatpush.msra.mxu1 %v672_v14  ;;  %v3162_v22 = vpop.f32.mrf.mxu0  ;;  %1277 = vmatpush.msra.mxu3 %v129_v15  ;;  %v3196_v34 = vpop.f32.mrf.mxu1  ;;  %v235_v14 = vld [vmem:[%s4878_s1 + $0x3f8] sm:$0xff]  ;;  %v49_v15 = vld [vmem:[%s4879_s0 + $0x88] sm:$0xff] }
  0xaa   :  { %1250 = vmatpush.msra.mxu2 %v700_v16  ;;  %1192 = vmatpush.msra.mxu0 %v636_v18  ;;  %v169_v16 = vld [vmem:[%s4878_s1 + $0x1e8] sm:$0xff]  ;;  %v203_v18 = vld [vmem:[%s4878_s1 + $0x2f8] sm:$0xff] }
  0xab   :  { %1220 = vmatpush.msra.mxu1 %v670_v19  ;;  %1278 = vmatpush.msra.mxu3 %v127_v20  ;;  %v233_v19 = vld [vmem:[%s4878_s1 + $0x3e8] sm:$0xff] }
  0xac   :  { %1091 = vmatmul.f32.gmra.mxu0 %v82_v21  ;;  %1149 = vmatmul.f32.gmra.mxu2 %v84_v24  ;;  %v267_v21 = vld [vmem:[%s4878_s1 + $0x4f8] sm:$0xff] }
  0xad   :  { %1193 = vmatpush.msra.mxu0 %v634_v25  ;;  %1221 = vmatpush.msra.mxu1 %v668_v26  ;;  %v167_v24 = vld [vmem:[%s4878_s1 + $0x1d8] sm:$0xff]  ;;  %v2013_v25 = vld [vmem:[%s4879_s0] sm:$0xff]  ;;  %v201_v26 = vld [vmem:[%s4878_s1 + $0x2e8] sm:$0xff] }
  0xae   :  { %1251 = vmatpush.msra.mxu2 %v698_v27  ;;  %1279 = vmatpush.msra.mxu3 %v125_v28  ;;  %v231_v27 = vld [vmem:[%s4878_s1 + $0x3d8] sm:$0xff] }
  0xaf   :  { %1120 = vmatmul.f32.gmra.mxu1 %v83_v29  ;;  %1178 = vmatmul.f32.gmra.mxu3 %v85_v30  ;;  %v265_v29 = vld [vmem:[%s4878_s1 + $0x4e8] sm:$0xff] }
  0xb0   :  { %1194 = vmatpush.msra.mxu0 %v632_v31  ;;  %v3210_v39 = vpop.f32.mrf.mxu2  ;;  %1222 = vmatpush.msra.mxu1 %v666_v32  ;;  %v165_v30 = vld [vmem:[%s4878_s1 + $0x1c8] sm:$0xff]  ;;  %v199_v31 = vld [vmem:[%s4878_s1 + $0x2d8] sm:$0xff] }
  0xb1   :  { %1252 = vmatpush.msra.mxu2 %v696_v33  ;;  %1280 = vmatpush.msra.mxu3 %v123_v35  ;;  %v229_v32 = vld [vmem:[%s4878_s1 + $0x3c8] sm:$0xff]  ;;  %v263_v33 = vld [vmem:[%s4878_s1 + $0x4d8] sm:$0xff] }
  0xb2   :  { %1195 = vmatpush.msra.mxu0 %v630_v36  ;;  %1223 = vmatpush.msra.mxu1 %v664_v37  ;;  %v67_v35 = vld [vmem:[%s4879_s0 + $0x118] sm:$0xff] }
  0xb3   :  { %1253 = vmatpush.msra.mxu2 %v694_v38  ;;  %v3230_v46 = vpop.f32.mrf.mxu0  ;;  %v3232_v47 = vpop.f32.mrf.mxu3  ;;  %1281 = vmatpush.msra.mxu3 %v121_v40  ;;  %v69_v38 = vld [vmem:[%s4879_s0 + $0x128] sm:$0xff]  ;;  %v163_v40 = vld [vmem:[%s4878_s1 + $0x1b8] sm:$0xff] }
  0xb4   :  { %1196 = vmatpush.msra.mxu0 %v628_v41  ;;  %1224 = vmatpush.msra.mxu1 %v662_v42  ;;  %v3264_v58 = vpop.f32.mrf.mxu1  ;;  %v197_v41 = vld [vmem:[%s4878_s1 + $0x2c8] sm:$0xff]  ;;  %v227_v42 = vld [vmem:[%s4878_s1 + $0x3b8] sm:$0xff] }
  0xb5   :  { %1254 = vmatpush.msra.mxu2 %v692_v43  ;;  %1282 = vmatpush.msra.mxu3 %v119_v44  ;;  %v261_v43 = vld [vmem:[%s4878_s1 + $0x4c8] sm:$0xff]  ;;  %v68_v44 = vld [vmem:[%s4879_s0 + $0x120] sm:$0xff] }
  0xb6   :  { %1094 = vmatmul.f32.gmra.mxu0 %v101_v45  ;;  %1152 = vmatmul.f32.gmra.mxu2 %v103_v48  ;;  %v161_v48 = vld [vmem:[%s4878_s1 + $0x1a8] sm:$0xff] }
  0xb7   :  { %1197 = vmatpush.msra.mxu0 %v626_v49  ;;  %1225 = vmatpush.msra.mxu1 %v660_v50  ;;  %v195_v49 = vld [vmem:[%s4878_s1 + $0x2b8] sm:$0xff]  ;;  %v225_v50 = vld [vmem:[%s4878_s1 + $0x3a8] sm:$0xff] }
  0xb8   :  { %1255 = vmatpush.msra.mxu2 %v690_v51  ;;  %1283 = vmatpush.msra.mxu3 %v117_v52  ;;  %v259_v51 = vld [vmem:[%s4878_s1 + $0x4b8] sm:$0xff] }
  0xb9   :  { %1123 = vmatmul.f32.gmra.mxu1 %v102_v53  ;;  %1181 = vmatmul.f32.gmra.mxu3 %v104_v54  ;;  %v159_v52 = vld [vmem:[%s4878_s1 + $0x198] sm:$0xff]  ;;  %v193_v54 = vld [vmem:[%s4878_s1 + $0x2a8] sm:$0xff] }
  0xba   :  { %1198 = vmatpush.msra.mxu0 %v624_v55  ;;  %v3278_v63 = vpop.f32.mrf.mxu2  ;;  %1226 = vmatpush.msra.mxu1 %v658_v56  ;;  %v2014_v53 = vld [vmem:[%s4879_s0 + $0x98] sm:$0xff] }
  0xbb   :  { %1256 = vmatpush.msra.mxu2 %v688_v57  ;;  %1284 = vmatpush.msra.mxu3 %v115_v59  ;;  %v223_v55 = vld [vmem:[%s4878_s1 + $0x398] sm:$0xff]  ;;  %v257_v57 = vld [vmem:[%s4878_s1 + $0x4a8] sm:$0xff] }
  0xbc   :  { %1199 = vmatpush.msra.mxu0 %v622_v60  ;;  %1227 = vmatpush.msra.mxu1 %v656_v61  ;;  %v157_v59 = vld [vmem:[%s4878_s1 + $0x188] sm:$0xff]  ;;  %v191_v60 = vld [vmem:[%s4878_s1 + $0x298] sm:$0xff] }
  0xbd   :  { %1257 = vmatpush.msra.mxu2 %v686_v62  ;;  %v3298_v7 = vpop.f32.mrf.mxu0  ;;  %v3300_v8 = vpop.f32.mrf.mxu3  ;;  %1285 = vmatpush.msra.mxu3 %v113_v0  ;;  %v221_v61 = vld [vmem:[%s4878_s1 + $0x388] sm:$0xff]  ;;  %v255_v62 = vld [vmem:[%s4878_s1 + $0x498] sm:$0xff]  ;;  %v86_v0 = vld [vmem:[%s4879_s0 + $0x1b0] sm:$0xff] }
  0xbe   :  { %1200 = vmatpush.msra.mxu0 %v620_v2  ;;  %1228 = vmatpush.msra.mxu1 %v654_v3  ;;  %v3330_v20 = vpop.f32.mrf.mxu1 }
  0xbf   :  { %1258 = vmatpush.msra.mxu2 %v684_v4  ;;  %1286 = vmatpush.msra.mxu3 %v111_v5  ;;  %v88_v4 = vld [vmem:[%s4879_s0 + $0x1c0] sm:$0xff]  ;;  %v155_v5 = vld [vmem:[%s4878_s1 + $0x178] sm:$0xff] }
  0xc0   :  { %1201 = vmatmul.f32.vlgmr.msra.gmra.mxu0 %v48_v6  ;;  %1229 = vmatpush.msra.mxu1 %v652_v9  ;;  %v189_v6 = vld [vmem:[%s4878_s1 + $0x288] sm:$0xff]  ;;  %v219_v9 = vld [vmem:[%s4878_s1 + $0x378] sm:$0xff] }
  0xc1   :  { %2002 = vmatmul.msk.f32.vlgmr.msra.gmra.mxu2 %vm708_vm0, %v50_v11  ;;  %1301 = vmatpush.msrb.mxu0 %v171_v12  ;;  %v253_v11 = vld [vmem:[%s4878_s1 + $0x488] sm:$0xff]  ;;  %v87_v12 = vld [vmem:[%s4879_s0 + $0x1b8] sm:$0xff] }
  0xc2   :  { %1287 = vmatpush.msra.mxu3 %v109_v13  ;;  %1359 = vmatpush.msrb.mxu2 %v235_v14  ;;  %v153_v14 = vld [vmem:[%s4878_s1 + $0x168] sm:$0xff] }
  0xc3   :  { %1230 = vmatmul.f32.vlgmr.msra.gmra.mxu1 %v49_v15  ;;  %1288 = vmatmul.f32.vlgmr.msra.gmra.mxu3 %v2013_v25  ;;  %v187_v15 = vld [vmem:[%s4878_s1 + $0x278] sm:$0xff] }
  0xc4   :  { %1302 = vmatpush.msrb.mxu0 %v169_v16  ;;  %v3347_v28 = vpop.f32.mrf.mxu2  ;;  %1330 = vmatpush.msrb.mxu1 %v203_v18  ;;  %v217_v16 = vld [vmem:[%s4878_s1 + $0x368] sm:$0xff]  ;;  %v251_v18 = vld [vmem:[%s4878_s1 + $0x478] sm:$0xff] }
  0xc5   :  { %1360 = vmatpush.msrb.mxu2 %v233_v19  ;;  %1388 = vmatpush.msrb.mxu3 %v267_v21  ;;  %v151_v19 = vld [vmem:[%s4878_s1 + $0x158] sm:$0xff]  ;;  %v2015_v21 = vld [vmem:[%s4879_s0 + $0x130] sm:$0xff] }
  0xc6   :  { %1303 = vmatpush.msrb.mxu0 %v167_v24  ;;  %1331 = vmatpush.msrb.mxu1 %v201_v26  ;;  %v185_v24 = vld [vmem:[%s4878_s1 + $0x268] sm:$0xff]  ;;  %v215_v25 = vld [vmem:[%s4878_s1 + $0x358] sm:$0xff] }
  0xc7   :  { %1361 = vmatpush.msrb.mxu2 %v231_v27  ;;  %v3367_v36 = vpop.f32.mrf.mxu3  ;;  %v3369_v37 = vpop.f32.mrf.mxu0  ;;  %1389 = vmatpush.msrb.mxu3 %v265_v29  ;;  %v249_v27 = vld [vmem:[%s4878_s1 + $0x468] sm:$0xff] }
  0xc8   :  { %1304 = vmatpush.msrb.mxu0 %v165_v30  ;;  %1332 = vmatpush.msrb.mxu1 %v199_v31  ;;  %v149_v29 = vld [vmem:[%s4878_s1 + $0x148] sm:$0xff]  ;;  %v183_v30 = vld [vmem:[%s4878_s1 + $0x258] sm:$0xff] }
  0xc9   :  { %1362 = vmatpush.msrb.mxu2 %v229_v32  ;;  %1390 = vmatpush.msrb.mxu3 %v263_v33  ;;  %v213_v31 = vld [vmem:[%s4878_s1 + $0x348] sm:$0xff]  ;;  %v247_v32 = vld [vmem:[%s4878_s1 + $0x458] sm:$0xff] }
  0xca   :  { %1204 = vmatmul.f32.gmra.mxu0 %v67_v35  ;;  %v3389_v45 = vpop.f32.mrf.mxu1  ;;  %2003 = vmatmul.msk.f32.gmra.mxu2 %vm708_vm0, %v69_v38  ;;  %v105_v33 = vld [vmem:[%s4879_s0 + $0x248] sm:$0xff] }
  0xcb   :  { %1305 = vmatpush.msrb.mxu0 %v163_v40  ;;  %1333 = vmatpush.msrb.mxu1 %v197_v41  ;;  %v107_v40 = vld [vmem:[%s4879_s0 + $0x258] sm:$0xff] }
  0xcc   :  { %1363 = vmatpush.msrb.mxu2 %v227_v42  ;;  %1391 = vmatpush.msrb.mxu3 %v261_v43  ;;  %v147_v41 = vld [vmem:[%s4878_s1 + $0x138] sm:$0xff]  ;;  %v181_v42 = vld [vmem:[%s4878_s1 + $0x248] sm:$0xff] }
  0xcd   :  { %1233 = vmatmul.f32.gmra.mxu1 %v68_v44  ;;  %1291 = vmatmul.f32.gmra.mxu3 %v2014_v53  ;;  %v211_v43 = vld [vmem:[%s4878_s1 + $0x338] sm:$0xff]  ;;  %v245_v44 = vld [vmem:[%s4878_s1 + $0x448] sm:$0xff] }
  0xce   :  { %1306 = vmatpush.msrb.mxu0 %v161_v48  ;;  %v3416_v56 = vpop.f32.mrf.mxu2  ;;  %1334 = vmatpush.msrb.mxu1 %v195_v49  ;;  %v106_v48 = vld [vmem:[%s4879_s0 + $0x250] sm:$0xff]  ;;  %v243_v53 = vld [vmem:[%s4878_s1 + $0x438] sm:$0xff] }
  0xcf   :  { %1364 = vmatpush.msrb.mxu2 %v225_v50  ;;  %1392 = vmatpush.msrb.mxu3 %v259_v51  ;;  %v145_v50 = vld [vmem:[%s4878_s1 + $0x128] sm:$0xff]  ;;  %v179_v51 = vld [vmem:[%s4878_s1 + $0x238] sm:$0xff] }
  0xd0   :  { %1307 = vmatpush.msrb.mxu0 %v159_v52  ;;  %1335 = vmatpush.msrb.mxu1 %v193_v54  ;;  %v3438_v3 = vpop.f32.mrf.mxu3  ;;  %v209_v52 = vld [vmem:[%s4878_s1 + $0x328] sm:$0xff]  ;;  %v143_v54 = vld [vmem:[%s4878_s1 + $0x118] sm:$0xff] }
  0xd1   :  { %1365 = vmatpush.msrb.mxu2 %v223_v55  ;;  %v3436_v2 = vpop.f32.mrf.mxu0  ;;  %1393 = vmatpush.msrb.mxu3 %v257_v57  ;;  %v2016_v55 = vld [vmem:[%s4879_s0 + $0x1c8] sm:$0xff] }
  0xd2   :  { %1308 = vmatpush.msrb.mxu0 %v157_v59  ;;  %1336 = vmatpush.msrb.mxu1 %v191_v60  ;;  %v177_v57 = vld [vmem:[%s4878_s1 + $0x228] sm:$0xff]  ;;  %v207_v59 = vld [vmem:[%s4878_s1 + $0x318] sm:$0xff] }
  0xd3   :  { %1366 = vmatpush.msrb.mxu2 %v221_v61  ;;  %1394 = vmatpush.msrb.mxu3 %v255_v62  ;;  %v241_v61 = vld [vmem:[%s4878_s1 + $0x428] sm:$0xff] }
  0xd4   :  { %1207 = vmatmul.f32.gmra.mxu0 %v86_v0  ;;  %v3458_v13 = vpop.f32.mrf.mxu1  ;;  %2004 = vmatmul.msk.f32.gmra.mxu2 %vm708_vm0, %v88_v4  ;;  %v141_v62 = vld [vmem:[%s4878_s1 + $0x108] sm:$0xff]  ;;  %v175_v0 = vld [vmem:[%s4878_s1 + $0x218] sm:$0xff] }
  0xd5   :  { %1309 = vmatpush.msrb.mxu0 %v155_v5  ;;  %1337 = vmatpush.msrb.mxu1 %v189_v6  ;;  %v205_v4 = vld [vmem:[%s4878_s1 + $0x308] sm:$0xff]  ;;  %v239_v5 = vld [vmem:[%s4878_s1 + $0x418] sm:$0xff] }
  0xd6   :  { %1367 = vmatpush.msrb.mxu2 %v219_v9  ;;  %1395 = vmatpush.msrb.mxu3 %v253_v11  ;;  %v771_v11 = vadd.f32 %v3196_v34, %v3162_v22  ;;  %v2017_v22 = vld [vmem:[%s4879_s0 + $0x8] sm:$0xff]  ;;  %v363_v34 = vld [vmem:[%s4878_s1 + $0x7f8] sm:$0xff] }
  0xd7   :  { %1236 = vmatmul.f32.gmra.mxu1 %v87_v12  ;;  %1294 = vmatmul.f32.gmra.mxu3 %v2015_v21  ;;  %v3485_v26 = vpop.f32.mrf.mxu2  ;;  %v173_v12 = vld [vmem:[%s4878_s1 + $0x208] sm:$0xff]  ;;  %v331_v21 = vld [vmem:[%s4878_s1 + $0x6f8] sm:$0xff] }
  0xd8   :  { %1310 = vmatpush.msrb.mxu0 %v153_v14  ;;  %1338 = vmatpush.msrb.mxu1 %v187_v15  ;;  %v299_v14 = vld [vmem:[%s4878_s1 + $0x5f8] sm:$0xff]  ;;  %v237_v15 = vld [vmem:[%s4878_s1 + $0x408] sm:$0xff] }
  0xd9   :  { %1368 = vmatpush.msrb.mxu2 %v217_v16  ;;  %1396 = vmatpush.msrb.mxu3 %v251_v18  ;;  %v800_v16 = vadd.f32 %v3210_v39, %v771_v11  ;;  %v297_v39 = vld [vmem:[%s4878_s1 + $0x5e8] sm:$0xff]  ;;  %v387_v11 = vld [vmem:[%s4878_s1 + $0x8b8] sm:$0xff] }
  0xda   :  { %1311 = vmatpush.msrb.mxu0 %v151_v19  ;;  %1339 = vmatpush.msrb.mxu1 %v185_v24  ;;  %v3507_v38 = vpop.f32.mrf.mxu3  ;;  %v2018_v19 = vld [vmem:[%s4879_s0 + $0x18] sm:$0xff]  ;;  %v361_v24 = vld [vmem:[%s4878_s1 + $0x7e8] sm:$0xff] }
  0xdb   :  { %1369 = vmatpush.msrb.mxu2 %v215_v25  ;;  %v3505_v35 = vpop.f32.mrf.mxu0  ;;  %1397 = vmatpush.msrb.mxu3 %v249_v27  ;;  %v2019_v25 = vld [vmem:[%s4879_s0 + $0x10] sm:$0xff]  ;;  %v395_v27 = vld [vmem:[%s4878_s1 + $0x8f8] sm:$0xff] }
  0xdc   :  { %1312 = vmatpush.msrb.mxu0 %v149_v29  ;;  %1340 = vmatpush.msrb.mxu1 %v183_v30  ;;  %v295_v29 = vld [vmem:[%s4878_s1 + $0x5d8] sm:$0xff]  ;;  %v829_v30 = vadd.f32 %v3232_v47, %v800_v16  ;;  %v393_v47 = vld [vmem:[%s4878_s1 + $0x8e8] sm:$0xff] }
  0xdd   :  { %1370 = vmatpush.msrb.mxu2 %v213_v31  ;;  %1398 = vmatpush.msrb.mxu3 %v247_v32  ;;  %v2020_v31 = vld [vmem:[%s4879_s0 + $0x20] sm:$0xff]  ;;  %v329_v32 = vld [vmem:[%s4878_s1 + $0x6e8] sm:$0xff] }
  0xde   :  { %1210 = vmatmul.f32.gmra.mxu0 %v105_v33  ;;  %v3527_v49 = vpop.f32.mrf.mxu1  ;;  %2005 = vmatmul.msk.f32.gmra.mxu2 %vm708_vm0, %v107_v40  ;;  %v359_v33 = vld [vmem:[%s4878_s1 + $0x7d8] sm:$0xff] }
  0xdf   :  { %1313 = vmatpush.msrb.mxu0 %v147_v41  ;;  %1341 = vmatpush.msrb.mxu1 %v181_v42  ;;  %v293_v41 = vld [vmem:[%s4878_s1 + $0x5c8] sm:$0xff]  ;;  %v858_v42 = vadd.f32 %v3436_v2, %v829_v30  ;;  %v291_v2 = vld [vmem:[%s4878_s1 + $0x5b8] sm:$0xff] }
  0xe0   :  { %1371 = vmatpush.msrb.mxu2 %v211_v43  ;;  %1399 = vmatpush.msrb.mxu3 %v245_v44  ;;  %v327_v43 = vld [vmem:[%s4878_s1 + $0x6d8] sm:$0xff]  ;;  %v357_v44 = vld [vmem:[%s4878_s1 + $0x7c8] sm:$0xff] }
  0xe1   :  { %1239 = vmatmul.f32.gmra.mxu1 %v106_v48  ;;  %1297 = vmatmul.f32.gmra.mxu3 %v2016_v55  ;;  %v3554_v60 = vpop.f32.mrf.mxu2  ;;  %v391_v48 = vld [vmem:[%s4878_s1 + $0x8d8] sm:$0xff]  ;;  %v2021_v55 = vld [vmem:[%s4879_s0 + $0xa0] sm:$0xff]  ;;  %v317_v30 = vld [vmem:[%s4878_s1 + $0x688] sm:$0xff] }
  0xe2   :  { %1314 = vmatpush.msrb.mxu0 %v145_v50  ;;  %1342 = vmatpush.msrb.mxu1 %v179_v51 }
  0xe3   :  { %1372 = vmatpush.msrb.mxu2 %v209_v52  ;;  %1400 = vmatpush.msrb.mxu3 %v243_v53  ;;  %v325_v52 = vld [vmem:[%s4878_s1 + $0x6c8] sm:$0xff]  ;;  %v355_v53 = vld [vmem:[%s4878_s1 + $0x7b8] sm:$0xff] }
  0xe4   :  { %1315 = vmatpush.msrb.mxu0 %v143_v54  ;;  %1343 = vmatpush.msrb.mxu1 %v177_v57  ;;  %v3573_v9 = vpop.f32.mrf.mxu3  ;;  %v887_v54 = vadd.f32 %v3458_v13, %v858_v42  ;;  %v389_v57 = vld [vmem:[%s4878_s1 + $0x8c8] sm:$0xff] }
  0xe5   :  { %1373 = vmatpush.msrb.mxu2 %v207_v59  ;;  %v3571_v6 = vpop.f32.mrf.mxu0  ;;  %1401 = vmatpush.msrb.mxu3 %v241_v61  ;;  %v2022_v61 = vld [vmem:[%s4879_s0 + $0xb0] sm:$0xff]  ;;  %v289_v13 = vld [vmem:[%s4878_s1 + $0x5a8] sm:$0xff] }
  0xe6   :  { %1316 = vmatpush.msrb.mxu0 %v141_v62  ;;  %1344 = vmatpush.msrb.mxu1 %v175_v0  ;;  %v323_v62 = vld [vmem:[%s4878_s1 + $0x6b8] sm:$0xff]  ;;  %v916_v0 = vadd.f32 %v3485_v26, %v887_v54  ;;  %v281_v42 = vld [vmem:[%s4878_s1 + $0x568] sm:$0xff]  ;;  %v2028_v54 = vld [vmem:[%s4879_s0 + $0x150] sm:$0xff] }
  0xe7   :  { %1374 = vmatpush.msrb.mxu2 %v205_v4  ;;  %1402 = vmatpush.msrb.mxu3 %v239_v5  ;;  %v353_v4 = vld [vmem:[%s4878_s1 + $0x7a8] sm:$0xff]  ;;  %v2024_v26 = vld [vmem:[%s4879_s0 + $0xb8] sm:$0xff] }
  0xe8   :  { %1317 = vmatmul.f32.vlgmr.msrb.gmra.mxu0 %v2017_v22  ;;  %v3593_v18 = vpop.f32.mrf.mxu1  ;;  %1345 = vmatpush.msrb.mxu1 %v173_v12  ;;  %v2023_v5 = vld [vmem:[%s4879_s0 + $0xa8] sm:$0xff]  ;;  %v287_v12 = vld [vmem:[%s4878_s1 + $0x598] sm:$0xff] }
  0xe9   :  { %1375 = vmatmul.f32.vlgmr.msrb.gmra.mxu2 %v2018_v19  ;;  %1417 = vmatpush.msra.mxu0 %v299_v14  ;;  %v321_v14 = vld [vmem:[%s4878_s1 + $0x6a8] sm:$0xff]  ;;  %v945_v19 = vadd.f32 %v3507_v38, %v916_v0  ;;  %v283_v38 = vld [vmem:[%s4878_s1 + $0x578] sm:$0xff] }
  0xea   :  { %1403 = vmatpush.msrb.mxu3 %v237_v15  ;;  %1475 = vmatpush.msra.mxu2 %v363_v34  ;;  %v351_v15 = vld [vmem:[%s4878_s1 + $0x798] sm:$0xff]  ;;  %v385_v22 = vld [vmem:[%s4878_s1 + $0x8a8] sm:$0xff] }
  0xeb   :  { %1346 = vmatmul.f32.vlgmr.msrb.gmra.mxu1 %v2019_v25  ;;  %1404 = vmatmul.f32.vlgmr.msrb.gmra.mxu3 %v2020_v31  ;;  %v3626_v40 = vpop.f32.mrf.mxu2  ;;  %v285_v34 = vld [vmem:[%s4878_s1 + $0x588] sm:$0xff]  ;;  %v347_v31 = vld [vmem:[%s4878_s1 + $0x778] sm:$0xff] }
  0xec   :  { %1418 = vmatpush.msra.mxu0 %v297_v39  ;;  %1446 = vmatpush.msra.mxu1 %v331_v21  ;;  %v319_v39 = vld [vmem:[%s4878_s1 + $0x698] sm:$0xff]  ;;  %v349_v21 = vld [vmem:[%s4878_s1 + $0x788] sm:$0xff] }
  0xed   :  { %1476 = vmatpush.msra.mxu2 %v361_v24  ;;  %1504 = vmatpush.msra.mxu3 %v395_v27  ;;  %v383_v24 = vld [vmem:[%s4878_s1 + $0x898] sm:$0xff] }
  0xee   :  { %1419 = vmatpush.msra.mxu0 %v295_v29  ;;  %1447 = vmatpush.msra.mxu1 %v329_v32  ;;  %v3644_v50 = vpop.f32.mrf.mxu3  ;;  %v2025_v32 = vld [vmem:[%s4879_s0 + $0x138] sm:$0xff] }
  0xef   :  { %1477 = vmatpush.msra.mxu2 %v359_v33  ;;  %v3646_v51 = vpop.f32.mrf.mxu0  ;;  %1505 = vmatpush.msra.mxu3 %v393_v47  ;;  %v381_v33 = vld [vmem:[%s4878_s1 + $0x888] sm:$0xff] }
  0xf0   :  { %1420 = vmatpush.msra.mxu0 %v293_v41  ;;  %1448 = vmatpush.msra.mxu1 %v327_v43  ;;  %v2026_v41 = vld [vmem:[%s4879_s0 + $0x148] sm:$0xff] }
  0xf1   :  { %1478 = vmatpush.msra.mxu2 %v357_v44  ;;  %1506 = vmatpush.msra.mxu3 %v391_v48  ;;  %v315_v44 = vld [vmem:[%s4878_s1 + $0x678] sm:$0xff]  ;;  %v345_v48 = vld [vmem:[%s4878_s1 + $0x768] sm:$0xff] }
  0xf2   :  { %1320 = vmatmul.f32.gmra.mxu0 %v2021_v55  ;;  %v3664_v59 = vpop.f32.mrf.mxu1  ;;  %1378 = vmatmul.f32.gmra.mxu2 %v2022_v61  ;;  %v313_v55 = vld [vmem:[%s4878_s1 + $0x668] sm:$0xff] }
  0xf3   :  { %1421 = vmatpush.msra.mxu0 %v291_v2  ;;  %1449 = vmatpush.msra.mxu1 %v325_v52  ;;  %v2027_v2 = vld [vmem:[%s4879_s0 + $0x140] sm:$0xff]  ;;  %v379_v52 = vld [vmem:[%s4878_s1 + $0x878] sm:$0xff] }
  0xf4   :  { %1479 = vmatpush.msra.mxu2 %v355_v53  ;;  %1507 = vmatpush.msra.mxu3 %v389_v57  ;;  %v279_v53 = vld [vmem:[%s4878_s1 + $0x558] sm:$0xff] }
  0xf5   :  { %1349 = vmatmul.f32.gmra.mxu1 %v2023_v5  ;;  %1407 = vmatmul.f32.gmra.mxu3 %v2024_v26  ;;  %v343_v57 = vld [vmem:[%s4878_s1 + $0x758] sm:$0xff]  ;;  %v341_v5 = vld [vmem:[%s4878_s1 + $0x748] sm:$0xff] }
  0xf6   :  { %1422 = vmatpush.msra.mxu0 %v289_v13  ;;  %v3697_v16 = vpop.f32.mrf.mxu2  ;;  %1450 = vmatpush.msra.mxu1 %v323_v62  ;;  %v377_v13 = vld [vmem:[%s4878_s1 + $0x868] sm:$0xff] }
  0xf7   :  { %1480 = vmatpush.msra.mxu2 %v353_v4  ;;  %1508 = vmatpush.msra.mxu3 %v387_v11  ;;  %v277_v62 = vld [vmem:[%s4878_s1 + $0x548] sm:$0xff]  ;;  %v311_v4 = vld [vmem:[%s4878_s1 + $0x658] sm:$0xff] }
  0xf8   :  { %1423 = vmatpush.msra.mxu0 %v287_v12  ;;  %1451 = vmatpush.msra.mxu1 %v321_v14  ;;  %v3715_v27 = vpop.f32.mrf.mxu3  ;;  %v375_v11 = vld [vmem:[%s4878_s1 + $0x858] sm:$0xff] }
  0xf9   :  { %1481 = vmatpush.msra.mxu2 %v351_v15  ;;  %v973_v25 = vpop.f32.mrf.mxu0  ;;  %1509 = vmatpush.msra.mxu3 %v385_v22  ;;  %v275_v14 = vld [vmem:[%s4878_s1 + $0x538] sm:$0xff]  ;;  %v309_v15 = vld [vmem:[%s4878_s1 + $0x648] sm:$0xff] }
  0xfa   :  { %1424 = vmatpush.msra.mxu0 %v285_v34  ;;  %v974_v29 = vadd.f32 %v973_v25, %v945_v19  ;;  %1452 = vmatpush.msra.mxu1 %v319_v39  ;;  %v339_v22 = vld [vmem:[%s4878_s1 + $0x738] sm:$0xff]  ;;  %v2029_v34 = vld [vmem:[%s4879_s0 + $0x1d0] sm:$0xff]  ;;  %v373_v19 = vld [vmem:[%s4878_s1 + $0x848] sm:$0xff] }
  0xfb   :  { %1482 = vmatpush.msra.mxu2 %v349_v21  ;;  %1510 = vmatpush.msra.mxu3 %v383_v24  ;;  %v2030_v21 = vld [vmem:[%s4879_s0 + $0x1e0] sm:$0xff]  ;;  %v273_v24 = vld [vmem:[%s4878_s1 + $0x528] sm:$0xff]  ;;  %v307_v25 = vld [vmem:[%s4878_s1 + $0x638] sm:$0xff] }
  0xfc   :  { %1323 = vmatmul.f32.gmra.mxu0 %v2025_v32  ;;  %v1002_v47 = vpop.f32.mrf.mxu1  ;;  %1381 = vmatmul.f32.gmra.mxu2 %v2026_v41  ;;  %v2032_v32 = vld [vmem:[%s4879_s0 + $0x1e8] sm:$0xff] }
  0xfd   :  { %1425 = vmatpush.msra.mxu0 %v283_v38  ;;  %v1003_v43 = vadd.f32 %v1002_v47, %v974_v29  ;;  %1453 = vmatpush.msra.mxu1 %v317_v30  ;;  %v337_v38 = vld [vmem:[%s4878_s1 + $0x728] sm:$0xff]  ;;  %v2031_v29 = vld [vmem:[%s4879_s0 + $0x1d8] sm:$0xff] }
  0xfe   :  { %1483 = vmatpush.msra.mxu2 %v347_v31  ;;  %1511 = vmatpush.msra.mxu3 %v381_v33  ;;  %v371_v30 = vld [vmem:[%s4878_s1 + $0x838] sm:$0xff]  ;;  %v305_v33 = vld [vmem:[%s4878_s1 + $0x628] sm:$0xff] }
  0xff   :  { %1352 = vmatmul.f32.gmra.mxu1 %v2027_v2  ;;  %1410 = vmatmul.f32.gmra.mxu3 %v2028_v54  ;;  %v1031_v61 = vpop.f32.mrf.mxu2  ;;  %v271_v31 = vld [vmem:[%s4878_s1 + $0x518] sm:$0xff]  ;;  %v301_v54 = vld [vmem:[%s4878_s1 + $0x608] sm:$0xff] }
 0x100   :  { %1426 = vmatpush.msra.mxu0 %v281_v42  ;;  %1454 = vmatpush.msra.mxu1 %v315_v44  ;;  %v3768_v0 = vadd.f32 %v1031_v61, %v1003_v43  ;;  %v335_v47 = vld [vmem:[%s4878_s1 + $0x718] sm:$0xff]  ;;  %v369_v42 = vld [vmem:[%s4878_s1 + $0x828] sm:$0xff] }
 0x101   :  { %1484 = vmatpush.msra.mxu2 %v345_v48  ;;  %1512 = vmatpush.msra.mxu3 %v379_v52  ;;  %v269_v43 = vld [vmem:[%s4878_s1 + $0x508] sm:$0xff]  ;;  %v303_v44 = vld [vmem:[%s4878_s1 + $0x618] sm:$0xff] }
 0x102   :  { %1427 = vmatpush.msra.mxu0 %v279_v53  ;;  %1455 = vmatpush.msra.mxu1 %v313_v55  ;;  %v3781_v26 = vpop.f32.mrf.mxu3  ;;  %v333_v48 = vld [vmem:[%s4878_s1 + $0x708] sm:$0xff]  ;;  %v367_v2 = vld [vmem:[%s4878_s1 + $0x818] sm:$0xff] }
 0x103   :  { %1485 = vmatpush.msra.mxu2 %v343_v57  ;;  %v3779_v12 = vpop.f32.mrf.mxu0  ;;  %1513 = vmatpush.msra.mxu3 %v377_v13  ;;  %v427_v55 = vld [vmem:[%s4878_s1 + $0x9f8] sm:$0xff]  ;;  %v365_v57 = vld [vmem:[%s4878_s1 + $0x808] sm:$0xff] }
 0x104   :  { %1428 = vmatpush.msra.mxu0 %v277_v62  ;;  %1456 = vmatpush.msra.mxu1 %v311_v4  ;;  %v2033_v61 = vld [vmem:[%s4879_s0 + $0x28] sm:$0xff]  ;;  %v491_v13 = vld [vmem:[%s4878_s1 + $0xbf8] sm:$0xff] }
 0x105   :  { %1486 = vmatpush.msra.mxu2 %v341_v5  ;;  %1514 = vmatpush.msra.mxu3 %v375_v11  ;;  %v2034_v4 = vld [vmem:[%s4879_s0 + $0x38] sm:$0xff]  ;;  %v425_v5 = vld [vmem:[%s4878_s1 + $0x9e8] sm:$0xff] }
 0x106   :  { %1326 = vmatmul.f32.gmra.mxu0 %v2029_v34  ;;  %v3798_v39 = vpop.f32.mrf.mxu1  ;;  %1384 = vmatmul.f32.gmra.mxu2 %v2030_v21  ;;  %v459_v11 = vld [vmem:[%s4878_s1 + $0xaf8] sm:$0xff]  ;;  %v457_v21 = vld [vmem:[%s4878_s1 + $0xae8] sm:$0xff] }
 0x107   :  { %1429 = vmatpush.msra.mxu0 %v275_v14  ;;  %1457 = vmatpush.msra.mxu1 %v309_v15  ;;  %v489_v14 = vld [vmem:[%s4878_s1 + $0xbe8] sm:$0xff]  ;;  %v2035_v15 = vld [vmem:[%s4879_s0 + $0x30] sm:$0xff]  ;;  %v423_v34 = vld [vmem:[%s4878_s1 + $0x9d8] sm:$0xff] }
 0x108   :  { %1487 = vmatpush.msra.mxu2 %v339_v22  ;;  %1515 = vmatpush.msra.mxu3 %v373_v19  ;;  %v523_v22 = vld [vmem:[%s4878_s1 + $0xcf8] sm:$0xff]  ;;  %v2036_v19 = vld [vmem:[%s4879_s0 + $0x40] sm:$0xff] }
 0x109   :  { %1355 = vmatmul.f32.gmra.mxu1 %v2031_v29  ;;  %1413 = vmatmul.f32.gmra.mxu3 %v2032_v32  ;;  %v3830_v41 = vpop.f32.mrf.mxu2  ;;  %v421_v29 = vld [vmem:[%s4878_s1 + $0x9c8] sm:$0xff]  ;;  %v519_v32 = vld [vmem:[%s4878_s1 + $0xcd8] sm:$0xff] }
 0x10a   :  { %1430 = vmatpush.msra.mxu0 %v273_v24  ;;  %1458 = vmatpush.msra.mxu1 %v307_v25  ;;  %v487_v24 = vld [vmem:[%s4878_s1 + $0xbd8] sm:$0xff] }
 0x10b   :  { %1488 = vmatpush.msra.mxu2 %v337_v38  ;;  %1516 = vmatpush.msra.mxu3 %v371_v30  ;;  %v521_v38 = vld [vmem:[%s4878_s1 + $0xce8] sm:$0xff]  ;;  %v455_v30 = vld [vmem:[%s4878_s1 + $0xad8] sm:$0xff] }
 0x10c   :  { %1431 = vmatpush.msra.mxu0 %v271_v31  ;;  %1459 = vmatpush.msra.mxu1 %v305_v33  ;;  %v3849_v53 = vpop.f32.mrf.mxu3  ;;  %v485_v31 = vld [vmem:[%s4878_s1 + $0xbc8] sm:$0xff] }
 0x10d   :  { %1489 = vmatpush.msra.mxu2 %v335_v47  ;;  %v3847_v52 = vpop.f32.mrf.mxu0  ;;  %1517 = vmatpush.msra.mxu3 %v369_v42  ;;  %v419_v42 = vld [vmem:[%s4878_s1 + $0x9b8] sm:$0xff] }
 0x10e   :  { %1432 = vmatpush.msra.mxu0 %v269_v43  ;;  %1460 = vmatpush.msra.mxu1 %v303_v44  ;;  %v453_v43 = vld [vmem:[%s4878_s1 + $0xac8] sm:$0xff]  ;;  %v483_v44 = vld [vmem:[%s4878_s1 + $0xbb8] sm:$0xff] }
 0x10f   :  { %1490 = vmatpush.msra.mxu2 %v333_v48  ;;  %1518 = vmatpush.msra.mxu3 %v367_v2  ;;  %v2037_v48 = vld [vmem:[%s4879_s0 + $0xc0] sm:$0xff]  ;;  %v517_v2 = vld [vmem:[%s4878_s1 + $0xcc8] sm:$0xff] }
 0x110   :  { %1433 = vmatmul.f32.vlgmr.msra.gmra.mxu0 %v2033_v61  ;;  %v3866_v62 = vpop.f32.mrf.mxu1  ;;  %1461 = vmatpush.msra.mxu1 %v301_v54  ;;  %v451_v61 = vld [vmem:[%s4878_s1 + $0xab8] sm:$0xff] }
 0x111   :  { %1491 = vmatmul.f32.vlgmr.msra.gmra.mxu2 %v2034_v4  ;;  %1533 = vmatpush.msrb.mxu0 %v427_v55  ;;  %v2038_v55 = vld [vmem:[%s4879_s0 + $0xd0] sm:$0xff]  ;;  %v2039_v4 = vld [vmem:[%s4879_s0 + $0xc8] sm:$0xff] }
 0x112   :  { %1519 = vmatpush.msra.mxu3 %v365_v57  ;;  %1591 = vmatpush.msrb.mxu2 %v491_v13  ;;  %v417_v57 = vld [vmem:[%s4878_s1 + $0x9a8] sm:$0xff] }
 0x113   :  { %1462 = vmatmul.f32.vlgmr.msra.gmra.mxu1 %v2035_v15  ;;  %1520 = vmatmul.f32.vlgmr.msra.gmra.mxu3 %v2036_v19  ;;  %v3898_v25 = vpop.f32.mrf.mxu2  ;;  %v481_v13 = vld [vmem:[%s4878_s1 + $0xba8] sm:$0xff] }
 0x114   :  { %1534 = vmatpush.msrb.mxu0 %v425_v5  ;;  %1562 = vmatpush.msrb.mxu1 %v459_v11  ;;  %v515_v5 = vld [vmem:[%s4878_s1 + $0xcb8] sm:$0xff]  ;;  %v449_v15 = vld [vmem:[%s4878_s1 + $0xaa8] sm:$0xff] }
 0x115   :  { %1592 = vmatpush.msrb.mxu2 %v489_v14  ;;  %1620 = vmatpush.msrb.mxu3 %v523_v22  ;;  %v415_v11 = vld [vmem:[%s4878_s1 + $0x998] sm:$0xff]  ;;  %v513_v19 = vld [vmem:[%s4878_s1 + $0xca8] sm:$0xff] }
 0x116   :  { %1535 = vmatpush.msrb.mxu0 %v423_v34  ;;  %1563 = vmatpush.msrb.mxu1 %v457_v21  ;;  %v3915_v33 = vpop.f32.mrf.mxu3  ;;  %v2040_v14 = vld [vmem:[%s4879_s0 + $0xd8] sm:$0xff]  ;;  %v413_v21 = vld [vmem:[%s4878_s1 + $0x988] sm:$0xff] }
 0x117   :  { %1593 = vmatpush.msrb.mxu2 %v487_v24  ;;  %v3917_v47 = vpop.f32.mrf.mxu0  ;;  %1621 = vmatpush.msrb.mxu3 %v521_v38  ;;  %v479_v22 = vld [vmem:[%s4878_s1 + $0xb98] sm:$0xff]  ;;  %v477_v38 = vld [vmem:[%s4878_s1 + $0xb88] sm:$0xff] }
 0x118   :  { %1536 = vmatpush.msrb.mxu0 %v421_v29  ;;  %1564 = vmatpush.msrb.mxu1 %v455_v30  ;;  %v447_v24 = vld [vmem:[%s4878_s1 + $0xa98] sm:$0xff] }
 0x119   :  { %1594 = vmatpush.msrb.mxu2 %v485_v31  ;;  %1622 = vmatpush.msrb.mxu3 %v519_v32  ;;  %v3934_v54 = vpop.f32.mrf.mxu1  ;;  %v511_v31 = vld [vmem:[%s4878_s1 + $0xc98] sm:$0xff] }
 0x11a   :  { %1436 = vmatmul.f32.gmra.mxu0 %v2037_v48  ;;  %1494 = vmatmul.f32.gmra.mxu2 %v2038_v55  ;;  %v411_v32 = vld [vmem:[%s4878_s1 + $0x978] sm:$0xff]  ;;  %v2042_v55 = vld [vmem:[%s4879_s0 + $0x168] sm:$0xff] }
 0x11b   :  { %1537 = vmatpush.msrb.mxu0 %v419_v42  ;;  %1565 = vmatpush.msrb.mxu1 %v453_v43  ;;  %v445_v42 = vld [vmem:[%s4878_s1 + $0xa88] sm:$0xff]  ;;  %v475_v43 = vld [vmem:[%s4878_s1 + $0xb78] sm:$0xff] }
 0x11c   :  { %1595 = vmatpush.msrb.mxu2 %v483_v44  ;;  %1623 = vmatpush.msrb.mxu3 %v517_v2  ;;  %v2041_v48 = vld [vmem:[%s4879_s0 + $0x158] sm:$0xff]  ;;  %v509_v2 = vld [vmem:[%s4878_s1 + $0xc88] sm:$0xff] }
 0x11d   :  { %1465 = vmatmul.f32.gmra.mxu1 %v2039_v4  ;;  %1523 = vmatmul.f32.gmra.mxu3 %v2040_v14  ;;  %v2043_v4 = vld [vmem:[%s4879_s0 + $0x160] sm:$0xff] }
 0x11e   :  { %1538 = vmatpush.msrb.mxu0 %v417_v57  ;;  %v3966_v34 = vpop.f32.mrf.mxu2  ;;  %1566 = vmatpush.msrb.mxu1 %v451_v61  ;;  %v409_v57 = vld [vmem:[%s4878_s1 + $0x968] sm:$0xff]  ;;  %v443_v61 = vld [vmem:[%s4878_s1 + $0xa78] sm:$0xff] }
 0x11f   :  { %1596 = vmatpush.msrb.mxu2 %v481_v13  ;;  %1624 = vmatpush.msrb.mxu3 %v515_v5  ;;  %v473_v13 = vld [vmem:[%s4878_s1 + $0xb68] sm:$0xff]  ;;  %v507_v5 = vld [vmem:[%s4878_s1 + $0xc78] sm:$0xff] }
 0x120   :  { %1539 = vmatpush.msrb.mxu0 %v415_v11  ;;  %v3980_v29 = vpop.f32.mrf.mxu0  ;;  %v3982_v30 = vpop.f32.mrf.mxu3  ;;  %1567 = vmatpush.msrb.mxu1 %v449_v15  ;;  %v407_v11 = vld [vmem:[%s4878_s1 + $0x958] sm:$0xff]  ;;  %v2044_v15 = vld [vmem:[%s4879_s0 + $0x170] sm:$0xff] }
 0x121   :  { %1597 = vmatpush.msrb.mxu2 %v479_v22  ;;  %1625 = vmatpush.msrb.mxu3 %v513_v19  ;;  %v441_v22 = vld [vmem:[%s4878_s1 + $0xa68] sm:$0xff]  ;;  %v471_v19 = vld [vmem:[%s4878_s1 + $0xb58] sm:$0xff] }
 0x122   :  { %1540 = vmatpush.msrb.mxu0 %v413_v21  ;;  %1568 = vmatpush.msrb.mxu1 %v447_v24  ;;  %v3996_v44 = vpop.f32.mrf.mxu1  ;;  %v505_v21 = vld [vmem:[%s4878_s1 + $0xc68] sm:$0xff] }
 0x123   :  { %1598 = vmatpush.msrb.mxu2 %v477_v38  ;;  %1626 = vmatpush.msrb.mxu3 %v511_v31  ;;  %v405_v24 = vld [vmem:[%s4878_s1 + $0x948] sm:$0xff] }
 0x124   :  { %1439 = vmatmul.f32.gmra.mxu0 %v2041_v48  ;;  %1497 = vmatmul.f32.gmra.mxu2 %v2042_v55  ;;  %v403_v48 = vld [vmem:[%s4878_s1 + $0x938] sm:$0xff]  ;;  %v437_v55 = vld [vmem:[%s4878_s1 + $0xa48] sm:$0xff] }
 0x125   :  { %1541 = vmatpush.msrb.mxu0 %v411_v32  ;;  %1569 = vmatpush.msrb.mxu1 %v445_v42  ;;  %v439_v32 = vld [vmem:[%s4878_s1 + $0xa58] sm:$0xff]  ;;  %v469_v42 = vld [vmem:[%s4878_s1 + $0xb48] sm:$0xff] }
 0x126   :  { %1599 = vmatpush.msrb.mxu2 %v475_v43  ;;  %1627 = vmatpush.msrb.mxu3 %v509_v2  ;;  %v4025_v14 = vpop.f32.mrf.mxu2  ;;  %v503_v43 = vld [vmem:[%s4878_s1 + $0xc58] sm:$0xff] }
 0x127   :  { %1468 = vmatmul.f32.gmra.mxu1 %v2043_v4  ;;  %1526 = vmatmul.f32.gmra.mxu3 %v2044_v15  ;;  %v2046_v4 = vld [vmem:[%s4879_s0 + $0x200] sm:$0xff]  ;;  %v465_v15 = vld [vmem:[%s4878_s1 + $0xb28] sm:$0xff] }
 0x128   :  { %1542 = vmatpush.msrb.mxu0 %v409_v57  ;;  %1570 = vmatpush.msrb.mxu1 %v443_v61  ;;  %v467_v57 = vld [vmem:[%s4878_s1 + $0xb38] sm:$0xff]  ;;  %v2045_v61 = vld [vmem:[%s4879_s0 + $0x1f0] sm:$0xff] }
 0x129   :  { %1600 = vmatpush.msrb.mxu2 %v473_v13  ;;  %v4042_v38 = vpop.f32.mrf.mxu0  ;;  %v4044_v31 = vpop.f32.mrf.mxu3  ;;  %1628 = vmatpush.msrb.mxu3 %v507_v5  ;;  %v501_v13 = vld [vmem:[%s4878_s1 + $0xc48] sm:$0xff] }
 0x12a   :  { %1543 = vmatpush.msrb.mxu0 %v407_v11  ;;  %1571 = vmatpush.msrb.mxu1 %v441_v22  ;;  %v401_v5 = vld [vmem:[%s4878_s1 + $0x928] sm:$0xff]  ;;  %v435_v11 = vld [vmem:[%s4878_s1 + $0xa38] sm:$0xff] }
 0x12b   :  { %1601 = vmatpush.msrb.mxu2 %v471_v19  ;;  %1629 = vmatpush.msrb.mxu3 %v505_v21  ;;  %v2047_v22 = vld [vmem:[%s4879_s0 + $0x1f8] sm:$0xff] }
 0x12c   :  { %1544 = vmatpush.msrb.mxu0 %v405_v24  ;;  %v4058_v2 = vpop.f32.mrf.mxu1  ;;  %1572 = vmatpush.msrb.mxu1 %v439_v32  ;;  %v499_v19 = vld [vmem:[%s4878_s1 + $0xc38] sm:$0xff]  ;;  %v2048_v32 = vld [vmem:[%s4879_s0 + $0x208] sm:$0xff] }
 0x12d   :  { %1602 = vmatpush.msrb.mxu2 %v469_v42  ;;  %1630 = vmatpush.msrb.mxu3 %v503_v43  ;;  %v399_v21 = vld [vmem:[%s4878_s1 + $0x918] sm:$0xff]  ;;  %v433_v42 = vld [vmem:[%s4878_s1 + $0xa28] sm:$0xff] }
 0x12e   :  { %1442 = vmatmul.f32.gmra.mxu0 %v2045_v61  ;;  %1500 = vmatmul.f32.gmra.mxu2 %v2046_v4  ;;  %v463_v43 = vld [vmem:[%s4878_s1 + $0xb18] sm:$0xff]  ;;  %v461_v4 = vld [vmem:[%s4878_s1 + $0xb08] sm:$0xff] }
 0x12f   :  { %1545 = vmatpush.msrb.mxu0 %v403_v48  ;;  %1573 = vmatpush.msrb.mxu1 %v437_v55  ;;  %v4093_v24 = vpop.f32.mrf.mxu2  ;;  %v497_v48 = vld [vmem:[%s4878_s1 + $0xc28] sm:$0xff] }
 0x130   :  { %1603 = vmatpush.msrb.mxu2 %v467_v57  ;;  %1631 = vmatpush.msrb.mxu3 %v501_v13  ;;  %v397_v55 = vld [vmem:[%s4878_s1 + $0x908] sm:$0xff]  ;;  %v431_v13 = vld [vmem:[%s4878_s1 + $0xa18] sm:$0xff] }
 0x131   :  { %1471 = vmatmul.f32.gmra.mxu1 %v2047_v22  ;;  %1529 = vmatmul.f32.gmra.mxu3 %v2048_v32  ;;  %v555_v22 = vld [vmem:[%s4878_s1 + $0xdf8] sm:$0xff] }
 0x132   :  { %1546 = vmatpush.msrb.mxu0 %v401_v5  ;;  %1574 = vmatpush.msrb.mxu1 %v435_v11  ;;  %v4112_v61 = vpop.f32.mrf.mxu3  ;;  %v495_v5 = vld [vmem:[%s4878_s1 + $0xc18] sm:$0xff]  ;;  %v429_v11 = vld [vmem:[%s4878_s1 + $0xa08] sm:$0xff] }
 0x133   :  { %1604 = vmatpush.msrb.mxu2 %v465_v15  ;;  %v4110_v57 = vpop.f32.mrf.mxu0  ;;  %1632 = vmatpush.msrb.mxu3 %v499_v19  ;;  %v493_v19 = vld [vmem:[%s4878_s1 + $0xc08] sm:$0xff]  ;;  %v619_v32 = vld [vmem:[%s4878_s1 + $0xff8] sm:$0xff] }
 0x134   :  { %1547 = vmatpush.msrb.mxu0 %v399_v21  ;;  %1575 = vmatpush.msrb.mxu1 %v433_v42  ;;  %v2049_v21 = vld [vmem:[%s4879_s0 + $0x48] sm:$0xff]  ;;  %v2050_v42 = vld [vmem:[%s4879_s0 + $0x58] sm:$0xff] }
 0x135   :  { %1605 = vmatpush.msrb.mxu2 %v463_v43  ;;  %1633 = vmatpush.msrb.mxu3 %v497_v48  ;;  %v553_v43 = vld [vmem:[%s4878_s1 + $0xde8] sm:$0xff]  ;;  %v587_v48 = vld [vmem:[%s4878_s1 + $0xef8] sm:$0xff] }
 0x136   :  { %1548 = vmatpush.msrb.mxu0 %v397_v55  ;;  %v4126_v15 = vpop.f32.mrf.mxu1  ;;  %1576 = vmatpush.msrb.mxu1 %v431_v13  ;;  %v617_v55 = vld [vmem:[%s4878_s1 + $0xfe8] sm:$0xff]  ;;  %v2051_v13 = vld [vmem:[%s4879_s0 + $0x50] sm:$0xff] }
 0x137   :  { %1606 = vmatpush.msrb.mxu2 %v461_v4  ;;  %1634 = vmatpush.msrb.mxu3 %v495_v5  ;;  %v651_v4 = vld [vmem:[%s4878_s1 + $0x10f8] sm:$0xff] }
 0x138   :  { %1549 = vmatmul.f32.vlgmr.msrb.gmra.mxu0 %v2049_v21  ;;  %1577 = vmatpush.msrb.mxu1 %v429_v11  ;;  %v551_v5 = vld [vmem:[%s4878_s1 + $0xdd8] sm:$0xff] }
 0x139   :  { %1607 = vmatmul.f32.vlgmr.msrb.gmra.mxu2 %v2050_v42  ;;  %1649 = vmatpush.msra.mxu0 %v555_v22  ;;  %v4161_v11 = vpop.f32.mrf.mxu2  ;;  %v2052_v22 = vld [vmem:[%s4879_s0 + $0x60] sm:$0xff]  ;;  %v615_v21 = vld [vmem:[%s4878_s1 + $0xfd8] sm:$0xff]  ;;  %v549_v42 = vld [vmem:[%s4878_s1 + $0xdc8] sm:$0xff] }
 0x13a   :  { %1635 = vmatpush.msrb.mxu3 %v493_v19  ;;  %1707 = vmatpush.msra.mxu2 %v619_v32  ;;  %v585_v19 = vld [vmem:[%s4878_s1 + $0xee8] sm:$0xff] }
 0x13b   :  { %1578 = vmatmul.f32.vlgmr.msrb.gmra.mxu1 %v2051_v13  ;;  %1636 = vmatmul.f32.vlgmr.msrb.gmra.mxu3 %v2052_v22  ;;  %v649_v32 = vld [vmem:[%s4878_s1 + $0x10e8] sm:$0xff]  ;;  %v583_v22 = vld [vmem:[%s4878_s1 + $0xed8] sm:$0xff] }
 0x13c   :  { %1650 = vmatpush.msra.mxu0 %v553_v43  ;;  %1678 = vmatpush.msra.mxu1 %v587_v48  ;;  %v4178_v13 = vpop.f32.mrf.mxu3  ;;  %v613_v48 = vld [vmem:[%s4878_s1 + $0xfc8] sm:$0xff] }
 0x13d   :  { %1708 = vmatpush.msra.mxu2 %v617_v55  ;;  %v4180_v43 = vpop.f32.mrf.mxu0  ;;  %1736 = vmatpush.msra.mxu3 %v651_v4  ;;  %v647_v55 = vld [vmem:[%s4878_s1 + $0x10d8] sm:$0xff] }
 0x13e   :  { %4888 = vst [vmem:[#allocation2_spill] sm:$0xff] %v4180_v43  ;;  %1651 = vmatpush.msra.mxu0 %v551_v5  ;;  %1679 = vmatpush.msra.mxu1 %v585_v19  ;;  %v547_v4 = vld [vmem:[%s4878_s1 + $0xdb8] sm:$0xff]  ;;  %v581_v43 = vld [vmem:[%s4878_s1 + $0xec8] sm:$0xff] }
 0x13f   :  { %1709 = vmatpush.msra.mxu2 %v615_v21  ;;  %1737 = vmatpush.msra.mxu3 %v649_v32  ;;  %v611_v19 = vld [vmem:[%s4878_s1 + $0xfb8] sm:$0xff]  ;;  %v777_v21 = vadd.f32 %v3330_v20, %v3298_v7  ;;  %v2053_v32 = vld [vmem:[%s4879_s0 + $0xe0] sm:$0xff]  ;;  %v545_v7 = vld [vmem:[%s4878_s1 + $0xda8] sm:$0xff]  ;;  %v774_v20 = vadd.f32 %v3264_v58, %v3230_v46 }
 0x140   :  { %1652 = vmatpush.msra.mxu0 %v549_v42  ;;  %v4194_v5 = vpop.f32.mrf.mxu1  ;;  %1680 = vmatpush.msra.mxu1 %v583_v22  ;;  %v645_v42 = vld [vmem:[%s4878_s1 + $0x10c8] sm:$0xff]  ;;  %v2054_v22 = vld [vmem:[%s4879_s0 + $0xf0] sm:$0xff]  ;;  %v643_v58 = vld [vmem:[%s4878_s1 + $0x10b8] sm:$0xff] }
 0x141   :  { %1710 = vmatpush.msra.mxu2 %v613_v48  ;;  %1738 = vmatpush.msra.mxu3 %v647_v55  ;;  %v806_v48 = vadd.f32 %v3347_v28, %v777_v21  ;;  %v579_v55 = vld [vmem:[%s4878_s1 + $0xeb8] sm:$0xff]  ;;  %v2055_v46 = vld [vmem:[%s4879_s0 + $0xe8] sm:$0xff] }
 0x142   :  { %1552 = vmatmul.f32.gmra.mxu0 %v2053_v32  ;;  %1610 = vmatmul.f32.gmra.mxu2 %v2054_v22  ;;  %v609_v32 = vld [vmem:[%s4878_s1 + $0xfa8] sm:$0xff]  ;;  %v768_v22 = vadd.f32 %v3128_v10, %v3102_v1  ;;  %v543_v28 = vld [vmem:[%s4878_s1 + $0xd98] sm:$0xff] }
 0x143   :  { %1653 = vmatpush.msra.mxu0 %v547_v4  ;;  %1681 = vmatpush.msra.mxu1 %v581_v43  ;;  %v803_v43 = vadd.f32 %v3278_v63, %v774_v20  ;;  %v2056_v1 = vld [vmem:[%s4879_s0 + $0xf8] sm:$0xff]  ;;  %v577_v10 = vld [vmem:[%s4878_s1 + $0xea8] sm:$0xff] }
 0x144   :  { %1711 = vmatpush.msra.mxu2 %v611_v19  ;;  %v4225_v4 = vpop.f32.mrf.mxu2  ;;  %1739 = vmatpush.msra.mxu3 %v645_v42  ;;  %v607_v19 = vld [vmem:[%s4878_s1 + $0xf98] sm:$0xff]  ;;  %v797_v21 = vadd.f32 %v3148_v17, %v768_v22  ;;  %v641_v63 = vld [vmem:[%s4878_s1 + $0x10a8] sm:$0xff] }
 0x145   :  { %1581 = vmatmul.f32.gmra.mxu1 %v2055_v46  ;;  %1639 = vmatmul.f32.gmra.mxu3 %v2056_v1  ;;  %v541_v42 = vld [vmem:[%s4878_s1 + $0xd88] sm:$0xff]  ;;  %v835_v46 = vadd.f32 %v3367_v36, %v806_v48  ;;  %v575_v17 = vld [vmem:[%s4878_s1 + $0xe98] sm:$0xff]  ;;  %v832_v22 = vadd.f32 %v3300_v8, %v803_v43 }
 0x146   :  { %1654 = vmatpush.msra.mxu0 %v545_v7  ;;  %1682 = vmatpush.msra.mxu1 %v579_v55  ;;  %v4257_v20 = vpop.f32.mrf.mxu3  ;;  %v605_v55 = vld [vmem:[%s4878_s1 + $0xf88] sm:$0xff]  ;;  %v539_v48 = vld [vmem:[%s4878_s1 + $0xd78] sm:$0xff] }
 0x147   :  { %1712 = vmatpush.msra.mxu2 %v609_v32  ;;  %v4255_v7 = vpop.f32.mrf.mxu0  ;;  %1740 = vmatpush.msra.mxu3 %v643_v58  ;;  %v639_v32 = vld [vmem:[%s4878_s1 + $0x1098] sm:$0xff]  ;;  %v864_v36 = vadd.f32 %v3571_v6, %v835_v46  ;;  %v573_v1 = vld [vmem:[%s4878_s1 + $0xe88] sm:$0xff]  ;;  %v861_v6 = vadd.f32 %v3505_v35, %v832_v22  ;;  %v2059_v46 = vld [vmem:[%s4879_s0 + $0x180] sm:$0xff] }
 0x148   :  { %1655 = vmatpush.msra.mxu0 %v543_v28  ;;  %1683 = vmatpush.msra.mxu1 %v577_v10  ;;  %v826_v28 = vadd.f32 %v3164_v23, %v797_v21  ;;  %v603_v8 = vld [vmem:[%s4878_s1 + $0xf78] sm:$0xff]  ;;  %v637_v23 = vld [vmem:[%s4878_s1 + $0x1088] sm:$0xff]  ;;  %v2060_v22 = vld [vmem:[%s4879_s0 + $0x190] sm:$0xff] }
 0x149   :  { %1713 = vmatpush.msra.mxu2 %v607_v19  ;;  %1741 = vmatpush.msra.mxu3 %v641_v63  ;;  %v2057_v43 = vld [vmem:[%s4879_s0 + $0x178] sm:$0xff]  ;;  %v2058_v19 = vld [vmem:[%s4879_s0 + $0x188] sm:$0xff]  ;;  %v893_v21 = vadd.f32 %v3593_v18, %v864_v36 }
 0x14a   :  { %1656 = vmatpush.msra.mxu0 %v541_v42  ;;  %v4274_v58 = vpop.f32.mrf.mxu1  ;;  %1684 = vmatpush.msra.mxu1 %v575_v17  ;;  %v855_v10 = vadd.f32 %v3369_v37, %v826_v28  ;;  %v537_v35 = vld [vmem:[%s4878_s1 + $0xd68] sm:$0xff]  ;;  %v571_v63 = vld [vmem:[%s4878_s1 + $0xe78] sm:$0xff] }
 0x14b   :  { %1714 = vmatpush.msra.mxu2 %v605_v55  ;;  %1742 = vmatpush.msra.mxu3 %v639_v32  ;;  %v601_v37 = vld [vmem:[%s4878_s1 + $0xf68] sm:$0xff]  ;;  %v635_v18 = vld [vmem:[%s4878_s1 + $0x1078] sm:$0xff]  ;;  %v890_v55 = vadd.f32 %v3527_v49, %v861_v6  ;;  %v922_v32 = vadd.f32 %v3626_v40, %v893_v21 }
 0x14c   :  { %1555 = vmatmul.f32.gmra.mxu0 %v2057_v43  ;;  %1613 = vmatmul.f32.gmra.mxu2 %v2058_v19  ;;  %v535_v17 = vld [vmem:[%s4878_s1 + $0xd58] sm:$0xff]  ;;  %v569_v36 = vld [vmem:[%s4878_s1 + $0xe68] sm:$0xff]  ;;  %v884_v28 = vadd.f32 %v3389_v45, %v855_v10 }
 0x14d   :  { %1657 = vmatpush.msra.mxu0 %v539_v48  ;;  %1685 = vmatpush.msra.mxu1 %v573_v1  ;;  %v4304_v42 = vpop.f32.mrf.mxu2  ;;  %v599_v48 = vld [vmem:[%s4878_s1 + $0xf58] sm:$0xff]  ;;  %v633_v49 = vld [vmem:[%s4878_s1 + $0x1068] sm:$0xff]  ;;  %v919_v6 = vadd.f32 %v3554_v60, %v890_v55  ;;  %v951_v60 = vadd.f32 %v3644_v50, %v922_v32 }
 0x14e   :  { %1715 = vmatpush.msra.mxu2 %v603_v8  ;;  %1743 = vmatpush.msra.mxu3 %v637_v23  ;;  %v533_v40 = vld [vmem:[%s4878_s1 + $0xd48] sm:$0xff]  ;;  %v567_v45 = vld [vmem:[%s4878_s1 + $0xe58] sm:$0xff]  ;;  %v913_v23 = vadd.f32 %v3416_v56, %v884_v28 }
 0x14f   :  { %1584 = vmatmul.f32.gmra.mxu1 %v2059_v46  ;;  %1642 = vmatmul.f32.gmra.mxu3 %v2060_v22  ;;  %v597_v43 = vld [vmem:[%s4878_s1 + $0xf48] sm:$0xff]  ;;  %v631_v10 = vld [vmem:[%s4878_s1 + $0x1058] sm:$0xff]  ;;  %v948_v50 = vadd.f32 %v3573_v9, %v919_v6 }
 0x150   :  { %1658 = vmatpush.msra.mxu0 %v537_v35  ;;  %1686 = vmatpush.msra.mxu1 %v571_v63  ;;  %v4335_v8 = vpop.f32.mrf.mxu3  ;;  %v531_v19 = vld [vmem:[%s4878_s1 + $0xd38] sm:$0xff]  ;;  %v565_v56 = vld [vmem:[%s4878_s1 + $0xe48] sm:$0xff]  ;;  %v980_v63 = vadd.f32 %v3847_v52, %v951_v60 }
 0x151   :  { %1716 = vmatpush.msra.mxu2 %v601_v37  ;;  %v4333_v1 = vpop.f32.mrf.mxu0  ;;  %1744 = vmatpush.msra.mxu3 %v635_v18  ;;  %v595_v21 = vld [vmem:[%s4878_s1 + $0xf38] sm:$0xff]  ;;  %v2061_v37 = vld [vmem:[%s4879_s0 + $0x210] sm:$0xff]  ;;  %v629_v46 = vld [vmem:[%s4878_s1 + $0x1048] sm:$0xff]  ;;  %v942_v18 = vadd.f32 %v3438_v3, %v913_v23  ;;  %v977_v52 = vadd.f32 %v3779_v12, %v948_v50 }
 0x152   :  { %1659 = vmatpush.msra.mxu0 %v535_v17  ;;  %1687 = vmatpush.msra.mxu1 %v569_v36  ;;  %v2062_v17 = vld [vmem:[%s4879_s0 + $0x220] sm:$0xff]  ;;  %v529_v9 = vld [vmem:[%s4878_s1 + $0xd28] sm:$0xff]  ;;  %v563_v55 = vld [vmem:[%s4878_s1 + $0xe38] sm:$0xff]  ;;  %v1009_v28 = vadd.f32 %v3866_v62, %v980_v63 }
 0x153   :  { %1717 = vmatpush.msra.mxu2 %v599_v48  ;;  %1745 = vmatpush.msra.mxu3 %v633_v49  ;;  %v593_v3 = vld [vmem:[%s4878_s1 + $0xf28] sm:$0xff]  ;;  %v971_v22 = vadd.f32 %v3646_v51, %v942_v18  ;;  %v2063_v36 = vld [vmem:[%s4879_s0 + $0x218] sm:$0xff]  ;;  %v1006_v23 = vadd.f32 %v3798_v39, %v977_v52 }
 0x154   :  { %1660 = vmatpush.msra.mxu0 %v533_v40  ;;  %v4352_v35 = vpop.f32.mrf.mxu1  ;;  %1688 = vmatpush.msra.mxu1 %v567_v45  ;;  %v627_v12 = vld [vmem:[%s4878_s1 + $0x1038] sm:$0xff]  ;;  %v2064_v51 = vld [vmem:[%s4879_s0 + $0x228] sm:$0xff] }
 0x155   :  { %1718 = vmatpush.msra.mxu2 %v597_v43  ;;  %1746 = vmatpush.msra.mxu3 %v631_v10  ;;  %v527_v48 = vld [vmem:[%s4878_s1 + $0xd18] sm:$0xff]  ;;  %v561_v49 = vld [vmem:[%s4878_s1 + $0xe28] sm:$0xff]  ;;  %v1038_v10 = vadd.f32 %v3898_v25, %v1009_v28  ;;  %v1035_v25 = vadd.f32 %v3830_v41, %v1006_v23 }
 0x156   :  { %1558 = vmatmul.f32.gmra.mxu0 %v2061_v37  ;;  %1616 = vmatmul.f32.gmra.mxu2 %v2062_v17  ;;  %v591_v40 = vld [vmem:[%s4878_s1 + $0xf18] sm:$0xff]  ;;  %v625_v62 = vld [vmem:[%s4878_s1 + $0x1028] sm:$0xff] }
 0x157   :  { %1661 = vmatpush.msra.mxu0 %v531_v19  ;;  %1689 = vmatpush.msra.mxu1 %v565_v56  ;;  %v4382_v32 = vpop.f32.mrf.mxu2  ;;  %v525_v6 = vld [vmem:[%s4878_s1 + $0xd08] sm:$0xff]  ;;  %v559_v60 = vld [vmem:[%s4878_s1 + $0xe18] sm:$0xff]  ;;  %v1000_v56 = vadd.f32 %v3664_v59, %v971_v22  ;;  %v1067_v37 = vadd.f32 %v3915_v33, %v1038_v10  ;;  %v2067_v22 = vld [vmem:[%s4879_s0 + $0x70] sm:$0xff] }
 0x158   :  { %1719 = vmatpush.msra.mxu2 %v595_v21  ;;  %1747 = vmatpush.msra.mxu3 %v629_v46  ;;  %v589_v19 = vld [vmem:[%s4878_s1 + $0xf08] sm:$0xff]  ;;  %v623_v39 = vld [vmem:[%s4878_s1 + $0x1018] sm:$0xff] }
 0x159   :  { %1587 = vmatmul.f32.gmra.mxu1 %v2063_v36  ;;  %1645 = vmatmul.f32.gmra.mxu3 %v2064_v51  ;;  %v557_v21 = vld [vmem:[%s4878_s1 + $0xe08] sm:$0xff]  ;;  %v1029_v63 = vadd.f32 %v3697_v16, %v1000_v56  ;;  %v683_v59 = vld [vmem:[%s4878_s1 + $0x11f8] sm:$0xff]  ;;  %v1061_v16 = vadd.f32 %v3781_v26, %v3768_v0  ;;  %v1096_v52 = vadd.f32 %v4110_v57, %v1067_v37  ;;  %v1853_v36 = vld [vmem:[%s4880_s3 + $0x70] sm:$0xff] }
 0x15a   :  { %1662 = vmatpush.msra.mxu0 %v529_v9  ;;  %1690 = vmatpush.msra.mxu1 %v563_v55  ;;  %v4412_v43 = vpop.f32.mrf.mxu3  ;;  %v621_v41 = vld [vmem:[%s4878_s1 + $0x1008] sm:$0xff]  ;;  %v2066_v18 = vld [vmem:[%s4879_s0 + $0x78] sm:$0xff]  ;;  %v1064_v9 = vadd.f32 %v3849_v53, %v1035_v25  ;;  %v2068_v53 = vld [vmem:[%s4879_s0 + $0x80] sm:$0xff] }
 0x15b   :  { %1720 = vmatpush.msra.mxu2 %v593_v3  ;;  %v4410_v45 = vpop.f32.mrf.mxu0  ;;  %1748 = vmatpush.msra.mxu3 %v627_v12  ;;  %v2065_v46 = vld [vmem:[%s4879_s0 + $0x68] sm:$0xff]  ;;  %v707_v33 = vld [vmem:[%s4878_s1 + $0x12b8] sm:$0xff]  ;;  %v1058_v55 = vadd.f32 %v3715_v27, %v1029_v63  ;;  %v1090_v3 = vadd.f32 %v3980_v29, %v1061_v16  ;;  %v1851_v63 = vld [vmem:[%s4880_s3 + $0x60] sm:$0xff] }
 0x15c   :  { %1663 = vmatpush.msra.mxu0 %v527_v48  ;;  %1691 = vmatpush.msra.mxu1 %v561_v49  ;;  %v681_v17 = vld [vmem:[%s4878_s1 + $0x11e8] sm:$0xff]  ;;  %v1854_v0 = vld [vmem:[%s4880_s3 + $0x78] sm:$0xff]  ;;  %v1093_v29 = vadd.f32 %v4042_v38, %v1064_v9  ;;  %v1125_v49 = vadd.f32 %v4126_v15, %v1096_v52  ;;  %v1849_v52 = vld [vmem:[%s4880_s3 + $0x50] sm:$0xff] }
 0x15d   :  { %1721 = vmatpush.msra.mxu2 %v591_v40  ;;  %1749 = vmatpush.msra.mxu3 %v625_v62  ;;  %v679_v57 = vld [vmem:[%s4878_s1 + $0x11d8] sm:$0xff]  ;;  %v705_v27 = vld [vmem:[%s4878_s1 + $0x12a8] sm:$0xff]  ;;  %v1087_v12 = vadd.f32 %v3917_v47, %v1058_v55  ;;  %v1119_v47 = vadd.f32 %v3996_v44, %v1090_v3 }
 0x15e   :  { %1664 = vmatpush.msra.mxu0 %v525_v6  ;;  %v4430_v50 = vpop.f32.mrf.mxu1  ;;  %1692 = vmatpush.msra.mxu1 %v559_v60  ;;  %v677_v48 = vld [vmem:[%s4878_s1 + $0x11c8] sm:$0xff]  ;;  %v703_v28 = vld [vmem:[%s4878_s1 + $0x1298] sm:$0xff]  ;;  %v1122_v23 = vadd.f32 %v4058_v2, %v1093_v29  ;;  %v1154_v10 = vadd.f32 %v4161_v11, %v1125_v49  ;;  %v2069_v60 = vld [vmem:[%s4879_s0 + $0x100] sm:$0xff] }
 0x15f   :  { %1722 = vmatpush.msra.mxu2 %v589_v19  ;;  %1750 = vmatpush.msra.mxu3 %v623_v39  ;;  %v675_v62 = vld [vmem:[%s4878_s1 + $0x11b8] sm:$0xff]  ;;  %v701_v6 = vld [vmem:[%s4878_s1 + $0x1288] sm:$0xff]  ;;  %v1148_v44 = vadd.f32 %v4025_v14, %v1119_v47  ;;  %v2070_v19 = vld [vmem:[%s4879_s0 + $0x110] sm:$0xff] }
 0x160   :  { %1665 = vmatmul.f32.vlgmr.msra.gmra.mxu0 %v2065_v46  ;;  %1693 = vmatpush.msra.mxu1 %v557_v21  ;;  %v673_v2 = vld [vmem:[%s4878_s1 + $0x11a8] sm:$0xff]  ;;  %v1151_v14 = vadd.f32 %v4093_v24, %v1122_v23  ;;  %v699_v56 = vld [vmem:[%s4878_s1 + $0x1278] sm:$0xff] }
 0x161   :  { %1723 = vmatmul.f32.vlgmr.msra.gmra.mxu2 %v2066_v18  ;;  %1765 = vmatpush.msrb.mxu0 %v683_v59  ;;  %v4459_v26 = vpop.f32.mrf.mxu2  ;;  %v2071_v25 = vld [vmem:[%s4879_s0 + $0x108] sm:$0xff]  ;;  %v2072_v21 = vld [vmem:[%s4879_s0 + $0x118] sm:$0xff]  ;;  %v1177_v37 = vadd.f32 %v4044_v31, %v1148_v44 }
 0x162   :  { %1751 = vmatpush.msra.mxu3 %v621_v41  ;;  %1694 = vmatmul.f32.vlgmr.msra.gmra.mxu1 %v2067_v22  ;;  %v671_v24 = vld [vmem:[%s4878_s1 + $0x1198] sm:$0xff]  ;;  %v697_v59 = vld [vmem:[%s4878_s1 + $0x1268] sm:$0xff]  ;;  %v4889_v22 = vld [vmem:[#allocation2_spill] sm:$0xff] }
 0x163   :  { %1752 = vmatmul.f32.vlgmr.msra.gmra.mxu3 %v2068_v53  ;;  %1766 = vmatpush.msrb.mxu0 %v681_v17  ;;  %v669_v46 = vld [vmem:[%s4878_s1 + $0x1188] sm:$0xff]  ;;  %v1850_v16 = vld [vmem:[%s4880_s3 + $0x58] sm:$0xff]  ;;  %v1206_v31 = vadd.f32 %v4255_v7, %v1177_v37 }
 0x164   :  { %1798 = vmatpush.msrb.mxu1 %v707_v33  ;;  %1875 = vmatpush.msrb.mxu2 %v1854_v0  ;;  %v4486_v51 = vpop.f32.mrf.mxu3  ;;  %v667_v9 = vld [vmem:[%s4878_s1 + $0x1178] sm:$0xff]  ;;  %v2074_v3 = vld [vmem:[%s4879_s0 + $0x1a8] sm:$0xff] }
 0x165   :  { %v1318_v38 = vpop.f32.mrf.mxu0  ;;  %1767 = vmatpush.msrb.mxu0 %v679_v57  ;;  %v2073_v7 = vld [vmem:[%s4879_s0 + $0x198] sm:$0xff]  ;;  %v1848_v57 = vld [vmem:[%s4880_s3 + $0x48] sm:$0xff] }
 0x166   :  { %1799 = vmatpush.msrb.mxu1 %v705_v27  ;;  %v1319_v40 = vadd.f32 %v1318_v38, %v4257_v20  ;;  %1876 = vmatpush.msrb.mxu2 %v1853_v36  ;;  %v1116_v20 = vadd.f32 %v3934_v54, %v1087_v12  ;;  %v1852_v54 = vld [vmem:[%s4880_s3 + $0x68] sm:$0xff]  ;;  %v2075_v36 = vld [vmem:[%s4879_s0 + $0x1a0] sm:$0xff]  ;;  %v2076_v12 = vld [vmem:[%s4879_s0 + $0x1b0] sm:$0xff]  ;;  %v1235_v38 = vadd.f32 %v4274_v58, %v1206_v31 }
 0x167   :  { %1768 = vmatpush.msrb.mxu0 %v677_v48  ;;  %v663_v48 = vld [vmem:[%s4878_s1 + $0x1158] sm:$0xff] }
 0x168   :  { %1800 = vmatpush.msrb.mxu1 %v703_v28  ;;  %v1347_v15 = vpop.f32.mrf.mxu1  ;;  %1668 = vmatmul.f32.gmra.mxu0 %v2069_v60  ;;  %v1145_v39 = vadd.f32 %v3966_v34, %v1116_v20  ;;  %v1183_v34 = vadd.f32 %v4178_v13, %v1154_v10  ;;  %v1180_v13 = vadd.f32 %v4112_v61, %v1151_v14  ;;  %v693_v28 = vld [vmem:[%s4878_s1 + $0x1248] sm:$0xff] }
 0x169   :  { %1726 = vmatmul.f32.gmra.mxu2 %v2070_v19  ;;  %v1348_v11 = vadd.f32 %v1347_v15, %v1319_v40  ;;  %1769 = vmatpush.msrb.mxu0 %v675_v62  ;;  %v1847_v40 = vld [vmem:[%s4880_s3 + $0x40] sm:$0xff]  ;;  %v661_v62 = vld [vmem:[%s4878_s1 + $0x1148] sm:$0xff]  ;;  %v659_v15 = vld [vmem:[%s4878_s1 + $0x1138] sm:$0xff] }
 0x16a   :  { %1801 = vmatpush.msrb.mxu1 %v701_v6  ;;  %1877 = vmatpush.msrb.mxu2 %v1852_v54  ;;  %v1212_v17 = vadd.f32 %v4410_v45, %v1183_v34  ;;  %v1174_v33 = vadd.f32 %v3982_v30, %v1145_v39  ;;  %v1209_v61 = vadd.f32 %v4333_v1, %v1180_v13  ;;  %v665_v1 = vld [vmem:[%s4878_s1 + $0x1168] sm:$0xff]  ;;  %v691_v6 = vld [vmem:[%s4878_s1 + $0x1238] sm:$0xff] }
 0x16b   :  { %1697 = vmatmul.f32.gmra.mxu1 %v2071_v25  ;;  %1755 = vmatmul.f32.gmra.mxu3 %v2072_v21  ;;  %v657_v60 = vld [vmem:[%s4878_s1 + $0x1128] sm:$0xff]  ;;  %v2079_v21 = vld [vmem:[%s4879_s0 + $0x238] sm:$0xff] }
 0x16c   :  { %1770 = vmatpush.msrb.mxu0 %v673_v2  ;;  %v1376_v41 = vpop.f32.mrf.mxu2  ;;  %1802 = vmatpush.msrb.mxu1 %v699_v56  ;;  %v1203_v53 = vadd.f32 %v4889_v22, %v1174_v33  ;;  %v1241_v27 = vadd.f32 %v4430_v50, %v1212_v17  ;;  %v1238_v49 = vadd.f32 %v4352_v35, %v1209_v61  ;;  %v689_v14 = vld [vmem:[%s4878_s1 + $0x1228] sm:$0xff]  ;;  %v1841_v33 = vld [vmem:[%s4880_s3 + $0x10] sm:$0xff] }
 0x16d   :  { %v1377_v18 = vadd.f32 %v1376_v41, %v1348_v11  ;;  %1878 = vmatpush.msrb.mxu2 %v1851_v63  ;;  %v1264_v35 = vadd.f32 %v4304_v42, %v1235_v38  ;;  %v2078_v11 = vld [vmem:[%s4879_s0 + $0x240] sm:$0xff]  ;;  %v1844_v56 = vld [vmem:[%s4880_s3 + $0x28] sm:$0xff]  ;;  %v2085_v38 = vld [vmem:[%s4879_s0 + $0x1b8] sm:$0xff] }
 0x16e   :  { %1771 = vmatpush.msrb.mxu0 %v671_v24  ;;  %1803 = vmatpush.msrb.mxu1 %v697_v59  ;;  %v1405_v55 = vpop.f32.mrf.mxu3  ;;  %v1270_v47 = vadd.f32 %v4459_v26, %v1241_v27  ;;  %v1232_v58 = vadd.f32 %v4194_v5, %v1203_v53  ;;  %v1267_v23 = vadd.f32 %v4382_v32, %v1238_v49  ;;  %v1846_v26 = vld [vmem:[%s4880_s3 + $0x38] sm:$0xff]  ;;  %v1845_v5 = vld [vmem:[%s4880_s3 + $0x30] sm:$0xff]  ;;  %v2080_v63 = vld [vmem:[%s4879_s0 + $0x248] sm:$0xff] }
 0x16f   :  { %v1321_v0 = vpop.f32.mrf.mxu0  ;;  %1879 = vmatpush.msrb.mxu2 %v1850_v16  ;;  %v4553_v30 = vadd.f32 %v1405_v55, %v1377_v18  ;;  %v2077_v32 = vld [vmem:[%s4879_s0 + $0x230] sm:$0xff]  ;;  %v655_v24 = vld [vmem:[%s4878_s1 + $0x1118] sm:$0xff]  ;;  %v1843_v41 = vld [vmem:[%s4880_s3 + $0x20] sm:$0xff] }
 0x170   :  { %1772 = vmatpush.msrb.mxu0 %v669_v46  ;;  %v1322_v45 = vadd.f32 %v1321_v0, %v4335_v8  ;;  %v695_v8 = vld [vmem:[%s4878_s1 + $0x1258] sm:$0xff]  ;;  %v1261_v44 = vadd.f32 %v4225_v4, %v1232_v58  ;;  %v1824_v42 = vmax.f32 %v1264_v35, %v1270_v47  ;;  %v4618_v4 = vld [vmem:[%s4881_s2] sm:$0x3]  ;;  %v653_v46 = vld [vmem:[%s4878_s1 + $0x1108] sm:$0xff] }
 0x171   :  { %1671 = vmatmul.f32.gmra.mxu0 %v2073_v7  ;;  %1729 = vmatmul.f32.gmra.mxu2 %v2074_v3  ;;  %v687_v59 = vld [vmem:[%s4878_s1 + $0x1218] sm:$0xff]  ;;  %v685_v13 = vld [vmem:[%s4878_s1 + $0x1208] sm:$0xff]  ;;  %v2082_v55 = vld [vmem:[%s4879_s0 + $0x90] sm:$0xff] }
 0x172   :  { %1773 = vmatpush.msrb.mxu0 %v667_v9  ;;  %1880 = vmatpush.msrb.mxu2 %v1849_v52  ;;  %v1350_v29 = vpop.f32.mrf.mxu1  ;;  %v1823_v54 = vmax.f32 %v1261_v44, %v1267_v23  ;;  %v1842_v18 = vld [vmem:[%s4880_s3 + $0x18] sm:$0xff]  ;;  %v2081_v9 = vld [vmem:[%s4879_s0 + $0x88] sm:$0xff]  ;;  %v1839_v3 = vld [vmem:[%s4880_s3] sm:$0xff] }
 0x173   :  { %1700 = vmatmul.f32.gmra.mxu1 %v2075_v36  ;;  %1758 = vmatmul.f32.gmra.mxu3 %v2076_v12  ;;  %v1351_v50 = vadd.f32 %v1350_v29, %v1322_v45  ;;  %v1840_v0 = vld [vmem:[%s4880_s3 + $0x8] sm:$0xff]  ;;  %v2087_v23 = vld [vmem:[%s4879_s0 + $0x250] sm:$0xff] }
 0x174   :  { %1774 = vmatpush.msrb.mxu0 %v665_v1  ;;  %1804 = vmatpush.msrb.mxu1 %v695_v8  ;;  %v1825_v34 = vmax.f32 %v1823_v54, %v1824_v42  ;;  %v2084_v29 = vld [vmem:[%s4879_s0 + $0x128] sm:$0xff] }
 0x175   :  { %1881 = vmatpush.msrb.mxu2 %v1848_v57  ;;  %v1379_v10 = vpop.f32.mrf.mxu2  ;;  %v2083_v57 = vld [vmem:[%s4879_s0 + $0x120] sm:$0xff] }
 0x176   :  { %1775 = vmatpush.msrb.mxu0 %v663_v48  ;;  %1805 = vmatpush.msrb.mxu1 %v693_v28  ;;  %v1380_v20 = vadd.f32 %v1379_v10, %v1351_v50  ;;  %v2088_v10 = vld [vmem:[%s4879_s0 + $0x258] sm:$0xff] }
 0x177   :  { %1882 = vmatpush.msrb.mxu2 %v1847_v40  ;;  %v2086_v40 = vld [vmem:[%s4879_s0 + $0x1c0] sm:$0xff] }
 0x178   :  { %1776 = vmatpush.msrb.mxu0 %v661_v62  ;;  %1806 = vmatpush.msrb.mxu1 %v691_v6  ;;  %v1408_v2 = vpop.f32.mrf.mxu3 }
 0x179   :  { %1883 = vmatpush.msrb.mxu2 %v1846_v26  ;;  %1674 = vmatmul.f32.gmra.mxu0 %v2077_v32  ;;  %v1324_v19 = vpop.f32.mrf.mxu0  ;;  %v4630_v25 = vadd.f32 %v1408_v2, %v1380_v20 }
 0x17a   :  { %1732 = vmatmul.f32.gmra.mxu2 %v2078_v11  ;;  %1777 = vmatpush.msrb.mxu0 %v659_v15  ;;  %v1325_v39 = vadd.f32 %v1324_v19, %v4412_v43  ;;  %v1831_v43 = vperm.slane %v4618_v4, 0 }
 0x17b   :  { %1884 = vmatpush.msrb.mxu2 %v1845_v5  ;;  %1703 = vmatmul.f32.gmra.mxu1 %v2079_v21 }
 0x17c   :  { %1761 = vmatmul.f32.gmra.mxu3 %v2080_v63  ;;  %1778 = vmatpush.msrb.mxu0 %v657_v60  ;;  %v1353_v37 = vpop.f32.mrf.mxu1  ;;  %v1835_v17 = vadd.f32 %v1831_v43, %v1825_v34 }
 0x17d   :  { %1807 = vmatpush.msrb.mxu1 %v689_v14  ;;  %1885 = vmatpush.msrb.mxu2 %v1844_v56  ;;  %v1354_v16 = vadd.f32 %v1353_v37, %v1325_v39 }
 0x17e   :  { %1779 = vmatpush.msrb.mxu0 %v655_v24  ;;  %v1837_v7 = vmax.f32 %v1835_v17, 0.0 }
 0x17f   :  { %1808 = vmatpush.msrb.mxu1 %v687_v59  ;;  %1886 = vmatpush.msrb.mxu2 %v1843_v41  ;;  %v1382_v31 = vpop.f32.mrf.mxu2 }
 0x180   :  { %1780 = vmatpush.msrb.mxu0 %v653_v46  ;;  %v1383_v52 = vadd.f32 %v1382_v31, %v1354_v16 }
 0x181   :  { %1887 = vmatpush.msrb.mxu2 %v1842_v18  ;;  %1781 = vmatmul.f32.vlgmr.msrb.gmra.mxu0 %v2081_v9 }
 0x182   :  { %1809 = vmatpush.msrb.mxu1 %v685_v13  ;;  %v1411_v45 = vpop.f32.mrf.mxu3 }
 0x183   :  { %1888 = vmatpush.msrb.mxu2 %v1841_v33  ;;  %2006 = vmatmul.msk.f32.vlgmr.msrb.gmra.mxu1 %vm708_vm0, %v2082_v55  ;;  %v1327_v61 = vpop.f32.mrf.mxu0  ;;  %v1412_v8 = vadd.f32 %v1411_v45, %v1383_v52 }
 0x184   :  { %v1328_v1 = vadd.f32 %v1327_v61, %v4486_v51 }
 0x185   :  { %1889 = vmatpush.msrb.mxu2 %v1840_v0 }
 0x186   :  { %v1356_v22 = vpop.f32.mrf.mxu1 }
 0x187   :  { %1890 = vmatpush.msrb.mxu2 %v1839_v3  ;;  %v1357_v53 = vadd.f32 %v1356_v22, %v1328_v1  ;;  %v1870_v3 = vld [vmem:[%s4880_s3 + $0xf8] sm:$0xff]  ;;  %v1869_v1 = vld [vmem:[%s4880_s3 + $0xf0] sm:$0xff] }
 0x188   :  { %1891 = vmatmul.f32.vlgmr.msrb.gmra.mxu2 %v1837_v7  ;;  %1895 = vmatpush.msrb.mxu3 %v1870_v3 }
 0x189   :  { %1784 = vmatmul.f32.gmra.mxu0 %v2083_v57  ;;  %v1385_v27 = vpop.f32.mrf.mxu2 }
 0x18a   :  { %v1386_v36 = vadd.f32 %v1385_v27, %v1357_v53  ;;  %1896 = vmatpush.msrb.mxu3 %v1869_v1  ;;  %v1868_v53 = vld [vmem:[%s4880_s3 + $0xe8] sm:$0xff]  ;;  %v1867_v27 = vld [vmem:[%s4880_s3 + $0xe0] sm:$0xff]  ;;  %v1926_v1 = vld [vmem:[%s4883_s5 + $0x50] sm:$0xff] }
 0x18b   :  { %2007 = vmatmul.msk.f32.gmra.mxu1 %vm708_vm0, %v2084_v29 }
 0x18c   :  { %v1414_v51 = vpop.f32.mrf.mxu3  ;;  %1897 = vmatpush.msrb.mxu3 %v1868_v53 }
 0x18d   :  { %v1434_v12 = vpop.f32.mrf.mxu0  ;;  %v1415_v48 = vadd.f32 %v1414_v51, %v1386_v36  ;;  %v1866_v36 = vld [vmem:[%s4880_s3 + $0xd8] sm:$0xff]  ;;  %v1865_v51 = vld [vmem:[%s4880_s3 + $0xd0] sm:$0xff] }
 0x18e   :  { %v1435_v28 = vadd.f32 %v1434_v12, %v4553_v30  ;;  %1898 = vmatpush.msrb.mxu3 %v1867_v27 }
 0x190   :  { %v1463_v50 = vpop.f32.mrf.mxu1  ;;  %1899 = vmatpush.msrb.mxu3 %v1866_v36 }
 0x191   :  { %1787 = vmatmul.f32.gmra.mxu0 %v2085_v38  ;;  %v1464_v49 = vadd.f32 %v1463_v50, %v1435_v28 }
 0x192   :  { %1900 = vmatpush.msrb.mxu3 %v1865_v51 }
 0x193   :  { %2008 = vmatmul.msk.f32.gmra.mxu1 %vm708_vm0, %v2086_v40  ;;  %v1862_v40 = vld [vmem:[%s4880_s3 + $0xb8] sm:$0xff] }
 0x194   :  { %v1492_v47 = vpop.f32.mrf.mxu2 }
 0x195   :  { %v1493_v62 = vadd.f32 %v1492_v47, %v1464_v49  ;;  %v1863_v49 = vld [vmem:[%s4880_s3 + $0xc0] sm:$0xff] }
 0x196   :  { %v1521_v58 = vpop.f32.mrf.mxu3 }
 0x197   :  { %v1437_v6 = vpop.f32.mrf.mxu0  ;;  %v1522_v30 = vadd.f32 %v1521_v58, %v1493_v62  ;;  %v1861_v62 = vld [vmem:[%s4880_s3 + $0xb0] sm:$0xff] }
 0x198   :  { %v1438_v35 = vadd.f32 %v1437_v6, %v4630_v25 }
 0x199   :  { %1790 = vmatmul.f32.gmra.mxu0 %v2087_v23 }
 0x19a   :  { %v1466_v26 = vpop.f32.mrf.mxu1 }
 0x19b   :  { %2009 = vmatmul.msk.f32.gmra.mxu1 %vm708_vm0, %v2088_v10  ;;  %v1467_v15 = vadd.f32 %v1466_v26, %v1438_v35 }
 0x19d   :  { %v1495_v20 = vpop.f32.mrf.mxu2 }
 0x19e   :  { %v1496_v44 = vadd.f32 %v1495_v20, %v1467_v15  ;;  %v1859_v15 = vld [vmem:[%s4880_s3 + $0xa0] sm:$0xff] }
 0x1a0   :  { %v1524_v42 = vpop.f32.mrf.mxu3 }
 0x1a1   :  { %v1440_v5 = vpop.f32.mrf.mxu0  ;;  %v1525_v60 = vadd.f32 %v1524_v42, %v1496_v44 }
 0x1a2   :  { %v1441_v32 = vadd.f32 %v1440_v5, %v1412_v8  ;;  %v1858_v5 = vld [vmem:[%s4880_s3 + $0x98] sm:$0xff] }
 0x1a4   :  { %v1469_v19 = vpop.f32.mrf.mxu1 }
 0x1a5   :  { %v1470_v2 = vadd.f32 %v1469_v19, %v1441_v32 }
 0x1a7   :  { %v1498_v39 = vpop.f32.mrf.mxu2 }
 0x1a8   :  { %v1499_v38 = vadd.f32 %v1498_v39, %v1470_v2  ;;  %v1857_v2 = vld [vmem:[%s4880_s3 + $0x90] sm:$0xff] }
 0x1aa   :  { %v1527_v24 = vpop.f32.mrf.mxu3 }
 0x1ab   :  { %v1443_v54 = vpop.f32.mrf.mxu0  ;;  %v1528_v6 = vadd.f32 %v1527_v24, %v1499_v38 }
 0x1ac   :  { %v1444_v11 = vadd.f32 %v1443_v54, %v1415_v48  ;;  %v1864_v48 = vld [vmem:[%s4880_s3 + $0xc8] sm:$0xff] }
 0x1ad   :  { %1901 = vmatpush.msrb.mxu3 %v1864_v48 }
 0x1ae   :  { %v1472_v14 = vpop.f32.mrf.mxu1 }
 0x1af   :  { %v1473_v56 = vadd.f32 %v1472_v14, %v1444_v11  ;;  %1902 = vmatpush.msrb.mxu3 %v1863_v49 }
 0x1b1   :  { %v1501_v43 = vpop.f32.mrf.mxu2  ;;  %1903 = vmatpush.msrb.mxu3 %v1862_v40  ;;  %v1923_v40 = vld [vmem:[%s4883_s5 + $0x38] sm:$0xff] }
 0x1b2   :  { %v1502_v26 = vadd.f32 %v1501_v43, %v1473_v56  ;;  %v1856_v56 = vld [vmem:[%s4880_s3 + $0x88] sm:$0xff]  ;;  %v1931_v43 = vld [vmem:[%s4883_s5 + $0x78] sm:$0xff] }
 0x1b3   :  { %1904 = vmatpush.msrb.mxu3 %v1861_v62  ;;  %1936 = vmatpush.msra.mxu0 %v1931_v43  ;;  %v1965_v43 = vld [vmem:[%s4885_s7 + $0x40] sm:$0xff] }
 0x1b4   :  { %v1530_v37 = vpop.f32.mrf.mxu3 }
 0x1b5   :  { %v1550_v25 = vpop.f32.mrf.mxu0  ;;  %v1531_v42 = vadd.f32 %v1530_v37, %v1502_v26 }
 0x1b6   :  { %v1551_v21 = vadd.f32 %v1550_v25, %v1522_v30  ;;  %v1860_v30 = vld [vmem:[%s4880_s3 + $0xa8] sm:$0xff] }
 0x1b7   :  { %1905 = vmatpush.msrb.mxu3 %v1860_v30 }
 0x1b8   :  { %v1579_v63 = vpop.f32.mrf.mxu1 }
 0x1b9   :  { %v1580_v34 = vadd.f32 %v1579_v63, %v1551_v21  ;;  %1906 = vmatpush.msrb.mxu3 %v1859_v15  ;;  %v1855_v21 = vld [vmem:[%s4880_s3 + $0x80] sm:$0xff] }
 0x1ba   :  { %v1920_v15 = vld [vmem:[%s4883_s5 + $0x20] sm:$0xff] }
 0x1bb   :  { %1907 = vmatpush.msrb.mxu3 %v1858_v5 }
 0x1bc   :  { %v1608_v18 = vpop.f32.mrf.mxu2 }
 0x1bd   :  { %v1609_v20 = vadd.f32 %v1608_v18, %v1580_v34  ;;  %1908 = vmatpush.msrb.mxu3 %v1857_v2 }
 0x1be   :  { %v1637_v17 = vpop.f32.mrf.mxu3 }
 0x1bf   :  { %v1553_v59 = vpop.f32.mrf.mxu0  ;;  %v1638_v54 = vadd.f32 %v1637_v17, %v1609_v20  ;;  %1909 = vmatpush.msrb.mxu3 %v1856_v56  ;;  %v1916_v56 = vld [vmem:[%s4883_s5] sm:$0xff] }
 0x1c0   :  { %v1554_v41 = vadd.f32 %v1553_v59, %v1525_v60  ;;  %v1930_v59 = vld [vmem:[%s4883_s5 + $0x70] sm:$0xff] }
 0x1c1   :  { %1910 = vmatpush.msrb.mxu3 %v1855_v21  ;;  %1937 = vmatpush.msra.mxu0 %v1930_v59  ;;  %v1969_v21 = vld [vmem:[%s4885_s7 + $0x60] sm:$0xff]  ;;  %v1964_v59 = vld [vmem:[%s4885_s7 + $0x38] sm:$0xff] }
 0x1c2   :  { %v1582_v46 = vpop.f32.mrf.mxu1 }
 0x1c3   :  { %v4697_v16 = vadd.f32 %v1582_v46, %v1554_v41 }
 0x1c5   :  { %v4699_v31 = vpop.f32.mrf.mxu2 }
 0x1c6   :  { %v1612_v24 = vadd.f32 %v4699_v31, %v4697_v16  ;;  %v1929_v16 = vld [vmem:[%s4883_s5 + $0x68] sm:$0xff]  ;;  %v1928_v31 = vld [vmem:[%s4883_s5 + $0x60] sm:$0xff] }
 0x1c7   :  { %1938 = vmatpush.msra.mxu0 %v1929_v16  ;;  %v2010_v16 = vld [vmem:[%s4882_s4] ss:$0 sm:$0xff] }
 0x1c8   :  { %v4701_v52 = vpop.f32.mrf.mxu3 }
 0x1c9   :  { %v1556_v13 = vpop.f32.mrf.mxu0  ;;  %1939 = vmatpush.msra.mxu0 %v1928_v31 }
 0x1ca   :  { %v1557_v35 = vadd.f32 %v1556_v13, %v1528_v6  ;;  %v1641_v13 = vadd.f32 %v4701_v52, %v1612_v24  ;;  %v1968_v24 = vld [vmem:[%s4885_s7 + $0x58] sm:$0xff] }
 0x1cc   :  { %v1585_v33 = vpop.f32.mrf.mxu1 }
 0x1cd   :  { %v1586_v44 = vadd.f32 %v1585_v33, %v1557_v35 }
 0x1cf   :  { %v1614_v55 = vpop.f32.mrf.mxu2 }
 0x1d0   :  { %v1615_v32 = vadd.f32 %v1614_v55, %v1586_v44 }
 0x1d2   :  { %v1643_v45 = vpop.f32.mrf.mxu3 }
 0x1d3   :  { %v1559_v9 = vpop.f32.mrf.mxu0  ;;  %v1644_v39 = vadd.f32 %v1643_v45, %v1615_v32 }
 0x1d4   :  { %v1560_v11 = vadd.f32 %v1559_v9, %v1531_v42  ;;  %v1919_v42 = vld [vmem:[%s4883_s5 + $0x18] sm:$0xff] }
 0x1d6   :  { %v4703_v0 = vpop.f32.mrf.mxu1 }
 0x1d7   :  { %v1589_v63 = vadd.f32 %v4703_v0, %v1560_v11 }
 0x1d9   :  { %v1617_v8 = vpop.f32.mrf.mxu2 }
 0x1da   :  { %v1618_v37 = vadd.f32 %v1617_v8, %v1589_v63  ;;  %v1967_v63 = vld [vmem:[%s4885_s7 + $0x50] sm:$0xff] }
 0x1dc   :  { %v4723_v29 = vpop.f32.mrf.mxu3 }
 0x1dd   :  { %v1666_v61 = vpop.f32.mrf.mxu0  ;;  %v1647_v55 = vadd.f32 %v4723_v29, %v1618_v37  ;;  %v1962_v37 = vld [vmem:[%s4885_s7 + $0x28] sm:$0xff] }
 0x1de   :  { %v1667_v25 = vadd.f32 %v1666_v61, %v1638_v54 }
 0x1df   :  { %v4705_v7 = vpop.f32.mrf.mxu1 }
 0x1e0   :  { %v1696_v46 = vadd.f32 %v4705_v7, %v1667_v25  ;;  %v1927_v7 = vld [vmem:[%s4883_s5 + $0x58] sm:$0xff]  ;;  %v1970_v25 = vld [vmem:[%s4885_s7 + $0x68] sm:$0xff] }
 0x1e1   :  { %1940 = vmatpush.msra.mxu0 %v1927_v7 }
 0x1e3   :  { %1941 = vmatpush.msra.mxu0 %v1926_v1  ;;  %v2012_v1 = vld [vmem:[%s4886_s8] ss:$0 sm:$0xff] }
 0x1e4   :  { %v1724_v28 = vpop.f32.mrf.mxu2 }
 0x1e5   :  { %v4713_v22 = vpop.f32.mrf.mxu0  ;;  %v1725_v17 = vadd.f32 %v1724_v28, %v1696_v46  ;;  %v1924_v28 = vld [vmem:[%s4883_s5 + $0x40] sm:$0xff] }
 0x1e6   :  { %v1753_v47 = vpop.f32.mrf.mxu3  ;;  %v1670_v61 = vadd.f32 %v4713_v22, %v1641_v13  ;;  %v1925_v22 = vld [vmem:[%s4883_s5 + $0x48] sm:$0xff]  ;;  %v1961_v46 = vld [vmem:[%s4885_s7 + $0x20] sm:$0xff] }
 0x1e7   :  { %v1754_v52 = vadd.f32 %v1753_v47, %v1725_v17  ;;  %1942 = vmatpush.msra.mxu0 %v1925_v22  ;;  %v1959_v17 = vld [vmem:[%s4885_s7 + $0x10] sm:$0xff] }
 0x1e8   :  { %v4718_v57 = vpop.f32.mrf.mxu1 }
 0x1e9   :  { %v1699_v8 = vadd.f32 %v4718_v57, %v1670_v61  ;;  %1943 = vmatpush.msra.mxu0 %v1924_v28  ;;  %v1957_v61 = vld [vmem:[%s4885_s7] sm:$0xff] }
 0x1eb   :  { %1944 = vmatpush.msra.mxu0 %v1923_v40 }
 0x1ec   :  { %v1727_v10 = vpop.f32.mrf.mxu2 }
 0x1ed   :  { %v1728_v51 = vadd.f32 %v1727_v10, %v1699_v8 }
 0x1ee   :  { %v1672_v12 = vpop.f32.mrf.mxu0  ;;  %v1756_v60 = vpop.f32.mrf.mxu3 }
 0x1ef   :  { %v1673_v34 = vadd.f32 %v1672_v12, %v1644_v39  ;;  %v1757_v62 = vadd.f32 %v1756_v60, %v1728_v51  ;;  %v1832_v60 = vperm.slane %v4618_v4, 1  ;;  %v1972_v4 = vld [vmem:[%s4885_s7 + $0x78] sm:$0xff]  ;;  %v1971_v39 = vld [vmem:[%s4885_s7 + $0x70] sm:$0xff] }
 0x1f0   :  { %v1701_v50 = vpop.f32.mrf.mxu1  ;;  %1977 = vmatpush.msra.mxu1 %v1972_v4 }
 0x1f1   :  { %v1702_v33 = vadd.f32 %v1701_v50, %v1673_v34  ;;  %v1966_v34 = vld [vmem:[%s4885_s7 + $0x48] sm:$0xff] }
 0x1f2   :  { %1978 = vmatpush.msra.mxu1 %v1971_v39 }
 0x1f4   :  { %v1730_v41 = vpop.f32.mrf.mxu2  ;;  %1979 = vmatpush.msra.mxu1 %v1970_v25 }
 0x1f5   :  { %v1731_v45 = vadd.f32 %v1730_v41, %v1702_v33  ;;  %v1963_v41 = vld [vmem:[%s4885_s7 + $0x30] sm:$0xff] }
 0x1f6   :  { %v1675_v58 = vpop.f32.mrf.mxu0  ;;  %v1759_v9 = vpop.f32.mrf.mxu3  ;;  %1980 = vmatpush.msra.mxu1 %v1969_v21 }
 0x1f7   :  { %v1676_v3 = vadd.f32 %v1675_v58, %v1647_v55  ;;  %v1760_v53 = vadd.f32 %v1759_v9, %v1731_v45  ;;  %v1922_v58 = vld [vmem:[%s4883_s5 + $0x30] sm:$0xff]  ;;  %v1958_v55 = vld [vmem:[%s4885_s7 + $0x8] sm:$0xff]  ;;  %v2011_v45 = vld [vmem:[%s4884_s6] ss:$0 sm:$0xff] }
 0x1f8   :  { %v1704_v23 = vpop.f32.mrf.mxu1  ;;  %1945 = vmatpush.msra.mxu0 %v1922_v58  ;;  %1981 = vmatpush.msra.mxu1 %v1968_v24 }
 0x1f9   :  { %v1705_v12 = vadd.f32 %v1704_v23, %v1676_v3  ;;  %v1921_v23 = vld [vmem:[%s4883_s5 + $0x28] sm:$0xff] }
 0x1fa   :  { %1946 = vmatpush.msra.mxu0 %v1921_v23  ;;  %1982 = vmatpush.msra.mxu1 %v1967_v63 }
 0x1fc   :  { %1947 = vmatpush.msra.mxu0 %v1920_v15  ;;  %1983 = vmatpush.msra.mxu1 %v1966_v34 }
 0x1fd   :  { %v1733_v29 = vpop.f32.mrf.mxu2 }
 0x1fe   :  { %v1782_v19 = vpop.f32.mrf.mxu0  ;;  %v1734_v38 = vadd.f32 %v1733_v29, %v1705_v12  ;;  %1948 = vmatpush.msra.mxu0 %v1919_v42  ;;  %1984 = vmatpush.msra.mxu1 %v1965_v43 }
 0x1ff   :  { %v1783_v27 = vadd.f32 %v1782_v19, %v1754_v52  ;;  %v1762_v47 = vpop.f32.mrf.mxu3  ;;  %v1918_v19 = vld [vmem:[%s4883_s5 + $0x10] sm:$0xff] }
 0x200   :  { %v1811_v14 = vpop.f32.mrf.mxu1  ;;  %v1763_v35 = vadd.f32 %v1762_v47, %v1734_v38  ;;  %1949 = vmatpush.msra.mxu0 %v1918_v19  ;;  %1985 = vmatpush.msra.mxu1 %v1964_v59 }
 0x201   :  { %v1812_v57 = vadd.f32 %v1811_v14, %v1783_v27  ;;  %v1917_v14 = vld [vmem:[%s4883_s5 + $0x8] sm:$0xff] }
 0x202   :  { %1950 = vmatpush.msra.mxu0 %v1917_v14  ;;  %1986 = vmatpush.msra.mxu1 %v1963_v41 }
 0x204   :  { %1951 = vmatpush.msra.mxu0 %v1916_v56  ;;  %1987 = vmatpush.msra.mxu1 %v1962_v37 }
 0x206   :  { %v1785_v18 = vpop.f32.mrf.mxu0  ;;  %1988 = vmatpush.msra.mxu1 %v1961_v46 }
 0x207   :  { %v1786_v30 = vadd.f32 %v1785_v18, %v1757_v62  ;;  %v1960_v18 = vld [vmem:[%s4885_s7 + $0x18] sm:$0xff] }
 0x208   :  { %v1814_v0 = vpop.f32.mrf.mxu1  ;;  %1989 = vmatpush.msra.mxu1 %v1960_v18 }
 0x209   :  { %v1815_v44 = vadd.f32 %v1814_v0, %v1786_v30 }
 0x20a   :  { %1990 = vmatpush.msra.mxu1 %v1959_v17 }
 0x20b   :  { %v1892_v13 = vpop.f32.mrf.mxu2 }
 0x20c   :  { %v1893_v33 = vadd.f32 %v2010_v16, %v1892_v13  ;;  %1991 = vmatpush.msra.mxu1 %v1958_v55 }
 0x20e   :  { %v1788_v36 = vpop.f32.mrf.mxu0  ;;  %1992 = vmatpush.msra.mxu1 %v1957_v61 }
 0x20f   :  { %v1789_v48 = vadd.f32 %v1788_v36, %v1760_v53 }
 0x210   :  { %v1817_v50 = vpop.f32.mrf.mxu1 }
 0x211   :  { %v1818_v49 = vadd.f32 %v1817_v50, %v1789_v48 }
 0x213   :  { %v1826_v6 = vmax.f32 %v1812_v57, %v1818_v49 }
 0x216   :  { %v1791_v26 = vpop.f32.mrf.mxu0 }
 0x217   :  { %v1792_v10 = vadd.f32 %v1791_v26, %v1763_v35 }
 0x218   :  { %v1820_v20 = vpop.f32.mrf.mxu1 }
 0x219   :  { %v1821_v5 = vadd.f32 %v1820_v20, %v1792_v10 }
 0x21b   :  { %v1827_v32 = vmax.f32 %v1815_v44, %v1821_v5 }
 0x21d   :  { %v1828_v2 = vmax.f32 %v1826_v6, %v1827_v32 }
 0x21f   :  { %v1836_v54 = vadd.f32 %v1832_v60, %v1828_v2 }
 0x221   :  { %v1838_v11 = vmax.f32 %v1836_v54, 0.0 }
 0x223   :  { %1911 = vmatmul.f32.vlgmr.msrb.gmra.mxu3 %v1838_v11 }
 0x2a6   :  { %v1912_v31 = vpop.f32.mrf.mxu3 }
 0x2a7   :  { %v1913_v9 = vadd.f32 %v1912_v31, %v1893_v33 }
 0x2a9   :  { %v1915_v0 = vmax.f32 %v1913_v9, 0.0 }
 0x2ab   :  { %1952 = vmatmul.f32.vlgmr.msra.gmra.mxu0 %v1915_v0 }
 0x328   :  { %v1953_v7 = vpop.f32.mrf.mxu0 }
 0x329   :  { %v1954_v52 = vadd.f32 %v2011_v45, %v1953_v7 }
 0x32b   :  { %v1956_v3 = vmax.f32 %v1954_v52, 0.0 }
 0x32d   :  { %1993 = vmatmul.f32.vlgmr.msra.gmra.mxu1 %v1956_v3 }
 0x3aa   :  { %v1994_v8 = vpop.f32.mrf.mxu1 }
 0x3ab   :  { %v1995_v53 = vadd.f32 %v2012_v1, %v1994_v8 }
 0x3ad   :  { %1997 = vst [vmem:[%s4887_s9] sm:$0xff] %v1995_v53 }

</bundles_post_ra>
